<compile_context>
chip_gen: v7x
topology: tpu7x:2x2x1
jax: 0.10.0
libtpu: 0.0.40
codegen_flags: <defaults>
</compile_context>

<pallas_src>
import functools

import jax
import jax.numpy as jnp
import numpy as np
from jax import lax
from jax.experimental import pallas as pl
from jax.experimental.pallas import tpu as pltpu


def _basic_block_kernel(x_ref, w1_ref, w2_ref, b1_ref, b2_ref, o_ref,
                        xbuf, col_s, *, H, W, CP, PAD):
    """One grid step = one image.

      x_ref  : (1, H, W, CP)   channel-padded input (also the residual)
      w1_ref : (9*CP, CP)      conv1 weights, BN1 scale folded, im2col layout, bf16
      w2_ref : (9*CP, CP)      conv2 weights, BN2 scale folded, im2col layout, bf16
      b1_ref : (1, CP)         folded BN1 shift (f32)
      b2_ref : (1, CP)         folded BN2 shift (f32)
      o_ref  : (1, H, W, CP)
      xbuf   : (HW+2*PAD, CP)  f32 flat row buffer with zero halo bands
      col_s  : (HW, 9*CP)      bf16 im2col slab
    """
    f32 = jnp.float32
    bf16 = jnp.bfloat16
    HW = H * W
    BUF = xbuf.shape[0]

    # ---- zero only the halo bands (re-done every grid step so the kernel is
    #      correct when the batch axis is sharded across TensorCores) --------
    xbuf[0:PAD, :] = jnp.zeros((PAD, CP), f32)
    xbuf[PAD + HW:BUF, :] = jnp.zeros((BUF - PAD - HW, CP), f32)

    # ---- hoisted column-boundary masks (multiplicative, f32, lane-broadcast)
    wcol = lax.broadcasted_iota(jnp.int32, (HW, 1), 0) % W
    mask_l = (wcol != 0).astype(f32)        # pixel column 0 has no left neighbour
    mask_r = (wcol != (W - 1)).astype(f32)  # pixel column W-1 has no right neighbour

    def build_im2col():
        # (HW, 9*CP) bf16 slab: tap t = dy*3+dx occupies lanes [t*CP, (t+1)*CP)
        for dy in range(3):
            for dx in range(3):
                t = dy * 3 + dx
                start = PAD + (dy - 1) * W + (dx - 1)      # static offset
                patch = xbuf[start:start + HW, :]          # (HW, CP) f32
                if dx == 0:
                    patch = patch * mask_l
                elif dx == 2:
                    patch = patch * mask_r
                col_s[:, t * CP:(t + 1) * CP] = patch.astype(bf16)

    # ---- conv1 (BN1 scale folded into weights) -> +shift -> relu -----------
    xbuf[PAD:PAD + HW, :] = x_ref[0].reshape(HW, CP)
    build_im2col()
    y = jnp.dot(col_s[...], w1_ref[...], preferred_element_type=f32)
    y = jnp.maximum(y + b1_ref[...], 0.0)

    # ---- conv2 -> +shift -> +identity -> relu -------------------------------
    xbuf[PAD:PAD + HW, :] = y          # halo bands are still zero
    build_im2col()
    y = jnp.dot(col_s[...], w2_ref[...], preferred_element_type=f32)
    y = jnp.maximum(y + b2_ref[...] + x_ref[0].reshape(HW, CP), 0.0)
    o_ref[0] = y.reshape(H, W, CP)


def basic_block_forward(x_nhwc, w1, w2, scale1, shift1, scale2, shift2):
    """x_nhwc: (N, H, W, Cin) float32, weights HWIO. Returns (N, H, W, Cout)."""
    N, H, W, Cin = x_nhwc.shape
    Cout = w1.shape[-1]
    assert Cin == Cout, "identity add requires inplanes == planes (no downsample)"

    f32 = jnp.float32
    bf16 = jnp.bfloat16
    CP = 128                                  # lane-dense padded channel count
    assert Cin <= CP and Cout <= CP
    HW = H * W
    PAD = ((W + 1 + 7) // 8) * 8              # sublane-aligned halo rows (>= W+1)
    BUF = HW + 2 * PAD

    # ---- host-side prep: fold BN scales into weights, pad channels, bf16 ----
    w1f = (w1 * scale1[None, None, None, :]).astype(f32)
    w2f = (w2 * scale2[None, None, None, :]).astype(f32)
    w1p = jnp.zeros((3, 3, CP, CP), f32).at[:, :, :Cin, :Cout].set(w1f)
    w2p = jnp.zeros((3, 3, CP, CP), f32).at[:, :, :Cout, :Cout].set(w2f)
    w1flat = w1p.reshape(9 * CP, CP).astype(bf16)   # im2col (tap-major) layout
    w2flat = w2p.reshape(9 * CP, CP).astype(bf16)

    b1 = jnp.zeros((1, CP), f32).at[0, :Cout].set(shift1.astype(f32))
    b2 = jnp.zeros((1, CP), f32).at[0, :Cout].set(shift2.astype(f32))

    xp = jnp.zeros((N, H, W, CP), f32).at[..., :Cin].set(x_nhwc.astype(f32))

    kernel = functools.partial(_basic_block_kernel, H=H, W=W, CP=CP, PAD=PAD)

    flops = 2 * 2 * N * HW * (9 * CP) * CP
    bytes_accessed = (4 * 2 * N * HW * CP            # input + output (f32)
                      + 2 * 2 * 9 * CP * CP          # two bf16 weight slabs
                      + 2 * 4 * CP)                  # biases

    out = pl.pallas_call(
        kernel,
        out_shape=jax.ShapeDtypeStruct((N, H, W, CP), f32),
        grid_spec=pltpu.PrefetchScalarGridSpec(
            num_scalar_prefetch=0,
            grid=(N,),
            in_specs=[
                pl.BlockSpec((1, H, W, CP), lambda n: (n, 0, 0, 0)),
                pl.BlockSpec((9 * CP, CP), lambda n: (0, 0)),
                pl.BlockSpec((9 * CP, CP), lambda n: (0, 0)),
                pl.BlockSpec((1, CP), lambda n: (0, 0)),
                pl.BlockSpec((1, CP), lambda n: (0, 0)),
            ],
            out_specs=pl.BlockSpec((1, H, W, CP), lambda n: (n, 0, 0, 0)),
            scratch_shapes=[
                pltpu.VMEM((BUF, CP), f32),          # flat padded row buffer
                pltpu.VMEM((HW, 9 * CP), bf16),      # im2col slab
            ],
        ),
        compiler_params=pltpu.CompilerParams(
            dimension_semantics=("parallel",)),      # images independent (v7x 2 TCs)
        cost_estimate=pl.CostEstimate(
            flops=flops, transcendentals=0, bytes_accessed=bytes_accessed),
    )(xp, w1flat, w2flat, b1, b2)

    return out[..., :Cout]


def _reference(x_nhwc, w1, w2, s1, b1, s2, b2):
    dn = ("NHWC", "HWIO", "NHWC")
    out = lax.conv_general_dilated(x_nhwc, w1, (1, 1), "SAME",
                                   dimension_numbers=dn)
    out = jnp.maximum(out * s1 + b1, 0.0)
    out = lax.conv_general_dilated(out, w2, (1, 1), "SAME",
                                   dimension_numbers=dn)
    out = out * s2 + b2 + x_nhwc
    return jnp.maximum(out, 0.0)


if __name__ == "__main__":
    # BasicBlock(inplanes=4, planes=4, stride=1, downsample=None), eval mode
    N, C, H, W = 2, 4, 16, 16
    planes = C
    eps = 1e-5

    keys = jax.random.split(jax.random.PRNGKey(0), 10)
    x_nchw = jax.random.normal(keys[0], (N, C, H, W), jnp.float32)

    # conv weights in HWIO layout (== torch weight.permute(2, 3, 1, 0))
    w1 = jax.random.normal(keys[1], (3, 3, C, planes), jnp.float32) * 0.1
    w2 = jax.random.normal(keys[2], (3, 3, planes, planes), jnp.float32) * 0.1

    # BatchNorm parameters (inference mode, deterministic)
    gamma1 = jax.random.uniform(keys[3], (planes,), minval=0.5, maxval=1.5)
    beta1 = jax.random.normal(keys[4], (planes,)) * 0.1
    mean1 = jax.random.normal(keys[5], (planes,)) * 0.1
    var1 = jax.random.uniform(keys[6], (planes,), minval=0.5, maxval=1.5)
    gamma2 = jax.random.uniform(keys[7], (planes,), minval=0.5, maxval=1.5)
    beta2 = jax.random.normal(keys[8], (planes,)) * 0.1
    mean2 = jax.random.normal(keys[9], (planes,)) * 0.1
    var2 = jnp.linspace(0.6, 1.4, planes).astype(jnp.float32)

    # fold eval-mode BatchNorm into per-channel scale/shift
    scale1 = gamma1 / jnp.sqrt(var1 + eps)
    shift1 = beta1 - mean1 * scale1
    scale2 = gamma2 / jnp.sqrt(var2 + eps)
    shift2 = beta2 - mean2 * scale2

    # NCHW (PyTorch) -> NHWC (kernel layout)
    x_nhwc = jnp.transpose(x_nchw, (0, 2, 3, 1))

    out = basic_block_forward(x_nhwc, w1, w2, scale1, shift1, scale2, shift2)
    out = jax.block_until_ready(out)

    ref = _reference(x_nhwc, w1, w2,
                     scale1.reshape(1, 1, 1, -1), shift1.reshape(1, 1, 1, -1),
                     scale2.reshape(1, 1, 1, -1), shift2.reshape(1, 1, 1, -1))
    # bf16 MXU operands with f32 accumulation -> tolerance loosened vs pure f32
    np.testing.assert_allclose(np.asarray(out), np.asarray(ref),
                               rtol=2e-2, atol=2e-2)
    print("KERNEL_OK")
</pallas_src>

<mosaic_0001>
module attributes {stable_mosaic.version = 11 : i64} {
  func.func @_basic_block_kernel(%arg0: i32, %arg1: memref<1x16x16x128xf32, #tpu.memory_space<vmem>>, %arg2: memref<1152x128xbf16, #tpu.memory_space<vmem>>, %arg3: memref<1152x128xbf16, #tpu.memory_space<vmem>>, %arg4: memref<1x128xf32, #tpu.memory_space<vmem>>, %arg5: memref<1x128xf32, #tpu.memory_space<vmem>>, %arg6: memref<1x16x16x128xf32, #tpu.memory_space<vmem>>, %arg7: memref<304x128xf32, #tpu.memory_space<vmem>>, %arg8: memref<256x1152xbf16, #tpu.memory_space<vmem>>) attributes {dimension_semantics = [#tpu.dimension_semantics<parallel>], iteration_bounds = array<i64: 2>, scalar_prefetch = 0 : i64, scratch_operands = 2 : i64, tpu.core_type = #tpu.core_type<tc>, window_params = [{transform_indices = @transform_0, window_bounds = array<i64: 1, 16, 16, 128>}, {pipeline_mode = #tpu.pipeline_mode<synchronous>, transform_indices = @transform_1, window_bounds = array<i64: 1152, 128>}, {pipeline_mode = #tpu.pipeline_mode<synchronous>, transform_indices = @transform_2, window_bounds = array<i64: 1152, 128>}, {pipeline_mode = #tpu.pipeline_mode<synchronous>, transform_indices = @transform_3, window_bounds = array<i64: 1, 128>}, {pipeline_mode = #tpu.pipeline_mode<synchronous>, transform_indices = @transform_4, window_bounds = array<i64: 1, 128>}, {transform_indices = @transform_5, window_bounds = array<i64: 1, 16, 16, 128>}]} {
    %cst = arith.constant 0.000000e+00 : f32
    %0 = vector.broadcast %cst : f32 to vector<24x128xf32>
    %c0 = arith.constant 0 : index
    %c0_0 = arith.constant 0 : index
    %1 = vector.load %arg7[%c0, %c0_0] : memref<304x128xf32, #tpu.memory_space<vmem>>, vector<24x128xf32>
    tpu.vector_store %arg7[%c0, %c0_0], %0 {strides = array<i32>} : memref<304x128xf32, #tpu.memory_space<vmem>>, vector<24x128xf32>,
    %cst_1 = arith.constant 0.000000e+00 : f32
    %2 = vector.broadcast %cst_1 : f32 to vector<24x128xf32>
    %c280 = arith.constant 280 : index
    %c0_2 = arith.constant 0 : index
    %3 = vector.load %arg7[%c280, %c0_2] : memref<304x128xf32, #tpu.memory_space<vmem>>, vector<24x128xf32>
    tpu.vector_store %arg7[%c280, %c0_2], %2 {strides = array<i32>} : memref<304x128xf32, #tpu.memory_space<vmem>>, vector<24x128xf32>,
    %4 = tpu.iota {dimensions = array<i32: 0>} : vector<256x1xi32>
    %c16_i32 = arith.constant 16 : i32
    %c0_i32 = arith.constant 0 : i32
    %5 = arith.cmpi eq, %c16_i32, %c0_i32 : i32
    %c1_i32 = arith.constant 1 : i32
    %6 = arith.select %5, %c1_i32, %c16_i32 : i32
    %7 = vector.broadcast %6 : i32 to vector<256x1xi32>
    %8 = arith.remsi %4, %7 : vector<256x1xi32>
    %c0_i32_3 = arith.constant 0 : i32
    %9 = vector.broadcast %c0_i32_3 : i32 to vector<256x1xi32>
    %10 = arith.cmpi ne, %8, %9 : vector<256x1xi32>
    %c0_i32_4 = arith.constant 0 : i32
    %11 = vector.broadcast %c0_i32_4 : i32 to vector<256x1xi32>
    %12 = arith.cmpi slt, %8, %11 : vector<256x1xi32>
    %c0_i32_5 = arith.constant 0 : i32
    %13 = arith.cmpi slt, %6, %c0_i32_5 : i32
    %14 = vector.broadcast %13 : i1 to vector<256x1xi1>
    %15 = vector.broadcast %14 : vector<256x1xi1> to vector<256x1xi1>
    %16 = arith.xori %12, %15 : vector<256x1xi1>
    %17 = arith.andi %16, %10 : vector<256x1xi1>
    %18 = vector.broadcast %6 : i32 to vector<256x1xi32>
    %19 = arith.addi %8, %18 : vector<256x1xi32>
    %20 = arith.select %17, %19, %8 : vector<256x1xi1>, vector<256x1xi32>
    %c0_i32_6 = arith.constant 0 : i32
    %21 = vector.broadcast %c0_i32_6 : i32 to vector<256x1xi32>
    %22 = arith.cmpi ne, %20, %21 : vector<256x1xi32>
    %23 = arith.extui %22 : vector<256x1xi1> to vector<256x1xi32>
    %24 = arith.sitofp %23 : vector<256x1xi32> to vector<256x1xf32>
    %c15_i32 = arith.constant 15 : i32
    %25 = vector.broadcast %c15_i32 : i32 to vector<256x1xi32>
    %26 = arith.cmpi ne, %20, %25 : vector<256x1xi32>
    %27 = arith.extui %26 : vector<256x1xi1> to vector<256x1xi32>
    %28 = arith.sitofp %27 : vector<256x1xi32> to vector<256x1xf32>
    %c0_7 = arith.constant 0 : index
    %c0_8 = arith.constant 0 : index
    %c0_9 = arith.constant 0 : index
    %c0_10 = arith.constant 0 : index
    %29 = vector.load %arg1[%c0_7, %c0_8, %c0_9, %c0_10] : memref<1x16x16x128xf32, #tpu.memory_space<vmem>>, vector<1x16x16x128xf32>
    %30 = vector.shape_cast %29 : vector<1x16x16x128xf32> to vector<16x16x128xf32>
    %31 = vector.shape_cast %30 : vector<16x16x128xf32> to vector<256x128xf32>
    %c24 = arith.constant 24 : index
    %c0_11 = arith.constant 0 : index
    %32 = vector.load %arg7[%c24, %c0_11] : memref<304x128xf32, #tpu.memory_space<vmem>>, vector<256x128xf32>
    tpu.vector_store %arg7[%c24, %c0_11], %31 {strides = array<i32>} : memref<304x128xf32, #tpu.memory_space<vmem>>, vector<256x128xf32>,
    %c7 = arith.constant 7 : index
    %c0_12 = arith.constant 0 : index
    %33 = vector.load %arg7[%c7, %c0_12] : memref<304x128xf32, #tpu.memory_space<vmem>>, vector<256x128xf32>
    %34 = vector.broadcast %24 : vector<256x1xf32> to vector<256x128xf32>
    %35 = arith.mulf %33, %34 : vector<256x128xf32>
    %36 = arith.truncf %35 : vector<256x128xf32> to vector<256x128xbf16>
    %c0_13 = arith.constant 0 : index
    %c0_14 = arith.constant 0 : index
    %37 = vector.load %arg8[%c0_13, %c0_14] : memref<256x1152xbf16, #tpu.memory_space<vmem>>, vector<256x128xbf16>
    tpu.vector_store %arg8[%c0_13, %c0_14], %36 {strides = array<i32>} : memref<256x1152xbf16, #tpu.memory_space<vmem>>, vector<256x128xbf16>,
    %c8 = arith.constant 8 : index
    %c0_15 = arith.constant 0 : index
    %38 = vector.load %arg7[%c8, %c0_15] : memref<304x128xf32, #tpu.memory_space<vmem>>, vector<256x128xf32>
    %39 = arith.truncf %38 : vector<256x128xf32> to vector<256x128xbf16>
    %c0_16 = arith.constant 0 : index
    %c128 = arith.constant 128 : index
    %40 = vector.load %arg8[%c0_16, %c128] : memref<256x1152xbf16, #tpu.memory_space<vmem>>, vector<256x128xbf16>
    tpu.vector_store %arg8[%c0_16, %c128], %39 {strides = array<i32>} : memref<256x1152xbf16, #tpu.memory_space<vmem>>, vector<256x128xbf16>,
    %c9 = arith.constant 9 : index
    %c0_17 = arith.constant 0 : index
    %41 = vector.load %arg7[%c9, %c0_17] : memref<304x128xf32, #tpu.memory_space<vmem>>, vector<256x128xf32>
    %42 = vector.broadcast %28 : vector<256x1xf32> to vector<256x128xf32>
    %43 = arith.mulf %41, %42 : vector<256x128xf32>
    %44 = arith.truncf %43 : vector<256x128xf32> to vector<256x128xbf16>
    %c0_18 = arith.constant 0 : index
    %c256 = arith.constant 256 : index
    %45 = vector.load %arg8[%c0_18, %c256] : memref<256x1152xbf16, #tpu.memory_space<vmem>>, vector<256x128xbf16>
    tpu.vector_store %arg8[%c0_18, %c256], %44 {strides = array<i32>} : memref<256x1152xbf16, #tpu.memory_space<vmem>>, vector<256x128xbf16>,
    %c23 = arith.constant 23 : index
    %c0_19 = arith.constant 0 : index
    %46 = vector.load %arg7[%c23, %c0_19] : memref<304x128xf32, #tpu.memory_space<vmem>>, vector<256x128xf32>
    %47 = vector.broadcast %24 : vector<256x1xf32> to vector<256x128xf32>
    %48 = arith.mulf %46, %47 : vector<256x128xf32>
    %49 = arith.truncf %48 : vector<256x128xf32> to vector<256x128xbf16>
    %c0_20 = arith.constant 0 : index
    %c384 = arith.constant 384 : index
    %50 = vector.load %arg8[%c0_20, %c384] : memref<256x1152xbf16, #tpu.memory_space<vmem>>, vector<256x128xbf16>
    tpu.vector_store %arg8[%c0_20, %c384], %49 {strides = array<i32>} : memref<256x1152xbf16, #tpu.memory_space<vmem>>, vector<256x128xbf16>,
    %c24_21 = arith.constant 24 : index
    %c0_22 = arith.constant 0 : index
    %51 = vector.load %arg7[%c24_21, %c0_22] : memref<304x128xf32, #tpu.memory_space<vmem>>, vector<256x128xf32>
    %52 = arith.truncf %51 : vector<256x128xf32> to vector<256x128xbf16>
    %c0_23 = arith.constant 0 : index
    %c512 = arith.constant 512 : index
    %53 = vector.load %arg8[%c0_23, %c512] : memref<256x1152xbf16, #tpu.memory_space<vmem>>, vector<256x128xbf16>
    tpu.vector_store %arg8[%c0_23, %c512], %52 {strides = array<i32>} : memref<256x1152xbf16, #tpu.memory_space<vmem>>, vector<256x128xbf16>,
    %c25 = arith.constant 25 : index
    %c0_24 = arith.constant 0 : index
    %54 = vector.load %arg7[%c25, %c0_24] : memref<304x128xf32, #tpu.memory_space<vmem>>, vector<256x128xf32>
    %55 = vector.broadcast %28 : vector<256x1xf32> to vector<256x128xf32>
    %56 = arith.mulf %54, %55 : vector<256x128xf32>
    %57 = arith.truncf %56 : vector<256x128xf32> to vector<256x128xbf16>
    %c0_25 = arith.constant 0 : index
    %c640 = arith.constant 640 : index
    %58 = vector.load %arg8[%c0_25, %c640] : memref<256x1152xbf16, #tpu.memory_space<vmem>>, vector<256x128xbf16>
    tpu.vector_store %arg8[%c0_25, %c640], %57 {strides = array<i32>} : memref<256x1152xbf16, #tpu.memory_space<vmem>>, vector<256x128xbf16>,
    %c39 = arith.constant 39 : index
    %c0_26 = arith.constant 0 : index
    %59 = vector.load %arg7[%c39, %c0_26] : memref<304x128xf32, #tpu.memory_space<vmem>>, vector<256x128xf32>
    %60 = vector.broadcast %24 : vector<256x1xf32> to vector<256x128xf32>
    %61 = arith.mulf %59, %60 : vector<256x128xf32>
    %62 = arith.truncf %61 : vector<256x128xf32> to vector<256x128xbf16>
    %c0_27 = arith.constant 0 : index
    %c768 = arith.constant 768 : index
    %63 = vector.load %arg8[%c0_27, %c768] : memref<256x1152xbf16, #tpu.memory_space<vmem>>, vector<256x128xbf16>
    tpu.vector_store %arg8[%c0_27, %c768], %62 {strides = array<i32>} : memref<256x1152xbf16, #tpu.memory_space<vmem>>, vector<256x128xbf16>,
    %c40 = arith.constant 40 : index
    %c0_28 = arith.constant 0 : index
    %64 = vector.load %arg7[%c40, %c0_28] : memref<304x128xf32, #tpu.memory_space<vmem>>, vector<256x128xf32>
    %65 = arith.truncf %64 : vector<256x128xf32> to vector<256x128xbf16>
    %c0_29 = arith.constant 0 : index
    %c896 = arith.constant 896 : index
    %66 = vector.load %arg8[%c0_29, %c896] : memref<256x1152xbf16, #tpu.memory_space<vmem>>, vector<256x128xbf16>
    tpu.vector_store %arg8[%c0_29, %c896], %65 {strides = array<i32>} : memref<256x1152xbf16, #tpu.memory_space<vmem>>, vector<256x128xbf16>,
    %c41 = arith.constant 41 : index
    %c0_30 = arith.constant 0 : index
    %67 = vector.load %arg7[%c41, %c0_30] : memref<304x128xf32, #tpu.memory_space<vmem>>, vector<256x128xf32>
    %68 = vector.broadcast %28 : vector<256x1xf32> to vector<256x128xf32>
    %69 = arith.mulf %67, %68 : vector<256x128xf32>
    %70 = arith.truncf %69 : vector<256x128xf32> to vector<256x128xbf16>
    %c0_31 = arith.constant 0 : index
    %c1024 = arith.constant 1024 : index
    %71 = vector.load %arg8[%c0_31, %c1024] : memref<256x1152xbf16, #tpu.memory_space<vmem>>, vector<256x128xbf16>
    tpu.vector_store %arg8[%c0_31, %c1024], %70 {strides = array<i32>} : memref<256x1152xbf16, #tpu.memory_space<vmem>>, vector<256x128xbf16>,
    %c0_32 = arith.constant 0 : index
    %c0_33 = arith.constant 0 : index
    %72 = vector.load %arg8[%c0_32, %c0_33] : memref<256x1152xbf16, #tpu.memory_space<vmem>>, vector<256x1152xbf16>
    %c0_34 = arith.constant 0 : index
    %c0_35 = arith.constant 0 : index
    %73 = vector.load %arg2[%c0_34, %c0_35] : memref<1152x128xbf16, #tpu.memory_space<vmem>>, vector<1152x128xbf16>
    %cst_36 = arith.constant dense<0.000000e+00> : vector<256x128xf32>
    %74 = tpu.matmul %72, %73, %cst_36 {dimension_numbers = #tpu.dot_dimension_numbers<[1], [0], [0], [1], [0, 0, 1, 1], [], []>} : vector<256x1152xbf16>, vector<1152x128xbf16>, vector<256x128xf32> -> vector<256x128xf32>
    %c0_37 = arith.constant 0 : index
    %c0_38 = arith.constant 0 : index
    %75 = vector.load %arg4[%c0_37, %c0_38] : memref<1x128xf32, #tpu.memory_space<vmem>>, vector<1x128xf32>
    %76 = vector.broadcast %75 : vector<1x128xf32> to vector<256x128xf32>
    %77 = arith.addf %74, %76 : vector<256x128xf32>
    %cst_39 = arith.constant 0.000000e+00 : f32
    %78 = vector.broadcast %cst_39 : f32 to vector<256x128xf32>
    %79 = arith.maximumf %77, %78 : vector<256x128xf32>
    %c24_40 = arith.constant 24 : index
    %c0_41 = arith.constant 0 : index
    %80 = vector.load %arg7[%c24_40, %c0_41] : memref<304x128xf32, #tpu.memory_space<vmem>>, vector<256x128xf32>
    tpu.vector_store %arg7[%c24_40, %c0_41], %79 {strides = array<i32>} : memref<304x128xf32, #tpu.memory_space<vmem>>, vector<256x128xf32>,
    %c7_42 = arith.constant 7 : index
    %c0_43 = arith.constant 0 : index
    %81 = vector.load %arg7[%c7_42, %c0_43] : memref<304x128xf32, #tpu.memory_space<vmem>>, vector<256x128xf32>
    %82 = vector.broadcast %24 : vector<256x1xf32> to vector<256x128xf32>
    %83 = arith.mulf %81, %82 : vector<256x128xf32>
    %84 = arith.truncf %83 : vector<256x128xf32> to vector<256x128xbf16>
    %c0_44 = arith.constant 0 : index
    %c0_45 = arith.constant 0 : index
    %85 = vector.load %arg8[%c0_44, %c0_45] : memref<256x1152xbf16, #tpu.memory_space<vmem>>, vector<256x128xbf16>
    tpu.vector_store %arg8[%c0_44, %c0_45], %84 {strides = array<i32>} : memref<256x1152xbf16, #tpu.memory_space<vmem>>, vector<256x128xbf16>,
    %c8_46 = arith.constant 8 : index
    %c0_47 = arith.constant 0 : index
    %86 = vector.load %arg7[%c8_46, %c0_47] : memref<304x128xf32, #tpu.memory_space<vmem>>, vector<256x128xf32>
    %87 = arith.truncf %86 : vector<256x128xf32> to vector<256x128xbf16>
    %c0_48 = arith.constant 0 : index
    %c128_49 = arith.constant 128 : index
    %88 = vector.load %arg8[%c0_48, %c128_49] : memref<256x1152xbf16, #tpu.memory_space<vmem>>, vector<256x128xbf16>
    tpu.vector_store %arg8[%c0_48, %c128_49], %87 {strides = array<i32>} : memref<256x1152xbf16, #tpu.memory_space<vmem>>, vector<256x128xbf16>,
    %c9_50 = arith.constant 9 : index
    %c0_51 = arith.constant 0 : index
    %89 = vector.load %arg7[%c9_50, %c0_51] : memref<304x128xf32, #tpu.memory_space<vmem>>, vector<256x128xf32>
    %90 = vector.broadcast %28 : vector<256x1xf32> to vector<256x128xf32>
    %91 = arith.mulf %89, %90 : vector<256x128xf32>
    %92 = arith.truncf %91 : vector<256x128xf32> to vector<256x128xbf16>
    %c0_52 = arith.constant 0 : index
    %c256_53 = arith.constant 256 : index
    %93 = vector.load %arg8[%c0_52, %c256_53] : memref<256x1152xbf16, #tpu.memory_space<vmem>>, vector<256x128xbf16>
    tpu.vector_store %arg8[%c0_52, %c256_53], %92 {strides = array<i32>} : memref<256x1152xbf16, #tpu.memory_space<vmem>>, vector<256x128xbf16>,
    %c23_54 = arith.constant 23 : index
    %c0_55 = arith.constant 0 : index
    %94 = vector.load %arg7[%c23_54, %c0_55] : memref<304x128xf32, #tpu.memory_space<vmem>>, vector<256x128xf32>
    %95 = vector.broadcast %24 : vector<256x1xf32> to vector<256x128xf32>
    %96 = arith.mulf %94, %95 : vector<256x128xf32>
    %97 = arith.truncf %96 : vector<256x128xf32> to vector<256x128xbf16>
    %c0_56 = arith.constant 0 : index
    %c384_57 = arith.constant 384 : index
    %98 = vector.load %arg8[%c0_56, %c384_57] : memref<256x1152xbf16, #tpu.memory_space<vmem>>, vector<256x128xbf16>
    tpu.vector_store %arg8[%c0_56, %c384_57], %97 {strides = array<i32>} : memref<256x1152xbf16, #tpu.memory_space<vmem>>, vector<256x128xbf16>,
    %c24_58 = arith.constant 24 : index
    %c0_59 = arith.constant 0 : index
    %99 = vector.load %arg7[%c24_58, %c0_59] : memref<304x128xf32, #tpu.memory_space<vmem>>, vector<256x128xf32>
    %100 = arith.truncf %99 : vector<256x128xf32> to vector<256x128xbf16>
    %c0_60 = arith.constant 0 : index
    %c512_61 = arith.constant 512 : index
    %101 = vector.load %arg8[%c0_60, %c512_61] : memref<256x1152xbf16, #tpu.memory_space<vmem>>, vector<256x128xbf16>
    tpu.vector_store %arg8[%c0_60, %c512_61], %100 {strides = array<i32>} : memref<256x1152xbf16, #tpu.memory_space<vmem>>, vector<256x128xbf16>,
    %c25_62 = arith.constant 25 : index
    %c0_63 = arith.constant 0 : index
    %102 = vector.load %arg7[%c25_62, %c0_63] : memref<304x128xf32, #tpu.memory_space<vmem>>, vector<256x128xf32>
    %103 = vector.broadcast %28 : vector<256x1xf32> to vector<256x128xf32>
    %104 = arith.mulf %102, %103 : vector<256x128xf32>
    %105 = arith.truncf %104 : vector<256x128xf32> to vector<256x128xbf16>
    %c0_64 = arith.constant 0 : index
    %c640_65 = arith.constant 640 : index
    %106 = vector.load %arg8[%c0_64, %c640_65] : memref<256x1152xbf16, #tpu.memory_space<vmem>>, vector<256x128xbf16>
    tpu.vector_store %arg8[%c0_64, %c640_65], %105 {strides = array<i32>} : memref<256x1152xbf16, #tpu.memory_space<vmem>>, vector<256x128xbf16>,
    %c39_66 = arith.constant 39 : index
    %c0_67 = arith.constant 0 : index
    %107 = vector.load %arg7[%c39_66, %c0_67] : memref<304x128xf32, #tpu.memory_space<vmem>>, vector<256x128xf32>
    %108 = vector.broadcast %24 : vector<256x1xf32> to vector<256x128xf32>
    %109 = arith.mulf %107, %108 : vector<256x128xf32>
    %110 = arith.truncf %109 : vector<256x128xf32> to vector<256x128xbf16>
    %c0_68 = arith.constant 0 : index
    %c768_69 = arith.constant 768 : index
    %111 = vector.load %arg8[%c0_68, %c768_69] : memref<256x1152xbf16, #tpu.memory_space<vmem>>, vector<256x128xbf16>
    tpu.vector_store %arg8[%c0_68, %c768_69], %110 {strides = array<i32>} : memref<256x1152xbf16, #tpu.memory_space<vmem>>, vector<256x128xbf16>,
    %c40_70 = arith.constant 40 : index
    %c0_71 = arith.constant 0 : index
    %112 = vector.load %arg7[%c40_70, %c0_71] : memref<304x128xf32, #tpu.memory_space<vmem>>, vector<256x128xf32>
    %113 = arith.truncf %112 : vector<256x128xf32> to vector<256x128xbf16>
    %c0_72 = arith.constant 0 : index
    %c896_73 = arith.constant 896 : index
    %114 = vector.load %arg8[%c0_72, %c896_73] : memref<256x1152xbf16, #tpu.memory_space<vmem>>, vector<256x128xbf16>
    tpu.vector_store %arg8[%c0_72, %c896_73], %113 {strides = array<i32>} : memref<256x1152xbf16, #tpu.memory_space<vmem>>, vector<256x128xbf16>,
    %c41_74 = arith.constant 41 : index
    %c0_75 = arith.constant 0 : index
    %115 = vector.load %arg7[%c41_74, %c0_75] : memref<304x128xf32, #tpu.memory_space<vmem>>, vector<256x128xf32>
    %116 = vector.broadcast %28 : vector<256x1xf32> to vector<256x128xf32>
    %117 = arith.mulf %115, %116 : vector<256x128xf32>
    %118 = arith.truncf %117 : vector<256x128xf32> to vector<256x128xbf16>
    %c0_76 = arith.constant 0 : index
    %c1024_77 = arith.constant 1024 : index
    %119 = vector.load %arg8[%c0_76, %c1024_77] : memref<256x1152xbf16, #tpu.memory_space<vmem>>, vector<256x128xbf16>
    tpu.vector_store %arg8[%c0_76, %c1024_77], %118 {strides = array<i32>} : memref<256x1152xbf16, #tpu.memory_space<vmem>>, vector<256x128xbf16>,
    %c0_78 = arith.constant 0 : index
    %c0_79 = arith.constant 0 : index
    %120 = vector.load %arg8[%c0_78, %c0_79] : memref<256x1152xbf16, #tpu.memory_space<vmem>>, vector<256x1152xbf16>
    %c0_80 = arith.constant 0 : index
    %c0_81 = arith.constant 0 : index
    %121 = vector.load %arg3[%c0_80, %c0_81] : memref<1152x128xbf16, #tpu.memory_space<vmem>>, vector<1152x128xbf16>
    %cst_82 = arith.constant dense<0.000000e+00> : vector<256x128xf32>
    %122 = tpu.matmul %120, %121, %cst_82 {dimension_numbers = #tpu.dot_dimension_numbers<[1], [0], [0], [1], [0, 0, 1, 1], [], []>} : vector<256x1152xbf16>, vector<1152x128xbf16>, vector<256x128xf32> -> vector<256x128xf32>
    %c0_83 = arith.constant 0 : index
    %c0_84 = arith.constant 0 : index
    %123 = vector.load %arg5[%c0_83, %c0_84] : memref<1x128xf32, #tpu.memory_space<vmem>>, vector<1x128xf32>
    %124 = vector.broadcast %123 : vector<1x128xf32> to vector<256x128xf32>
    %125 = arith.addf %122, %124 : vector<256x128xf32>
    %c0_85 = arith.constant 0 : index
    %c0_86 = arith.constant 0 : index
    %c0_87 = arith.constant 0 : index
    %c0_88 = arith.constant 0 : index
    %126 = vector.load %arg1[%c0_85, %c0_86, %c0_87, %c0_88] : memref<1x16x16x128xf32, #tpu.memory_space<vmem>>, vector<1x16x16x128xf32>
    %127 = vector.shape_cast %126 : vector<1x16x16x128xf32> to vector<16x16x128xf32>
    %128 = vector.shape_cast %127 : vector<16x16x128xf32> to vector<256x128xf32>
    %129 = arith.addf %125, %128 : vector<256x128xf32>
    %cst_89 = arith.constant 0.000000e+00 : f32
    %130 = vector.broadcast %cst_89 : f32 to vector<256x128xf32>
    %131 = arith.maximumf %129, %130 : vector<256x128xf32>
    %132 = vector.shape_cast %131 : vector<256x128xf32> to vector<16x16x128xf32>
    %c0_90 = arith.constant 0 : index
    %c0_91 = arith.constant 0 : index
    %c0_92 = arith.constant 0 : index
    %c0_93 = arith.constant 0 : index
    %133 = vector.load %arg6[%c0_90, %c0_91, %c0_92, %c0_93] : memref<1x16x16x128xf32, #tpu.memory_space<vmem>>, vector<1x16x16x128xf32>
    %134 = vector.shape_cast %133 : vector<1x16x16x128xf32> to vector<16x16x128xf32>
    %135 = vector.shape_cast %132 : vector<16x16x128xf32> to vector<1x16x16x128xf32>
    tpu.vector_store %arg6[%c0_90, %c0_91, %c0_92, %c0_93], %135 {strides = array<i32>} : memref<1x16x16x128xf32, #tpu.memory_space<vmem>>, vector<1x16x16x128xf32>,
    return
  }
  func.func @transform_0(%arg0: i32) -> (i32, i32, i32, i32) {
    %c0_i32 = arith.constant 0 : i32
    %c0_i32_0 = arith.constant 0 : i32
    %c0_i32_1 = arith.constant 0 : i32
    %c0_i32_2 = arith.constant 0 : i32
    return %arg0, %c0_i32, %c0_i32_0, %c0_i32_1 : i32, i32, i32, i32
  }
  func.func @transform_1(%arg0: i32) -> (i32, i32) {
    %c0_i32 = arith.constant 0 : i32
    %c0_i32_0 = arith.constant 0 : i32
    %c0_i32_1 = arith.constant 0 : i32
    return %c0_i32, %c0_i32_0 : i32, i32
  }
  func.func @transform_2(%arg0: i32) -> (i32, i32) {
    %c0_i32 = arith.constant 0 : i32
    %c0_i32_0 = arith.constant 0 : i32
    %c0_i32_1 = arith.constant 0 : i32
    return %c0_i32, %c0_i32_0 : i32, i32
  }
  func.func @transform_3(%arg0: i32) -> (i32, i32) {
    %c0_i32 = arith.constant 0 : i32
    %c0_i32_0 = arith.constant 0 : i32
    %c0_i32_1 = arith.constant 0 : i32
    return %c0_i32, %c0_i32_0 : i32, i32
  }
  func.func @transform_4(%arg0: i32) -> (i32, i32) {
    %c0_i32 = arith.constant 0 : i32
    %c0_i32_0 = arith.constant 0 : i32
    %c0_i32_1 = arith.constant 0 : i32
    return %c0_i32, %c0_i32_0 : i32, i32
  }
  func.func @transform_5(%arg0: i32) -> (i32, i32, i32, i32) {
    %c0_i32 = arith.constant 0 : i32
    %c0_i32_0 = arith.constant 0 : i32
    %c0_i32_1 = arith.constant 0 : i32
    %c0_i32_2 = arith.constant 0 : i32
    return %arg0, %c0_i32, %c0_i32_0, %c0_i32_1 : i32, i32, i32, i32
  }
}

</mosaic_0001>

<bundles_post_ra>
// kernel: tpu_custom_call.1
= control target key start
LH: loop header
LB: loop body
LE: loop exit
PB: predicated region body
PF: predicated region fallthrough
CT: control target
= control target key end

     0   :  { %10 = vsyncpa [#allocation5], 0  ;;  %s9570_s0 = inlined_call_operand.hbm [shape: f32[2,16,16,128], index: 0, kind: input, shape index: {}]   ;;  %s9571_s1 = inlined_call_operand.hbm [shape: bf16[1152,128], index: 1, kind: input, shape index: {}]   ;;  %s9572_s2 = inlined_call_operand.hbm [shape: bf16[1152,128], index: 2, kind: input, shape index: {}]   ;;  %s9573_s3 = inlined_call_operand.vmem [shape: f32[1,128], index: 3, kind: input, shape index: {}]   ;;  %s9574_s4 = inlined_call_operand.vmem [shape: f32[1,128], index: 4, kind: input, shape index: {}]   ;;  %s9575_s5 = inlined_call_operand.hbm [shape: f32[2,16,16,128], index: 5, kind: output, shape index: {}]  }
   0x1   :  { %12 = vsyncpa [#allocation5 + $0x1], 0 }
   0x2   :  { %13 = vsyncpa [#allocation8], 0 }
   0x3   :  { %14 = vsyncpa [#allocation6], 0 }
   0x4   :  { %16 = vsyncpa [#allocation6 + $0x1], 0  ;;  %s7515_s18 = smov 0   ;;  %s7517_s19 = smov 0  }
   0x5   :  { %s7519_s20 = smov 0   ;;  %s7521_s21 = smov 0  }
   0x6 LB: > { %s7536_s22 = sadd.s32 4294967295, %s7471_s21   ;;  %s5850_s23 = sadd.s32 4294967294, %s7471_s21   ;;  %s7471_s21 = sphi %s7521_s21, %s9987_s21   ;;  %s7467_s20 = sphi %s7519_s20, %s9986_s20   ;;  %s7463_s19 = sphi %s7517_s19, %s9985_s19   ;;  %s7459_s18 = sphi %s7515_s18, %s9984_s18  }
   0x7   : > { %p42_p0 = scmp.ne.s32.totalorder %s7463_s19, %s7459_s18  ;;  %p9576_p1 = scmp.eq.s32.totalorder %s7536_s22, 0 }
   0x8   : > { %p156_p3 = scmp.eq.s32.totalorder %s5850_s23, 1  ;;  %p5851_p5 = scmp.ge.s32.totalorder %s7471_s21, 1 }
   0x9   : > { %p7545_p4 = por %p9576_p1, %p42_p0  ;;  %p163_p7 = scmp.lt.s32.totalorder %s7471_s21, 3 }
   0xa   : > { %p7550_p6 = por %p156_p3, %p42_p0  ;;  %s7473_s27 = smov [#allocation7]  }
   0xb   : > { %s9711_s24 = scalar_select %p7545_p4, 1, 0 }
   0xc   : > { %s9712_s25 = scalar_select %p7550_p6, 1, 0 }
   0xd   : > { %p7555_p8 = pnand %p5851_p5, %p163_p7  ;;  %s175_s28 = sshll.u32 %s7473_s27, 4  ;;  %s7559_s28 = int_to_ptr.vmem [resolvable:$true] %s175_s28 }
   0xe   : > { %s7474_s30 = smov [#allocation9]   ;;  %s7315_s9 = scalar_lea.hbm %s9571_s1, 9216 }
   0xf   : > { %p7100_p9 = pneg %p7555_p8  ;;  %s188_s6 = sshll.u32 %s7474_s30, 4  ;;  %s7570_s6 = int_to_ptr.vmem [resolvable:$true] %s188_s6 }
  0x10   : > { %p7316_p12 = scmp.ne.s32.totalorder %s9571_s1, %s7315_s9  ;;  %p7322_p5 = scmp.lt.u32.totalorder %s7315_s9, %s9571_s1 }
  0x11   : > { %p7566_p11 = pnand %p7100_p9, %p9576_p1 }
  0x13   : > { %p7317_p13 = pneg %p7566_p11 }
  0x15   : > { %p7318_p0 = pnand %p7317_p13, %p7316_p12 }
  0x17   : > { %p7319_p3 = pneg %p7318_p0 }
  0x19   : > { %p7324_p7 = pnand %p7322_p5, %p7319_p3 }
  0x1b   : > { %7327 = shalt.err (!%p7324_p7)
}
  0x1c   : > { %s7328_s14 = scalar_lea.vmem %s7559_s28, 9216  ;;  %p7336_p2 = scmp.lt.s32.totalorder %s7559_s28, %s7559_s28 }
  0x1d   : > { %p7329_p9 = scmp.ne.s32.totalorder %s7559_s28, %s7328_s14  ;;  %p7337_p12 = scmp.lt.s32.totalorder %s7328_s14, %s7328_s14 }
  0x1f   : > { %p7331_p10 = pnand %p7329_p9, %p7317_p13  ;;  %p7338_p0 = por %p7337_p12, %p7336_p2 }
  0x21   : > { %p7332_p1 = pneg %p7331_p10 }
  0x23   : > { %p7339_p6 = pnand %p7338_p0, %p7332_p1 }
  0x25   : > { %7342 = shalt.err (!%p7339_p6)
}
  0x26   : > { %s7475_s15 = smov 64   ;;  %s7476_s16 = smov 4  }
  0x27   : > { %7103 = dma.hbm_to_vmem [thread:$0]  (!%p7566_p11), %s9571_s1, 9216, %s7559_s28, [#allocation8], %s7475_s15, %s7475_s15, %s7476_s16  }
  0x28   : > { %s7343_s7 = scalar_lea.hbm %s9572_s2, 9216 }
  0x29   : > { %p7344_p2 = scmp.ne.s32.totalorder %s9572_s2, %s7343_s7  ;;  %p7350_p10 = scmp.lt.u32.totalorder %s7343_s7, %s9572_s2 }
  0x2b   : > { %p7346_p1 = pnand %p7344_p2, %p7317_p13 }
  0x2d   : > { %p7347_p6 = pneg %p7346_p1 }
  0x2f   : > { %p7352_p3 = pnand %p7350_p10, %p7347_p6 }
  0x31   : > { %7355 = shalt.err (!%p7352_p3)
}
  0x32   : > { %s7356_s28 = scalar_lea.vmem %s7570_s6, 9216  ;;  %p7364_p12 = scmp.lt.s32.totalorder %s7570_s6, %s7570_s6 }
  0x33   : > { %p7357_p5 = scmp.ne.s32.totalorder %s7570_s6, %s7356_s28  ;;  %p7365_p0 = scmp.lt.s32.totalorder %s7356_s28, %s7356_s28 }
  0x35   : > { %p7359_p7 = pnand %p7357_p5, %p7317_p13  ;;  %p7366_p2 = por %p7365_p0, %p7364_p12 }
  0x37   : > { %p7360_p9 = pneg %p7359_p7 }
  0x39   : > { %p7367_p1 = pnand %p7366_p2, %p7360_p9 }
  0x3b   : > { %7370 = shalt.err (!%p7367_p1)
}
  0x3c   : > { %7106 = dma.hbm_to_vmem [thread:$0]  (!%p7566_p11), %s9572_s2, 9216, %s7570_s6, [#allocation8], %s7475_s15, %s7475_s15, %s7476_s16  }
  0x3d   : > { %s7625_s14 = sadd.s32 1, %s7471_s21   ;;  %s29_s29 = sadd.s32 1, %s7467_s20 }
  0x3e   : > { %s26_s17 = ssub.s32 %s7471_s21, %s7625_s14  ;;  %p36_p13 = scmp.ne.s32.totalorder %s7467_s20, %s7463_s19 }
  0x3f   : > { %p27_p6 = scmp.eq.s32.totalorder %s26_s17, 0  ;;  %p37_p10 = scmp.eq.s32.totalorder %s7471_s21, 0 }
  0x40   : > { %p9715_p3 = scmp.eq.s32.totalorder %s7536_s22, 1  ;;  %p7117_p7 = scmp.lt.s32.totalorder %s7471_s21, 2 }
  0x41   : > { %s7641_s27 = scalar_select %p27_p6, %s7467_s20, %s29_s29  }
  0x42   : > { %p7635_p5 = por %p9715_p3, %p36_p13  ;;  %p38_p9 = por %p37_p10, %p36_p13 }
  0x43   : > { %s208_s30 = sand.u32 1, %s7467_s20   ;;  %s6046_s6 = sshll.u32 %s7471_s21, 12 }
  0x44   : > { %s9716_s23 = scalar_select %p7635_p5, 1, 0 }
  0x45   : > { %s5855_s7 = sshll.u32 %s208_s30, 8  ;;  %s7648_s8 = scalar_lea.hbm %s9570_s0, %s6046_s6 }
  0x46   : > { %s212_s9 = scalar_lea.vmem [#allocation4], %s5855_s7  ;;  %p7652_p11 = pnand %p7117_p7, %p38_p9 }
  0x47   : > { %s219_s10 = sshll.u32 %s212_s9, 4  ;;  %s7656_s28 = scalar_lea.sflag [#allocation5], %s208_s30  ;;  %s7650_s10 = int_to_ptr.vmem [resolvable:$true] %s219_s10 }
  0x48   : > { %s7371_s12 = scalar_lea.hbm %s7648_s8, 4096  ;;  %p7373_p0 = pneg %p7652_p11 }
  0x49   : > { %p7372_p12 = scmp.ne.s32.totalorder %s7648_s8, %s7371_s12  ;;  %s7376_s17 = scalar_lea.hbm %s9570_s0, 8192 }
  0x4a   : > { %p7377_p13 = scmp.lt.u32.totalorder %s7648_s8, %s9570_s0  ;;  %p7378_p6 = scmp.lt.u32.totalorder %s7376_s17, %s7371_s12 }
  0x4b   : > { %p7374_p2 = pnand %p7373_p0, %p7372_p12  ;;  %p7380_p3 = scmp.lt.u32.totalorder %s7371_s12, %s7648_s8 }
  0x4c   : > { %p7379_p10 = por %p7378_p6, %p7377_p13 }
  0x4d   : > { %p7375_p1 = pneg %p7374_p2 }
  0x4e   : > { %p7381_p7 = por %p7380_p3, %p7379_p10 }
  0x50   : > { %p7382_p9 = pnand %p7381_p7, %p7375_p1 }
  0x52   : > { %7385 = shalt.err (!%p7382_p9)
}
  0x53   : > { %s7386_s30 = scalar_lea.vmem %s7650_s10, 4096  ;;  %s7477_s15 = smov [#allocation4]  }
  0x54   : > { %p7387_p12 = scmp.ne.s32.totalorder %s7650_s10, %s7386_s30  ;;  %s7391_s16 = sshll.u32 %s7477_s15, 4  ;;  %s7392_s16 = int_to_ptr.vmem [resolvable:$false] %s7391_s16 }
  0x55   : > { %s7393_s9 = scalar_lea.vmem %s7392_s16, 8192  ;;  %p7394_p4 = scmp.lt.s32.totalorder %s7650_s10, %s7392_s16 }
  0x56   : > { %p7389_p2 = pnand %p7387_p12, %p7373_p0  ;;  %p7395_p13 = scmp.lt.s32.totalorder %s7393_s9, %s7386_s30 }
  0x58   : > { %p7390_p5 = pneg %p7389_p2  ;;  %p7396_p6 = por %p7395_p13, %p7394_p4 }
  0x5a   : > { %p7397_p10 = pnand %p7396_p6, %p7390_p5 }
  0x5c   : > { %7400 = shalt.err (!%p7397_p10)
}
  0x5d   : > { %s7478_s12 = smov 128   ;;  %s7479_s13 = smov 8  }
  0x5e   : > { %7110 = dma.hbm_to_vmem [thread:$0]  (!%p7652_p11), %s7648_s8, 4096, %s7650_s10, %s7656_s28, %s7478_s12, %s7478_s12, %s7479_s13  }
  0x5f   : > { %231 = sbr.rel (%p7555_p8) target bundleno = 1167 (0x48f), region = 40 }
  0x66   : > { %s7687_s29 = sand.u32 1, %s7463_s19   ;;  %p9718_p4 = scmp.ne.s32.totalorder %s9711_s24, 0 }
  0x67   : > { %s5859_s17 = sshll.u32 %s7687_s29, 8  ;;  %s234_s7 = scalar_lea.sflag [#allocation5], %s7687_s29 }
  0x68   : > { %s7693_s6 = scalar_lea.vmem [#allocation4], %s5859_s17 }
  0x69   : > { %7446 = dma.done.wait (%p9718_p4), %s234_s7, 4096  }
  0x6a   : > { %7448 = vsyncadd (%p9718_p4), %s234_s7, 4294963200  ;;  %p9719_p5 = scmp.eq.s32.totalorder %s7536_s22, 0 }
  0x6c   : > { %7450 = dma.done.wait (%p9719_p5), [#allocation8], 18432   ;;  %p9720_p8 = pmov %p9719_p5 }
  0x6d   : > { %v7480_v0 = vmov 0.0   ;;  %v7481_v1 = vmov 0.0|0.0   ;;  %v7162_v2 = vld [vmem:[#allocation7 + $0x40] sm:$0xff]   ;;  %v7166_v6 = vld [vmem:[#allocation7 + $0x48] sm:$0xff]   ;;  %v7170_v10 = vld [vmem:[#allocation7 + $0x50] sm:$0xff]   ;;  %v279_v18 = vlaneseq  ;;  %s9427_s11 = scalar_lea.vmem [#allocation10], %s5859_s17 }
  0x6e   : > { %7452 = vsyncadd (%p9720_p8), [#allocation8], 4294948864  ;;  %274 = vst [vmem:[#allocation2 + $0x8] sm:$0xff] %v7480_v0  ;;  %2479 = vmatprep.mubr.bf16.mxu0 %v7481_v1  ;;  %v7163_v3 = vld [vmem:[#allocation7] sm:$0xff]   ;;  %6048 = vmatprep.subr.bf16.mxu0 %v7162_v2  ;;  %v7167_v7 = vld [vmem:[#allocation7 + $0x8] sm:$0xff]   ;;  %s6047_s28 = sshll.u32 %s7536_s22, 12 }
  0x6f   : > { %275 = vst [vmem:[#allocation2 + $0x10] sm:$0xff] %v7480_v0  ;;  %273 = vst [vmem:[#allocation2] sm:$0xff] %v7480_v0  ;;  %v7164_v4 = vld [vmem:[#allocation7 + $0xc0] sm:$0xff]   ;;  %6049 = vmatpush3.bf16.msra.mxu0 %v7163_v3  ;;  %v7168_v8 = vld [vmem:[#allocation7 + $0xc8] sm:$0xff]   ;;  %v7709_v23 = vshrl.u32 %v279_v18, 7  ;;  %s5758_s30 = sshll.u32 %s9427_s11, 4  ;;  %s9521_s9 = scalar_lea.hbm %s9575_s5, %s6047_s28  ;;  %s9523_s30 = int_to_ptr.vmem [resolvable:$true] %s5758_s30 }
  0x70   : > { %276 = vst [vmem:[#allocation2 + $0x118] sm:$0xff] %v7480_v0  ;;  %277 = vst [vmem:[#allocation2 + $0x120] sm:$0xff] %v7480_v0  ;;  %v7165_v5 = vld [vmem:[#allocation7 + $0x80] sm:$0xff]   ;;  %6160 = vmatprep.subr.bf16.mxu1 %v7164_v4  ;;  %6050 = vmatprep.subr.bf16.mxu0 %v7166_v6  ;;  %v7169_v9 = vld [vmem:[#allocation7 + $0x88] sm:$0xff]   ;;  %s5745_s22 = scalar_lea.sflag [#allocation6], %s7687_s29  ;;  %s7401_s12 = scalar_lea.vmem %s9523_s30, 4096 }
  0x71   : > { %278 = vst [vmem:[#allocation2 + $0x128] sm:$0xff] %v7480_v0  ;;  %6161 = vmatpush3.bf16.msra.mxu1 %v7165_v5  ;;  %v7171_v11 = vld [vmem:[#allocation7 + $0x10] sm:$0xff]   ;;  %v7174_v14 = vld [vmem:[#allocation7 + $0x58] sm:$0xff]   ;;  %v7178_v19 = vld [vmem:[#allocation7 + $0x60] sm:$0xff]   ;;  %v316_v28 = vand.u32 15, %v7709_v23  ;;  %v281_v31 = vadd.s32 8, %v7709_v23  ;;  %p7402_p11 = scmp.ne.s32.totalorder %s9523_s30, %s7401_s12 }
  0x72   : > { %6162 = vmatprep.subr.bf16.mxu1 %v7168_v8  ;;  %v7172_v12 = vld [vmem:[#allocation7 + $0xd0] sm:$0xff]   ;;  %v7175_v15 = vld [vmem:[#allocation7 + $0x18] sm:$0xff]   ;;  %v7179_v20 = vld [vmem:[#allocation7 + $0x20] sm:$0xff]   ;;  %v282_v33 = vadd.s32 16, %v7709_v23  ;;  %v283_v36 = vadd.s32 24, %v7709_v23  ;;  %v284_v45 = vadd.s32 32, %v7709_v23 }
  0x73   : > { %6051 = vmatpush3.bf16.msra.mxu0 %v7167_v7  ;;  %v7173_v13 = vld [vmem:[#allocation7 + $0x90] sm:$0xff]   ;;  %v7176_v16 = vld [vmem:[#allocation7 + $0xd8] sm:$0xff]   ;;  %v7180_v21 = vld [vmem:[#allocation7 + $0xe0] sm:$0xff]   ;;  %vm696_vm0 = vcmp.ne.s32.totalorder %v316_v28, 0  ;;  %v323_v38 = vand.u32 15, %v281_v31  ;;  %v286_v63 = vadd.s32 48, %v7709_v23 }
  0x74   : > { %6052 = vmatprep.subr.bf16.mxu0 %v7170_v10  ;;  %v7177_v17 = vld [vmem:[#allocation7 + $0x98] sm:$0xff]   ;;  %v7181_v22 = vld [vmem:[#allocation7 + $0xa0] sm:$0xff]   ;;  %v7182_v24 = vld [vmem:[#allocation7 + $0x68] sm:$0xff]   ;;  %v7716_v40 = vsel %vm696_vm0, 1.0, %v7480_v0  ;;  %v330_v42 = vand.u32 15, %v282_v33  ;;  %v337_v50 = vand.u32 15, %v283_v36 }
  0x75   : > { %6163 = vmatpush3.bf16.msra.mxu1 %v7169_v9  ;;  %v7183_v25 = vld [vmem:[#allocation7 + $0x28] sm:$0xff]   ;;  %v7186_v29 = vld [vmem:[#allocation7 + $0x70] sm:$0xff]   ;;  %v7190_v35 = vld [vmem:[#allocation7 + $0x78] sm:$0xff]   ;;  %9721 = vst [vmem:[#allocation14_spill] sm:$0xff] %v7716_v40  ;;  %vm7722_vm1 = vcmp.ne.s32.totalorder %v323_v38, 15  ;;  %v344_v58 = vand.u32 15, %v284_v45 }
  0x76   : > { %6164 = vmatprep.subr.bf16.mxu1 %v7172_v12  ;;  %v7184_v26 = vld [vmem:[#allocation7 + $0xe8] sm:$0xff]   ;;  %v7187_v30 = vld [vmem:[#allocation7 + $0x30] sm:$0xff]   ;;  %v7191_v37 = vld [vmem:[#allocation7 + $0x38] sm:$0xff]   ;;  %vm7726_vm2 = vcmp.ne.s32.totalorder %v330_v42, 0  ;;  %v7744_v1 = vsel %vm7722_vm1, 1.0, %v7480_v0  ;;  %vm7757_vm3 = vcmp.ne.s32.totalorder %v337_v50, 15 }
  0x77   : > { %6053 = vmatpush3.bf16.msra.mxu0 %v7171_v11  ;;  %v7185_v27 = vld [vmem:[#allocation7 + $0xa8] sm:$0xff]   ;;  %v7188_v32 = vld [vmem:[#allocation7 + $0xf0] sm:$0xff]   ;;  %v7192_v39 = vld [vmem:[#allocation7 + $0xf8] sm:$0xff]   ;;  %9726 = vst [vmem:[#allocation15_spill] sm:$0xff] %v7744_v1  ;;  %v7749_v3 = vsel %vm7726_vm2, 1.0, %v7480_v0  ;;  %vm7761_vm4 = vcmp.ne.s32.totalorder %v344_v58, 0 }
  0x78   : > { %6054 = vmatprep.subr.bf16.mxu0 %v7174_v14  ;;  %v7189_v34 = vld [vmem:[#allocation7 + $0xb0] sm:$0xff]   ;;  %v7193_v41 = vld [vmem:[#allocation7 + $0xb8] sm:$0xff]   ;;  %v7194_v47 = vld [vmem:[#allocation7 + $0x140] sm:$0xff]   ;;  %9727 = vst [vmem:[#allocation16_spill] sm:$0xff] %v7749_v3  ;;  %v285_v12 = vadd.s32 40, %v7709_v23  ;;  %v288_v38 = vadd.s32 64, %v7709_v23 }
  0x79   : > { %6165 = vmatpush3.bf16.msra.mxu1 %v7173_v13  ;;  %v952_v43 = vld [vmem:[#allocation2 + $0x7] sm:$0xff]  ;;  %v953_v44 = vld [vmem:[#allocation2 + $0xf] sm:$0xff]  ;;  %v889_v49 = vld [vmem:[%s7693_s6 + $0x8] sm:$0xff]  ;;  %v289_v7 = vadd.s32 72, %v7709_v23  ;;  %p9981_p0 = scmp.ne.s32.totalorder %s9716_s23, 0  ;;  %s7482_s13 = smov [#allocation10]  }
  0x7a   : > { %6166 = vmatprep.subr.bf16.mxu1 %v7176_v16  ;;  %v984_v46 = vmul.f32 %v7716_v40, %v952_v43  ;;  %v888_v48 = vld [vmem:[%s7693_s6] sm:$0xff]  ;;  %921 = vst [vmem:[#allocation2 + $0x20] sm:$0xff] %v889_v49  ;;  %v890_v56 = vld [vmem:[%s7693_s6 + $0x10] sm:$0xff]  ;;  %v891_v57 = vld [vmem:[%s7693_s6 + $0x18] sm:$0xff]  ;;  %v351_v31 = vand.u32 15, %v285_v12  ;;  %v287_v43 = vadd.s32 56, %v7709_v23 }
  0x7b   : > { %6055 = vmatpush3.bf16.msra.mxu0 %v7175_v15  ;;  %920 = vst [vmem:[#allocation2 + $0x18] sm:$0xff] %v888_v48  ;;  %v7195_v52 = vld [vmem:[#allocation7 + $0x100] sm:$0xff]   ;;  %v1081_v54 = vpack.c.bf16 %v889_v49, %v888_v48  ;;  %922 = vst [vmem:[#allocation2 + $0x28] sm:$0xff] %v890_v56  ;;  %v7196_v59 = vld [vmem:[#allocation7 + $0x148] sm:$0xff]   ;;  %v290_v12 = vadd.s32 80, %v7709_v23  ;;  %p7403_p1 = pnand %p7402_p11, %p9981_p0  ;;  %s7405_s17 = sshll.u32 %s7482_s13, 4  ;;  %s7406_s17 = int_to_ptr.vmem [resolvable:$false] %s7405_s17 }
  0x7c   : > { %6056 = vmatprep.subr.bf16.mxu0 %v7178_v19  ;;  %v1016_v51 = vpack.c.bf16 %v953_v44, %v984_v46  ;;  %923 = vst [vmem:[#allocation2 + $0x30] sm:$0xff] %v891_v57  ;;  %v7733_v60 = vld [vmem:[%s7693_s6 + $0x20] sm:$0xff]  ;;  %v7736_v61 = vld [vmem:[%s7693_s6 + $0x28] sm:$0xff]  ;;  %v7752_v4 = vld [vmem:[%s7693_s6 + $0x30] sm:$0xff]  ;;  %v7782_v19 = vsel %vm7757_vm3, 1.0, %v7480_v0  ;;  %vm797_vm6 = vcmp.ne.s32.totalorder %v351_v31, 15  ;;  %p7408_p7 = scmp.lt.s32.totalorder %s9523_s30, %s7406_s17 }
  0x7d   : > { %6167 = vmatpush3.bf16.msra.mxu1 %v7177_v17  ;;  %924 = vst [vmem:[#allocation2 + $0x38] sm:$0xff] %v7733_v60  ;;  %925 = vst [vmem:[#allocation2 + $0x40] sm:$0xff] %v7736_v61  ;;  %v7197_v62 = vld [vmem:[#allocation7 + $0x108] sm:$0xff]   ;;  %v1112_v2 = vld [vmem:[#allocation2 + $0x9] sm:$0xff]  ;;  %v1083_v50 = vpack.c.bf16 %v7736_v61, %v7733_v60  ;;  %v7819_v55 = vsel %vm797_vm6, 1.0, %v7480_v0  ;;  %p7404_p3 = pneg %p7403_p1  ;;  %s7407_s7 = scalar_lea.vmem %s7406_s17, 8192 }
  0x7e   : > { %6168 = vmatprep.subr.bf16.mxu1 %v7180_v21  ;;  %v7755_v5 = vld [vmem:[%s7693_s6 + $0x38] sm:$0xff]  ;;  %926 = vst [vmem:[#allocation2 + $0x48] sm:$0xff] %v7752_v4  ;;  %v7198_v8 = vld [vmem:[#allocation7 + $0x150] sm:$0xff]   ;;  %v7768_v9 = vld [vmem:[%s7693_s6 + $0x40] sm:$0xff]  ;;  %v7787_v21 = vsel %vm7761_vm4, 1.0, %v7480_v0  ;;  %p7409_p9 = scmp.lt.s32.totalorder %s7407_s7, %s7401_s12 }
  0x7f   : > { %6057 = vmatpush3.bf16.msra.mxu0 %v7179_v20  ;;  %927 = vst [vmem:[#allocation2 + $0x50] sm:$0xff] %v7755_v5  ;;  %v7772_v13 = vld [vmem:[%s7693_s6 + $0x48] sm:$0xff]  ;;  %928 = vst [vmem:[#allocation2 + $0x58] sm:$0xff] %v7768_v9  ;;  %v1082_v20 = vpack.c.bf16 %v891_v57, %v890_v56  ;;  %v7795_v36 = vld [vmem:[%s7693_s6 + $0x58] sm:$0xff] }
  0x80   : > { %6058 = vmatprep.subr.bf16.mxu0 %v7182_v24  ;;  %929 = vst [vmem:[#allocation2 + $0x60] sm:$0xff] %v7772_v13  ;;  %9732 = vst [vmem:[#allocation17_spill] sm:$0xff] %v7782_v19  ;;  %v7809_v48 = vld [vmem:[%s7693_s6 + $0x60] sm:$0xff]  ;;  %v7814_v53 = vld [vmem:[%s7693_s6 + $0x68] sm:$0xff]  ;;  %p7410_p12 = por %p7409_p9, %p7408_p7 }
  0x81   : > { %6169 = vmatpush3.bf16.msra.mxu1 %v7181_v22  ;;  %v358_v22 = vand.u32 15, %v286_v63  ;;  %931 = vst [vmem:[#allocation2 + $0x70] sm:$0xff] %v7795_v36  ;;  %932 = vst [vmem:[#allocation2 + $0x78] sm:$0xff] %v7809_v48  ;;  %v7201_v56 = vld [vmem:[#allocation7 + $0x118] sm:$0xff]   ;;  %v7823_v57 = vld [vmem:[%s7693_s6 + $0x70] sm:$0xff] }
  0x82   : > { %6170 = vmatprep.subr.bf16.mxu1 %v7184_v26  ;;  %v1208_v10 = vld [vmem:[#allocation2 + $0x17] sm:$0xff]  ;;  %v1209_v14 = vld [vmem:[#allocation2 + $0x1f] sm:$0xff]  ;;  %v1210_v18 = vld [vmem:[#allocation2 + $0x27] sm:$0xff]  ;;  %9733 = vst [vmem:[#allocation18_spill] sm:$0xff] %v7819_v55  ;;  %p7411_p2 = pnand %p7410_p12, %p7404_p3 }
  0x83   : > { %6059 = vmatpush3.bf16.msra.mxu0 %v7183_v25  ;;  %v1113_v11 = vld [vmem:[#allocation2 + $0x11] sm:$0xff]  ;;  %v1240_v15 = vmul.f32 %v7716_v40, %v1208_v10  ;;  %v986_v17 = vmul.f32 %v7749_v3, %v1208_v10  ;;  %v1242_v28 = vmul.f32 %v7749_v3, %v1210_v18  ;;  %vm702_vm5 = vcmp.ne.s32.totalorder %v358_v22, 0  ;;  %933 = vst [vmem:[#allocation2 + $0x80] sm:$0xff] %v7814_v53  ;;  %v7826_v58 = vld [vmem:[%s7693_s6 + $0x78] sm:$0xff] }
  0x84   : > { %6060 = vmatprep.subr.bf16.mxu0 %v7186_v29  ;;  %v1145_v16 = vmul.f32 %v7744_v1, %v1113_v11  ;;  %v1115_v29 = vld [vmem:[#allocation2 + $0x21] sm:$0xff]  ;;  %v1117_v45 = vld [vmem:[#allocation2 + $0x31] sm:$0xff]  ;;  %v7806_v46 = vsel %vm702_vm5, 1.0, %v7480_v0  ;;  %934 = vst [vmem:[#allocation2 + $0x88] sm:$0xff] %v7823_v57  ;;  %935 = vst [vmem:[#allocation2 + $0x90] sm:$0xff] %v7826_v58 }
  0x85   : > { %6171 = vmatpush3.bf16.msra.mxu1 %v7185_v27  ;;  %v1272_v24 = vpack.c.bf16 %v1209_v14, %v1240_v15  ;;  %v1017_v26 = vpack.c.bf16 %v1209_v14, %v986_v17  ;;  %v1211_v27 = vld [vmem:[#allocation2 + $0x2f] sm:$0xff]  ;;  %v7802_v42 = vld [vmem:[#allocation2 + $0x3f] sm:$0xff]  ;;  %v1149_v63 = vmul.f32 %v7819_v55, %v1117_v45 }
  0x86   : > { %6172 = vmatprep.subr.bf16.mxu1 %v7188_v32  ;;  %v1176_v25 = vpack.c.bf16 %v1145_v16, %v1112_v2  ;;  %v7199_v32 = vld [vmem:[#allocation7 + $0x110] sm:$0xff]   ;;  %v1273_v33 = vpack.c.bf16 %v1211_v27, %v1242_v28  ;;  %v7202_v60 = vld [vmem:[#allocation7 + $0x160] sm:$0xff]   ;;  %v7843_v10 = vld [vmem:[%s7693_s6 + $0x88] sm:$0xff]  ;;  %v379_v28 = vand.u32 15, %v289_v7  ;;  %v294_v7 = vadd.s32 112, %v7709_v23 }
  0x87   : > { %6061 = vmatpush3.bf16.msra.mxu0 %v7187_v30  ;;  %v1212_v30 = vld [vmem:[#allocation2 + $0x37] sm:$0xff]  ;;  %2640 = vmatprep.mubr.bf16.mxu1 %v1272_v24  ;;  %v1116_v61 = vld [vmem:[#allocation2 + $0x29] sm:$0xff]  ;;  %937 = vst [vmem:[#allocation2 + $0xa0] sm:$0xff] %v7843_v10  ;;  %v7850_v15 = vld [vmem:[%s7693_s6 + $0x90] sm:$0xff] }
  0x88   : > { %6062 = vmatprep.subr.bf16.mxu0 %v7190_v35  ;;  %v7792_v35 = vld [vmem:[%s7693_s6 + $0x50] sm:$0xff]  ;;  %v7832_v2 = vld [vmem:[#allocation2 + $0x4f] sm:$0xff]  ;;  %938 = vst [vmem:[#allocation2 + $0xa8] sm:$0xff] %v7850_v15  ;;  %v7204_v24 = vld [vmem:[#allocation7 + $0x168] sm:$0xff]   ;;  %vm801_vm9 = vcmp.ne.s32.totalorder %v379_v28, 15 }
  0x89   : > { %6173 = vmatpush3.bf16.msra.mxu1 %v7189_v34  ;;  %v988_v34 = vmul.f32 %v7787_v21, %v1210_v18  ;;  %930 = vst [vmem:[#allocation2 + $0x68] sm:$0xff] %v7792_v35  ;;  %v7203_v14 = vld [vmem:[#allocation7 + $0x120] sm:$0xff]   ;;  %v7853_v16 = vld [vmem:[%s7693_s6 + $0x98] sm:$0xff]  ;;  %v1178_v18 = vpack.c.bf16 %v1149_v63, %v1116_v61  ;;  %v7207_v61 = vld [vmem:[#allocation7 + $0x130] sm:$0xff]  }
  0x8a   : > { %6174 = vmatprep.subr.bf16.mxu1 %v7192_v39  ;;  %v1114_v39 = vld [vmem:[#allocation2 + $0x19] sm:$0xff]  ;;  %939 = vst [vmem:[#allocation2 + $0xb0] sm:$0xff] %v7853_v16  ;;  %v7870_v31 = vld [vmem:[%s7693_s6 + $0xa0] sm:$0xff] }
  0x8b   : > { %6063 = vmatpush3.bf16.msra.mxu0 %v7191_v37  ;;  %v1147_v37 = vmul.f32 %v7782_v19, %v1115_v29  ;;  %v1018_v44 = vpack.c.bf16 %v1211_v27, %v988_v34  ;;  %v1119_v27 = vld [vmem:[#allocation2 + $0x41] sm:$0xff]  ;;  %v386_v29 = vand.u32 15, %v290_v12  ;;  %940 = vst [vmem:[#allocation2 + $0xb8] sm:$0xff] %v7870_v31  ;;  %v1118_v34 = vld [vmem:[#allocation2 + $0x39] sm:$0xff]  ;;  %v1121_v45 = vld [vmem:[#allocation2 + $0x51] sm:$0xff] }
  0x8c   : > { %6272 = vmatprep.subr.bf16.mxu0 %v7194_v47  ;;  %v7200_v47 = vld [vmem:[#allocation7 + $0x158] sm:$0xff]   ;;  %v7209_v12 = vld [vmem:[#allocation7 + $0x180] sm:$0xff]  }
  0x8d   : > { %6175 = vmatpush3.bf16.msra.mxu1 %v7193_v41  ;;  %v1244_v41 = vmul.f32 %v7787_v21, %v1212_v30  ;;  %v1177_v49 = vpack.c.bf16 %v1147_v37, %v1114_v39  ;;  %vm706_vm10 = vcmp.ne.s32.totalorder %v386_v29, 0  ;;  %v7882_v39 = vld [vmem:[%s7693_s6 + $0xb0] sm:$0xff]  ;;  %v1086_v29 = vpack.c.bf16 %v7795_v36, %v7792_v35  ;;  %v7220_v35 = vld [vmem:[#allocation7 + $0x1e8] sm:$0xff]  }
  0x8e   : > { %2480 = vmatmul.mubr.bf16.vlgmr.msra.gmra.mrb[0].mxu0 %v1016_v51  ;;  %v1214_v51 = vld [vmem:[#allocation2 + $0x47] sm:$0xff]  ;;  %942 = vst [vmem:[#allocation2 + $0xc8] sm:$0xff] %v7882_v39 }
  0x8f   : > { %6273 = vmatpush3.bf16.msra.mxu0 %v7195_v52  ;;  %2487 = vmatprep.mubr.bf16.mxu0 %v1081_v54  ;;  %v372_v52 = vand.u32 15, %v288_v38  ;;  %v1274_v54 = vpack.c.bf16 %v7802_v42, %v1244_v41  ;;  %v1246_v11 = vmul.f32 %v7806_v46, %v1214_v51  ;;  %v292_v38 = vadd.s32 96, %v7709_v23  ;;  %v7885_v41 = vld [vmem:[%s7693_s6 + $0xb8] sm:$0xff]  ;;  %v7212_v36 = vld [vmem:[#allocation7 + $0x1d0] sm:$0xff]  }
  0x90   : > { %6274 = vmatprep.subr.bf16.mxu0 %v7196_v59  ;;  %2641 = vmatmul.mubr.bf16.vlgmr.msra.gmra.mrb[0].mxu1 %v1176_v25  ;;  %v365_v59 = vand.u32 15, %v287_v43  ;;  %v291_v43 = vadd.s32 88, %v7709_v23  ;;  %943 = vst [vmem:[#allocation2 + $0xd0] sm:$0xff] %v7885_v41  ;;  %v1123_v28 = vld [vmem:[#allocation2 + $0x61] sm:$0xff] }
  0x91   : > { %2648 = vmatprep.mubr.bf16.mxu1 %v1273_v33  ;;  %vm7834_vm7 = vcmp.ne.s32.totalorder %v372_v52, 0  ;;  %v1275_v25 = vpack.c.bf16 %v7832_v2, %v1246_v11  ;;  %v7206_v52 = vld [vmem:[#allocation7 + $0x170] sm:$0xff]   ;;  %v7208_v11 = vld [vmem:[#allocation7 + $0x1c0] sm:$0xff]  }
  0x92   : > { %vm799_vm8 = vcmp.ne.s32.totalorder %v365_v59, 15  ;;  %v7863_v22 = vsel %vm7834_vm7, 1.0, %v7480_v0  ;;  %v393_v63 = vand.u32 15, %v291_v43  ;;  %6384 = vmatprep.subr.bf16.mxu1 %v7208_v11  ;;  %v1122_v43 = vld [vmem:[#allocation2 + $0x59] sm:$0xff]  ;;  %v7216_v11 = vld [vmem:[#allocation7 + $0x178] sm:$0xff]  }
  0x93   : > { %6275 = vmatpush3.bf16.msra.mxu0 %v7197_v62  ;;  %v990_v62 = vmul.f32 %v7806_v46, %v1212_v30  ;;  %v1216_v30 = vld [vmem:[#allocation2 + $0x57] sm:$0xff]  ;;  %6385 = vmatpush3.bf16.msra.mxu1 %v7209_v12 }
  0x94   : > { %6276 = vmatprep.subr.bf16.mxu0 %v7198_v8  ;;  %v7840_v8 = vld [vmem:[%s7693_s6 + $0x80] sm:$0xff]  ;;  %v1248_v37 = vmul.f32 %v7863_v22, %v1216_v30  ;;  %vm803_vm12 = vcmp.ne.s32.totalorder %v393_v63, 15  ;;  %v7215_v63 = vld [vmem:[#allocation7 + $0x198] sm:$0xff]  }
  0x95   : > { %936 = vst [vmem:[#allocation2 + $0x98] sm:$0xff] %v7840_v8  ;;  %v1019_v17 = vpack.c.bf16 %v7802_v42, %v990_v62  ;;  %v1217_v42 = vld [vmem:[#allocation2 + $0x5f] sm:$0xff]  ;;  %v1218_v62 = vld [vmem:[#allocation2 + $0x67] sm:$0xff]  ;;  %v916_v12 = vld [vmem:[%s7693_s6 + $0xe0] sm:$0xff] }
  0x96   : > { %2488 = vmatmul.mubr.bf16.gmra.mrb[4].mxu0 %v1017_v26  ;;  %v7867_v26 = vsel %vm799_vm8, 1.0, %v7480_v0  ;;  %v1276_v59 = vpack.c.bf16 %v1217_v42, %v1248_v37  ;;  %v1220_v37 = vld [vmem:[#allocation2 + $0x77] sm:$0xff]  ;;  %948 = vst [vmem:[#allocation2 + $0xf8] sm:$0xff] %v916_v12 }
  0x97   : > { %2495 = vmatprep.mubr.bf16.mxu0 %v1082_v20  ;;  %6277 = vmatpush3.bf16.msra.mxu0 %v7199_v32  ;;  %v1084_v20 = vpack.c.bf16 %v7755_v5, %v7752_v4  ;;  %9736 = vst [vmem:[#allocation19_spill] sm:$0xff] %v7867_v26  ;;  %v7873_v4 = vld [vmem:[%s7693_s6 + $0xa8] sm:$0xff]  ;;  %v992_v5 = vmul.f32 %v7863_v22, %v1214_v51  ;;  %v7897_v51 = vsel %vm706_vm10, 1.0, %v7480_v0 }
  0x98   : > { %6278 = vmatprep.subr.bf16.mxu0 %v7200_v47  ;;  %2649 = vmatmul.mubr.bf16.gmra.mrb[4].mxu1 %v1177_v49  ;;  %941 = vst [vmem:[#allocation2 + $0xc0] sm:$0xff] %v7873_v4  ;;  %v7205_v32 = vld [vmem:[#allocation7 + $0x128] sm:$0xff]   ;;  %v1151_v33 = vmul.f32 %v7867_v26, %v1119_v27  ;;  %v7892_v49 = vsel %vm801_vm9, 1.0, %v7480_v0  ;;  %9738 = vst [vmem:[#allocation21_spill] sm:$0xff] %v7897_v51  ;;  %v994_v6 = vmul.f32 %v7897_v51, %v1216_v30 }
  0x99   : > { %2656 = vmatprep.mubr.bf16.mxu1 %v1274_v54  ;;  %9737 = vst [vmem:[#allocation20_spill] sm:$0xff] %v7892_v49  ;;  %v912_v54 = vld [vmem:[%s7693_s6 + $0xc0] sm:$0xff] }
  0x9a   : > { %v1179_v47 = vpack.c.bf16 %v1151_v33, %v1118_v34  ;;  %944 = vst [vmem:[#allocation2 + $0xd8] sm:$0xff] %v912_v54  ;;  %v7914_v33 = vsel %vm803_vm12, 1.0, %v7480_v0  ;;  %v7211_v34 = vld [vmem:[#allocation7 + $0x188] sm:$0xff]  }
  0x9b   : > { %6279 = vmatpush3.bf16.msra.mxu0 %v7201_v56  ;;  %v913_v56 = vld [vmem:[%s7693_s6 + $0xc8] sm:$0xff]  ;;  %9741 = vst [vmem:[#allocation24_spill] sm:$0xff] %v7914_v33 }
  0x9c   : > { %6280 = vmatprep.subr.bf16.mxu0 %v7202_v60  ;;  %v400_v60 = vand.u32 15, %v292_v38  ;;  %945 = vst [vmem:[#allocation2 + $0xe0] sm:$0xff] %v913_v56  ;;  %v7917_v38 = vld [vmem:[%s7693_s6 + $0xd0] sm:$0xff] }
  0x9d   : > { %946 = vst [vmem:[#allocation2 + $0xe8] sm:$0xff] %v7917_v38 }
  0x9e   : > { %2496 = vmatmul.mubr.bf16.gmra.mrb[8].mxu0 %v1018_v44  ;;  %v1020_v44 = vpack.c.bf16 %v7832_v2, %v992_v5  ;;  %v7901_v2 = vpack.c.bf16 %v913_v56, %v912_v54  ;;  %vm708_vm11 = vcmp.ne.s32.totalorder %v400_v60, 0  ;;  %v414_v5 = vand.u32 15, %v294_v7  ;;  %v7214_v56 = vld [vmem:[#allocation7 + $0x1d8] sm:$0xff]  }
  0x9f   : > { %2503 = vmatprep.mubr.bf16.mxu0 %v1083_v50  ;;  %6281 = vmatpush3.bf16.msra.mxu0 %v7203_v14  ;;  %v1085_v50 = vpack.c.bf16 %v7772_v13, %v7768_v9  ;;  %v293_v9 = vadd.s32 104, %v7709_v23  ;;  %v1153_v13 = vmul.f32 %v7892_v49, %v1121_v45  ;;  %v1120_v14 = vld [vmem:[#allocation2 + $0x49] sm:$0xff]  ;;  %v7911_v30 = vsel %vm708_vm11, 1.0, %v7480_v0 }
  0xa0   : > { %6282 = vmatprep.subr.bf16.mxu0 %v7204_v24  ;;  %2657 = vmatmul.mubr.bf16.gmra.mrb[8].mxu1 %v1178_v18  ;;  %9739 = vst [vmem:[#allocation22_spill] sm:$0xff] %v7901_v2  ;;  %v1219_v18 = vld [vmem:[#allocation2 + $0x6f] sm:$0xff]  ;;  %v1021_v24 = vpack.c.bf16 %v1217_v42, %v994_v6  ;;  %9740 = vst [vmem:[#allocation23_spill] sm:$0xff] %v7911_v30  ;;  %v1155_v45 = vmul.f32 %v7914_v33, %v1123_v28  ;;  %vm7930_vm14 = vcmp.ne.s32.totalorder %v414_v5, 0 }
  0xa1   : > { %2664 = vmatprep.mubr.bf16.mxu1 %v1275_v25  ;;  %v407_v25 = vand.u32 15, %v293_v9  ;;  %v1180_v27 = vpack.c.bf16 %v1153_v13, %v1120_v14  ;;  %v7920_v42 = vld [vmem:[%s7693_s6 + $0xd8] sm:$0xff]  ;;  %v296_v54 = vadd.s32 128, %v7709_v23  ;;  %v295_v60 = vadd.s32 120, %v7709_v23  ;;  %v917_v14 = vld [vmem:[%s7693_s6 + $0xe8] sm:$0xff] }
  0xa2   : > { %947 = vst [vmem:[#allocation2 + $0xf0] sm:$0xff] %v7920_v42  ;;  %v1181_v6 = vpack.c.bf16 %v1155_v45, %v1122_v43  ;;  %v7946_v13 = vpack.c.bf16 %v7814_v53, %v7809_v48  ;;  %v7951_v7 = vsel %vm7930_vm14, 1.0, %v7480_v0  ;;  %949 = vst [vmem:[#allocation2 + $0x100] sm:$0xff] %v917_v14  ;;  %v7957_v48 = vld [vmem:[#allocation2 + $0x69] sm:$0xff]  ;;  %v297_v28 = vadd.s32 136, %v7709_v23  ;;  %v7221_v45 = vld [vmem:[#allocation7 + $0x1a8] sm:$0xff]  }
  0xa3   : > { %6283 = vmatpush3.bf16.msra.mxu0 %v7205_v32  ;;  %vm7923_vm13 = vcmp.ne.s32.totalorder %v407_v25, 15  ;;  %9747 = vst [vmem:[#allocation26_spill] sm:$0xff] %v7951_v7  ;;  %v1222_v25 = vld [vmem:[#allocation2 + $0x87] sm:$0xff]  ;;  %v998_v53 = vmul.f32 %v7951_v7, %v1220_v37  ;;  %v7964_v5 = vld [vmem:[#allocation2 + $0x8f] sm:$0xff] }
  0xa4   : > { %6284 = vmatprep.subr.bf16.mxu0 %v7206_v52  ;;  %v1252_v52 = vmul.f32 %v7911_v30, %v1220_v37  ;;  %v7942_v9 = vsel %vm7923_vm13, 1.0, %v7480_v0  ;;  %v1254_v43 = vmul.f32 %v7951_v7, %v1222_v25  ;;  %v7219_v37 = vld [vmem:[#allocation7 + $0x1a0] sm:$0xff]  }
  0xa5   : > { %9746 = vst [vmem:[#allocation25_spill] sm:$0xff] %v7942_v9 }
  0xa6   : > { %2504 = vmatmul.mubr.bf16.gmra.mrb[12].mxu0 %v1019_v17  ;;  %v1250_v17 = vmul.f32 %v7897_v51, %v1218_v62 }
  0xa7   : > { %2511 = vmatprep.mubr.bf16.mxu0 %v1084_v20  ;;  %6285 = vmatpush3.bf16.msra.mxu0 %v7207_v61  ;;  %v7210_v20 = vld [vmem:[#allocation7 + $0x1c8] sm:$0xff]  }
  0xa8   : > { %2665 = vmatmul.mubr.bf16.gmra.mrb[12].mxu1 %v1179_v47  ;;  %6386 = vmatprep.subr.bf16.mxu1 %v7210_v20  ;;  %v1277_v32 = vpack.c.bf16 %v1219_v18, %v1250_v17  ;;  %v7217_v20 = vld [vmem:[#allocation7 + $0x138] sm:$0xff]   ;;  %v918_v47 = vld [vmem:[%s7693_s6 + $0xf0] sm:$0xff] }
  0xa9   : > { %2672 = vmatprep.mubr.bf16.mxu1 %v1276_v59  ;;  %6387 = vmatpush3.bf16.msra.mxu1 %v7211_v34  ;;  %v1221_v59 = vld [vmem:[#allocation2 + $0x7f] sm:$0xff]  ;;  %v7218_v34 = vld [vmem:[#allocation7 + $0x1e0] sm:$0xff]   ;;  %950 = vst [vmem:[#allocation2 + $0x108] sm:$0xff] %v918_v47 }
  0xaa   : > { %6388 = vmatprep.subr.bf16.mxu1 %v7212_v36  ;;  %v1278_v17 = vpack.c.bf16 %v1221_v59, %v1252_v52  ;;  %6286 = vmatprep.subr.bf16.mxu0 %v7216_v11  ;;  %v1023_v36 = vpack.c.bf16 %v1221_v59, %v998_v53  ;;  %v8022_v47 = vld [vmem:[#allocation2 + $0x91] sm:$0xff] }
  0xab   : > { %6287 = vmatpush3.bf16.msra.mxu0 %v7217_v20  ;;  %v7998_v20 = vld [vmem:[#allocation2 + $0x79] sm:$0xff] }
  0xae   : > { %2512 = vmatmul.mubr.bf16.gmra.mrb[16].mxu0 %v1020_v44  ;;  %v996_v44 = vmul.f32 %v7911_v30, %v1218_v62  ;;  %v7937_v62 = vld [vmem:[#allocation2 + $0x71] sm:$0xff] }
  0xaf   : > { %2519 = vmatprep.mubr.bf16.mxu0 %v1085_v50  ;;  %v7213_v50 = vld [vmem:[#allocation7 + $0x190] sm:$0xff]  }
  0xb0   : > { %2673 = vmatmul.mubr.bf16.gmra.mrb[16].mxu1 %v1180_v27  ;;  %v1022_v61 = vpack.c.bf16 %v1219_v18, %v996_v44  ;;  %v428_v18 = vand.u32 15, %v296_v54  ;;  %v421_v27 = vand.u32 15, %v295_v60  ;;  %v7977_v54 = vpack.c.bf16 %v7826_v58, %v7823_v57  ;;  %v7222_v58 = vld [vmem:[#allocation7 + $0x1f0] sm:$0xff]  }
  0xb1   : > { %2680 = vmatprep.mubr.bf16.mxu1 %v1277_v32  ;;  %6389 = vmatpush3.bf16.msra.mxu1 %v7213_v50  ;;  %v298_v32 = vadd.s32 144, %v7709_v23  ;;  %v919_v50 = vld [vmem:[%s7693_s6 + $0xf8] sm:$0xff]  ;;  %v435_v57 = vand.u32 15, %v297_v28  ;;  %v8014_v44 = vpack.c.bf16 %v7843_v10, %v7840_v8  ;;  %v304_v8 = vadd.s32 192, %v7709_v23 }
  0xb2   : > { %6390 = vmatprep.subr.bf16.mxu1 %v7214_v56  ;;  %vm712_vm15 = vcmp.ne.s32.totalorder %v428_v18, 0  ;;  %vm7968_vm0 = vcmp.ne.s32.totalorder %v421_v27, 15  ;;  %9751 = vst [vmem:[#allocation28_spill] sm:$0xff] %v7977_v54  ;;  %951 = vst [vmem:[#allocation2 + $0x110] sm:$0xff] %v919_v50  ;;  %v7224_v18 = vld [vmem:[#allocation7 + $0x1f8] sm:$0xff]   ;;  %v8002_v27 = vld [vmem:[#allocation2 + $0x9f] sm:$0xff] }
  0xb3   : > { %v7980_v56 = vsel %vm712_vm15, 1.0, %v7480_v0  ;;  %v442_v60 = vand.u32 15, %v298_v32  ;;  %v7986_v59 = vsel %vm7968_vm0, 1.0, %v7480_v0  ;;  %v300_v0 = vadd.s32 160, %v7709_v23  ;;  %v8005_v28 = vld [vmem:[#allocation2 + $0x8] sm:$0xff]  ;;  %9756 = vst [vmem:[#allocation33_spill] sm:$0xff] %v8014_v44 }
  0xb4   : > { %9752 = vst [vmem:[#allocation29_spill] sm:$0xff] %v7980_v56  ;;  %9753 = vst [vmem:[#allocation30_spill] sm:$0xff] %v7986_v59  ;;  %v1000_v11 = vmul.f32 %v7980_v56, %v1222_v25  ;;  %vm809_vm2 = vcmp.ne.s32.totalorder %v435_v57, 15  ;;  %v302_v50 = vadd.s32 176, %v7709_v23  ;;  %v305_v10 = vadd.s32 200, %v7709_v23 }
  0xb5   : > { %6391 = vmatpush3.bf16.msra.mxu1 %v7215_v63  ;;  %v7988_v63 = vld [vmem:[#allocation2 + $0x81] sm:$0xff]  ;;  %vm714_vm1 = vcmp.ne.s32.totalorder %v442_v60, 0  ;;  %v306_v57 = vadd.s32 208, %v7709_v23 }
  0xb6   : > { %2520 = vmatmul.mubr.bf16.gmra.mrb[20].mxu0 %v1021_v24  ;;  %v7955_v24 = vpack.c.bf16 %v917_v14, %v916_v12  ;;  %6392 = vmatprep.subr.bf16.mxu1 %v7218_v34  ;;  %v299_v12 = vadd.s32 152, %v7709_v23  ;;  %v7223_v14 = vld [vmem:[#allocation7 + $0x1b0] sm:$0xff]   ;;  %v1024_v53 = vpack.c.bf16 %v7964_v5, %v1000_v11  ;;  %v301_v34 = vadd.s32 168, %v7709_v23 }
  0xb7   : > { %2527 = vmatprep.mubr.bf16.mxu0 %v1086_v29  ;;  %v1157_v29 = vmul.f32 %v7942_v9, %v7937_v62  ;;  %v8026_v60 = vld [vmem:[#allocation2 + $0xa7] sm:$0xff]  ;;  %v308_v11 = vadd.s32 224, %v7709_v23  ;;  %v498_v7 = vand.u32 15, %v306_v57 }
  0xb8   : > { %9748 = vst [vmem:[#allocation27_spill] sm:$0xff] %v7955_v24  ;;  %2681 = vmatmul.mubr.bf16.gmra.mrb[20].mxu1 %v1181_v6  ;;  %v7990_v6 = vld [vmem:[#allocation2 + $0x97] sm:$0xff]  ;;  %v449_v32 = vand.u32 15, %v299_v12  ;;  %v8036_v12 = vld [vmem:[#allocation2 + $0x89] sm:$0xff] }
  0xb9   : > { %2688 = vmatprep.mubr.bf16.mxu1 %v1278_v17  ;;  %6393 = vmatpush3.bf16.msra.mxu1 %v7219_v37  ;;  %v1182_v52 = vpack.c.bf16 %v1157_v29, %v7957_v48  ;;  %9754 = vst [vmem:[#allocation31_spill] sm:$0xff] %v7990_v6  ;;  %v1159_v17 = vmul.f32 %v7986_v59, %v7988_v63  ;;  %v8008_v29 = vsel %vm714_vm1, 1.0, %v8005_v28  ;;  %vm722_vm10 = vcmp.ne.s32.totalorder %v498_v7, 0 }
  0xba   : > { %6394 = vmatprep.subr.bf16.mxu1 %v7220_v35  ;;  %v1256_v25 = vmul.f32 %v7980_v56, %v7990_v6  ;;  %9755 = vst [vmem:[#allocation32_spill] sm:$0xff] %v8008_v29  ;;  %v456_v35 = vand.u32 15, %v300_v0  ;;  %vm8041_vm3 = vcmp.ne.s32.totalorder %v449_v32, 15  ;;  %v8055_v56 = vpack.c.bf16 %v7853_v16, %v7850_v15 }
  0xbb   : > { %v1183_v37 = vpack.c.bf16 %v1159_v17, %v7998_v20  ;;  %v484_v32 = vand.u32 15, %v304_v8  ;;  %v8097_v17 = vld [vmem:[#allocation2 + $0x99] sm:$0xff]  ;;  %v310_v8 = vadd.s32 240, %v7709_v23 }
  0xbc   : > { %vm8045_vm4 = vcmp.ne.s32.totalorder %v456_v35, 0 }
  0xbd   : > { %6395 = vmatpush3.bf16.msra.mxu1 %v7221_v45  ;;  %v8020_v45 = vsel %vm809_vm2, 1.0, %v8005_v28  ;;  %v8069_v15 = vsel %vm8045_vm4, 1.0, %v8005_v28  ;;  %vm8086_vm8 = vcmp.ne.s32.totalorder %v484_v32, 0 }
  0xbe   : > { %2528 = vmatmul.mubr.bf16.gmra.mrb[24].mxu0 %v1022_v61  ;;  %v1279_v61 = vpack.c.bf16 %v7964_v5, %v1254_v43  ;;  %6396 = vmatprep.subr.bf16.mxu1 %v7222_v58  ;;  %v7225_v43 = vld [vmem:[#allocation7 + $0x1b8] sm:$0xff]   ;;  %v1280_v5 = vpack.c.bf16 %v8002_v27, %v1256_v25  ;;  %9757 = vst [vmem:[#allocation34_spill] sm:$0xff] %v8020_v45  ;;  %v307_v58 = vadd.s32 216, %v7709_v23  ;;  %9764 = vst [vmem:[#allocation37_spill] sm:$0xff] %v8069_v15 }
  0xbf   : > { %2535 = vmatprep.mubr.bf16.mxu0 %v7946_v13  ;;  %v1258_v25 = vmul.f32 %v8008_v29, %v8026_v60 }
  0xc0   : > { %2689 = vmatmul.mubr.bf16.gmra.mrb[24].mxu1 %v1182_v52  ;;  %v303_v52 = vadd.s32 184, %v7709_v23 }
  0xc1   : > { %2696 = vmatprep.mubr.bf16.mxu1 %v1279_v61  ;;  %6397 = vmatpush3.bf16.msra.mxu1 %v7223_v14  ;;  %v1002_v61 = vmul.f32 %v8008_v29, %v7990_v6  ;;  %v1161_v14 = vmul.f32 %v8020_v45, %v8022_v47  ;;  %v505_v6 = vand.u32 15, %v307_v58  ;;  %v8148_v58 = vpack.c.bf16 %v7873_v4, %v7870_v31  ;;  %v8257_v31 = vld [vmem:[#allocation2 + $0x107] sm:$0xff] }
  0xc2   : > { %6398 = vmatprep.subr.bf16.mxu1 %v7224_v18  ;;  %v463_v18 = vand.u32 15, %v301_v34  ;;  %v526_v4 = vand.u32 15, %v310_v8  ;;  %v8179_v8 = vld [vmem:[#allocation2 + $0xb9] sm:$0xff]  ;;  %9803 = vst [vmem:[#allocation60_spill] sm:$0xff] %v8257_v31 }
  0xc3   : > { %v1025_v35 = vpack.c.bf16 %v8002_v27, %v1002_v61  ;;  %v1184_v34 = vpack.c.bf16 %v1161_v14, %v8036_v12  ;;  %v8084_v61 = vld [vmem:[#allocation2 + $0xb7] sm:$0xff]  ;;  %v1004_v14 = vmul.f32 %v8069_v15, %v8026_v60  ;;  %vm819_vm11 = vcmp.ne.s32.totalorder %v505_v6, 15  ;;  %9784 = vst [vmem:[#allocation47_spill] sm:$0xff] %v8148_v58 }
  0xc4   : > { %vm8071_vm5 = vcmp.ne.s32.totalorder %v463_v18, 15  ;;  %9771 = vst [vmem:[#allocation38_spill] sm:$0xff] %v8084_v61  ;;  %v1260_v6 = vmul.f32 %v8069_v15, %v8084_v61  ;;  %v8135_v32 = vsel %vm819_vm11, 1.0, %v8005_v28  ;;  %v8150_v15 = vld [vmem:[#allocation2 + $0xc7] sm:$0xff]  ;;  %vm8201_vm14 = vcmp.ne.s32.totalorder %v526_v4, 0  ;;  %v8217_v4 = vld [vmem:[#allocation2 + $0xef] sm:$0xff] }
  0xc5   : > { %6399 = vmatpush3.bf16.msra.mxu1 %v7225_v43  ;;  %v477_v43 = vand.u32 15, %v303_v52  ;;  %v8107_v18 = vsel %vm8071_vm5, 1.0, %v8005_v28  ;;  %9782 = vst [vmem:[#allocation45_spill] sm:$0xff] %v8135_v32  ;;  %9785 = vst [vmem:[#allocation48_spill] sm:$0xff] %v8150_v15 }
  0xc6   : > { %2536 = vmatmul.mubr.bf16.gmra.mrb[28].mxu0 %v1023_v36  ;;  %v8016_v36 = vld [vmem:[#allocation7 + $0x200] sm:$0xff]   ;;  %9776 = vst [vmem:[#allocation39_spill] sm:$0xff] %v8107_v18  ;;  %9798 = vst [vmem:[#allocation55_spill] sm:$0xff] %v8217_v4 }
  0xc7   : > { %2543 = vmatprep.mubr.bf16.mxu0 %v7977_v54  ;;  %6992 = vmatprep.subr.bf16.mxu0 %v8016_v36  ;;  %v512_v54 = vand.u32 15, %v308_v11  ;;  %vm8080_vm7 = vcmp.ne.s32.totalorder %v477_v43, 15  ;;  %v309_v11 = vadd.s32 232, %v7709_v23  ;;  %v8132_v43 = vsel %vm722_vm10, 1.0, %v8005_v28 }
  0xc8   : > { %2697 = vmatmul.mubr.bf16.gmra.mrb[28].mxu1 %v1183_v37  ;;  %v8051_v37 = vld [vmem:[#allocation2 + $0xaf] sm:$0xff]  ;;  %9781 = vst [vmem:[#allocation44_spill] sm:$0xff] %v8132_v43 }
  0xc9   : > { %2704 = vmatprep.mubr.bf16.mxu1 %v1280_v5  ;;  %9762 = vst [vmem:[#allocation35_spill] sm:$0xff] %v8051_v37  ;;  %v8062_v5 = vsel %vm8041_vm3, 1.0, %v8005_v28  ;;  %v1281_v52 = vpack.c.bf16 %v8051_v37, %v1258_v25  ;;  %vm724_vm12 = vcmp.ne.s32.totalorder %v512_v54, 0  ;;  %v8117_v54 = vsel %vm8080_vm7, 1.0, %v8005_v28 }
  0xca   : > { %9763 = vst [vmem:[#allocation36_spill] sm:$0xff] %v8062_v5  ;;  %9778 = vst [vmem:[#allocation41_spill] sm:$0xff] %v8117_v54  ;;  %v8124_v25 = vsel %vm8086_vm8, 1.0, %v8005_v28  ;;  %v1026_v16 = vpack.c.bf16 %v8051_v37, %v1004_v14  ;;  %v8176_v37 = vld [vmem:[#allocation2 + $0xd7] sm:$0xff] }
  0xcb   : > { %9779 = vst [vmem:[#allocation42_spill] sm:$0xff] %v8124_v25  ;;  %9790 = vst [vmem:[#allocation51_spill] sm:$0xff] %v8176_v37 }
  0xce   : > { %2544 = vmatmul.mubr.bf16.gmra.mrb[32].mxu0 %v1024_v53  ;;  %v470_v53 = vand.u32 15, %v302_v50  ;;  %v8064_v50 = vld [vmem:[#allocation2 + $0xa1] sm:$0xff] }
  0xcf   : > { %2551 = vmatprep.mubr.bf16.mxu0 %v8014_v44  ;;  %v491_v44 = vand.u32 15, %v305_v10  ;;  %v1163_v0 = vmul.f32 %v8062_v5, %v8064_v50  ;;  %v311_v10 = vadd.s32 248, %v7709_v23 }
  0xd0   : > { %vm8076_vm6 = vcmp.ne.s32.totalorder %v470_v53, 0  ;;  %2705 = vmatmul.mubr.bf16.gmra.mrb[32].mxu1 %v1184_v34  ;;  %v519_v34 = vand.u32 15, %v309_v11  ;;  %v8153_v11 = vld [vmem:[#allocation2 + $0xa9] sm:$0xff] }
  0xd1   : > { %vm8090_vm9 = vcmp.ne.s32.totalorder %v491_v44, 15  ;;  %v8102_v44 = vld [vmem:[#allocation2 + $0xbf] sm:$0xff]  ;;  %v8112_v7 = vsel %vm8076_vm6, 1.0, %v8005_v28  ;;  %2712 = vmatprep.mubr.bf16.mxu1 %v1281_v52  ;;  %v8141_v52 = vld [vmem:[#allocation2 + $0xb1] sm:$0xff]  ;;  %v1185_v57 = vpack.c.bf16 %v1163_v0, %v8097_v17 }
  0xd2   : > { %9777 = vst [vmem:[#allocation40_spill] sm:$0xff] %v8112_v7  ;;  %v8129_v53 = vsel %vm8090_vm9, 1.0, %v8005_v28  ;;  %v1282_v29 = vpack.c.bf16 %v8102_v44, %v1260_v6  ;;  %v1006_v14 = vmul.f32 %v8112_v7, %v8084_v61  ;;  %v1165_v23 = vmul.f32 %v8107_v18, %v8141_v52  ;;  %v8160_v0 = vld [vmem:[#allocation2 + $0xcf] sm:$0xff]  ;;  %v8169_v61 = vld [vmem:[#allocation2 + $0xc1] sm:$0xff] }
  0xd3   : > { %9780 = vst [vmem:[#allocation43_spill] sm:$0xff] %v8129_v53  ;;  %9786 = vst [vmem:[#allocation49_spill] sm:$0xff] %v8160_v0  ;;  %vm8162_vm13 = vcmp.ne.s32.totalorder %v519_v34, 15  ;;  %v1262_v6 = vmul.f32 %v8112_v7, %v8150_v15 }
  0xd5   : > { %v1283_v34 = vpack.c.bf16 %v8160_v0, %v1262_v6  ;;  %v1264_v6 = vmul.f32 %v8124_v25, %v8176_v37 }
  0xd6   : > { %2552 = vmatmul.mubr.bf16.gmra.mrb[36].mxu0 %v1025_v35  ;;  %v8138_v35 = vsel %vm724_vm12, 1.0, %v8005_v28 }
  0xd7   : > { %2559 = vmatprep.mubr.bf16.mxu0 %v8055_v56  ;;  %9783 = vst [vmem:[#allocation46_spill] sm:$0xff] %v8138_v35 }
  0xd8   : > { %2713 = vmatmul.mubr.bf16.gmra.mrb[36].mxu1 %v1185_v57  ;;  %v1186_v57 = vpack.c.bf16 %v1165_v23, %v8153_v11  ;;  %v8186_v23 = vld [vmem:[#allocation2 + $0xdf] sm:$0xff] }
  0xd9   : > { %2720 = vmatprep.mubr.bf16.mxu1 %v1282_v29  ;;  %v1008_v29 = vmul.f32 %v8124_v25, %v8150_v15  ;;  %9791 = vst [vmem:[#allocation52_spill] sm:$0xff] %v8186_v23  ;;  %v8199_v15 = vld [vmem:[#allocation2 + $0xe7] sm:$0xff] }
  0xda   : > { %9793 = vst [vmem:[#allocation54_spill] sm:$0xff] %v8199_v15 }
  0xde   : > { %2560 = vmatmul.mubr.bf16.gmra.mrb[40].mxu0 %v1026_v16  ;;  %v1027_v16 = vpack.c.bf16 %v8102_v44, %v1006_v14  ;;  %v1167_v14 = vmul.f32 %v8117_v54, %v8169_v61 }
  0xdf   : > { %2567 = vmatprep.mubr.bf16.mxu0 %v8148_v58  ;;  %v8174_v58 = vpack.c.bf16 %v7885_v41, %v7882_v39  ;;  %v8191_v39 = vsel %vm8162_vm13, 1.0, %v8005_v28  ;;  %v533_v41 = vand.u32 15, %v311_v10  ;;  %v1284_v10 = vpack.c.bf16 %v8186_v23, %v1264_v6 }
  0xe0   : > { %2721 = vmatmul.mubr.bf16.gmra.mrb[40].mxu1 %v1186_v57  ;;  %9792 = vst [vmem:[#allocation53_spill] sm:$0xff] %v8191_v39  ;;  %v8196_v57 = vld [vmem:[#allocation2 + $0xd1] sm:$0xff]  ;;  %v1187_v7 = vpack.c.bf16 %v1167_v14, %v8179_v8 }
  0xe1   : > { %9789 = vst [vmem:[#allocation50_spill] sm:$0xff] %v8174_v58  ;;  %2728 = vmatprep.mubr.bf16.mxu1 %v1283_v34  ;;  %vm8205_vm15 = vcmp.ne.s32.totalorder %v533_v41, 15  ;;  %v8210_v34 = vld [vmem:[#allocation2 + $0xc9] sm:$0xff]  ;;  %v1169_v14 = vmul.f32 %v8129_v53, %v8196_v57  ;;  %v1266_v41 = vmul.f32 %v8132_v43, %v8199_v15 }
  0xe3   : > { %v1188_v25 = vpack.c.bf16 %v1169_v14, %v8210_v34  ;;  %v8249_v14 = vld [vmem:[#allocation2 + $0xff] sm:$0xff] }
  0xe6   : > { %2568 = vmatmul.mubr.bf16.gmra.mrb[44].mxu0 %v1027_v16  ;;  %v1028_v16 = vpack.c.bf16 %v8160_v0, %v1008_v29  ;;  %v1010_v29 = vmul.f32 %v8132_v43, %v8176_v37  ;;  %v8229_v37 = vld [vmem:[#allocation2 + $0xf7] sm:$0xff]  ;;  %v1369_v43 = vld [vmem:[#allocation2 + $0x21] sm:$0xff] }
  0xe7   : > { %2575 = vmatprep.mubr.bf16.mxu0 %v8174_v58  ;;  %9800 = vst [vmem:[#allocation57_spill] sm:$0xff] %v8229_v37  ;;  %v8232_v0 = vld [vmem:[#allocation2 + $0xd9] sm:$0xff] }
  0xe8   : > { %2729 = vmatmul.mubr.bf16.gmra.mrb[44].mxu1 %v1187_v7  ;;  %v1029_v6 = vpack.c.bf16 %v8186_v23, %v1010_v29  ;;  %v8227_v7 = vpack.c.bf16 %v7920_v42, %v7917_v38  ;;  %v8239_v29 = vsel %vm8201_vm14, 1.0, %v8005_v28  ;;  %v8244_v38 = vsel %vm8205_vm15, 1.0, %v8005_v28  ;;  %v8276_v23 = vld [vmem:[#allocation2 + $0x31] sm:$0xff] }
  0xe9   : > { %2736 = vmatprep.mubr.bf16.mxu1 %v1284_v10  ;;  %v1012_v10 = vmul.f32 %v8138_v35, %v8199_v15  ;;  %9801 = vst [vmem:[#allocation58_spill] sm:$0xff] %v8239_v29  ;;  %9802 = vst [vmem:[#allocation59_spill] sm:$0xff] %v8244_v38  ;;  %v8260_v15 = vld [vmem:[#allocation2 + $0xe9] sm:$0xff] }
  0xea   : > { %9799 = vst [vmem:[#allocation56_spill] sm:$0xff] %v8227_v7 }
  0xeb   : > { %v1030_v58 = vpack.c.bf16 %v8217_v4, %v1012_v10 }
  0xee   : > { %2576 = vmatmul.mubr.bf16.gmra.mrb[48].mxu0 %v1028_v16  ;;  %v8222_v16 = vld [vmem:[#allocation2 + $0xe1] sm:$0xff] }
  0xef   : > { %2583 = vmatprep.mubr.bf16.mxu0 %v7901_v2  ;;  %v1285_v2 = vpack.c.bf16 %v8217_v4, %v1266_v41  ;;  %v1171_v42 = vmul.f32 %v8135_v32, %v8222_v16  ;;  %v1268_v41 = vmul.f32 %v8138_v35, %v8229_v37  ;;  %v8267_v35 = vld [vmem:[#allocation2 + $0x10f] sm:$0xff]  ;;  %v8273_v4 = vld [vmem:[#allocation2 + $0x101] sm:$0xff]  ;;  %v8279_v32 = vld [vmem:[#allocation2 + $0xf9] sm:$0xff] }
  0xf0   : > { %2737 = vmatmul.mubr.bf16.gmra.mrb[48].mxu1 %v1188_v25  ;;  %9804 = vst [vmem:[#allocation61_spill] sm:$0xff] %v8267_v35 }
  0xf1   : > { %2744 = vmatprep.mubr.bf16.mxu1 %v1285_v2  ;;  %v1189_v28 = vpack.c.bf16 %v1171_v42, %v8232_v0  ;;  %v1286_v25 = vpack.c.bf16 %v8249_v14, %v1268_v41  ;;  %v1014_v2 = vmul.f32 %v8239_v29, %v8229_v37  ;;  %v1401_v42 = vmul.f32 %v7744_v1, %v1369_v43  ;;  %v1305_v43 = vld [vmem:[#allocation2 + $0x20] sm:$0xff] }
  0xf2   : > { %v1270_v41 = vmul.f32 %v8239_v29, %v8257_v31  ;;  %v1561_v29 = vld [vmem:[#allocation2 + $0x30] sm:$0xff]  ;;  %v7227_v31 = vld [vmem:[#allocation7 + $0x208] sm:$0xff]  }
  0xf6   : > { %2584 = vmatmul.mubr.bf16.gmra.mrb[52].mxu0 %v1029_v6  ;;  %v8254_v6 = vld [vmem:[#allocation2 + $0xf1] sm:$0xff] }
  0xf7   : > { %2591 = vmatprep.mubr.bf16.mxu0 %v8227_v7  ;;  %v1368_v7 = vld [vmem:[#allocation2 + $0x19] sm:$0xff]  ;;  %v1173_v10 = vmul.f32 %v8191_v39, %v8254_v6  ;;  %v1287_v39 = vpack.c.bf16 %v8267_v35, %v1270_v41  ;;  %v1464_v41 = vld [vmem:[#allocation2 + $0x27] sm:$0xff] }
  0xf8   : > { %2745 = vmatmul.mubr.bf16.gmra.mrb[52].mxu1 %v1189_v28  ;;  %v1432_v28 = vpack.c.bf16 %v1401_v42, %v1368_v7  ;;  %v1403_v7 = vmul.f32 %v7782_v19, %v8276_v23  ;;  %v8287_v35 = vld [vmem:[#allocation2 + $0x41] sm:$0xff] }
  0xf9   : > { %2752 = vmatprep.mubr.bf16.mxu1 %v1286_v25  ;;  %v1190_v37 = vpack.c.bf16 %v1173_v10, %v8260_v15  ;;  %v1175_v25 = vmul.f32 %v8244_v38, %v8273_v4  ;;  %v8285_v10 = vld [vmem:[#allocation2 + $0x29] sm:$0xff]  ;;  %v7228_v19 = vld [vmem:[#allocation7 + $0x210] sm:$0xff]  }
  0xfe   : > { %2592 = vmatmul.mubr.bf16.gmra.mrb[56].mxu0 %v1030_v58  ;;  %v1031_v58 = vpack.c.bf16 %v8249_v14, %v1014_v2  ;;  %v1560_v2 = vld [vmem:[#allocation2 + $0x28] sm:$0xff] }
  0xff   : > { %2599 = vmatprep.mubr.bf16.mxu0 %v7955_v24  ;;  %v1304_v24 = vld [vmem:[#allocation2 + $0x18] sm:$0xff]  ;;  %v1592_v1 = vpack.c.bf16 %v1561_v29, %v1560_v2  ;;  %v1563_v29 = vld [vmem:[#allocation2 + $0x40] sm:$0xff] }
 0x100   : > { %2753 = vmatmul.mubr.bf16.gmra.mrb[56].mxu1 %v1190_v37  ;;  %v1336_v42 = vpack.c.bf16 %v1305_v43, %v1304_v24  ;;  %v1433_v37 = vpack.c.bf16 %v1403_v7, %v8285_v10  ;;  %v1465_v24 = vld [vmem:[#allocation2 + $0x2f] sm:$0xff]  ;;  %v8295_v43 = vld [vmem:[#allocation2 + $0x39] sm:$0xff] }
 0x101   : > { %2760 = vmatprep.mubr.bf16.mxu1 %v1287_v39  ;;  %v1496_v39 = vmul.f32 %v7716_v40, %v1464_v41  ;;  %9805 = vst [vmem:[#allocation62_spill] sm:$0xff] %v8295_v43  ;;  %v7229_v41 = vld [vmem:[#allocation7 + $0x218] sm:$0xff]  }
 0x103   : > { %v1528_v2 = vpack.c.bf16 %v1465_v24, %v1496_v39  ;;  %v8303_v39 = vld [vmem:[#allocation2 + $0x49] sm:$0xff] }
 0x104   : > { %9806 = vst [vmem:[#allocation63_spill] sm:$0xff] %v8303_v39  ;;  %v7230_v24 = vld [vmem:[#allocation7 + $0x220] sm:$0xff]  }
 0x106   : > { %2600 = vmatmul.mubr.bf16.gmra.mrb[60].mxu0 %v1031_v58  ;;  %v1191_v58 = vpack.c.bf16 %v1175_v25, %v8279_v32  ;;  %v1562_v25 = vld [vmem:[#allocation2 + $0x38] sm:$0xff] }
 0x107   : > { %2801 = vmatprep.mubr.bf16.mxu0 %v1432_v28  ;;  %v1405_v28 = vmul.f32 %v7819_v55, %v8287_v35  ;;  %v1467_v55 = vld [vmem:[#allocation2 + $0x3f] sm:$0xff] }
 0x108   : > { %2761 = vmatmul.mubr.bf16.gmra.mrb[60].mxu1 %v1191_v58  ;;  %v8298_v58 = vld [vmem:[#allocation2 + $0x51] sm:$0xff] }
 0x109   : > { %2962 = vmatprep.mubr.bf16.mxu1 %v1592_v1  ;;  %v1434_v7 = vpack.c.bf16 %v1405_v28, %v8295_v43  ;;  %v1407_v40 = vmul.f32 %v7867_v26, %v8298_v58  ;;  %v1565_v28 = vld [vmem:[#allocation2 + $0x50] sm:$0xff]  ;;  %v1566_v43 = vld [vmem:[#allocation2 + $0x58] sm:$0xff] }
 0x10a   : > { %v1469_v26 = vld [vmem:[#allocation2 + $0x4f] sm:$0xff] }
 0x10e   : > { %2802 = vmatmul.mubr.bf16.vlgmr.msra.gmra.mrb[64].mxu0 %v1336_v42  ;;  %v1593_v42 = vpack.c.bf16 %v1563_v29, %v1562_v25  ;;  %v1435_v29 = vpack.c.bf16 %v1407_v40, %v8303_v39  ;;  %v7232_v40 = vld [vmem:[#allocation7 + $0x230] sm:$0xff]   ;;  %v1470_v39 = vld [vmem:[#allocation2 + $0x57] sm:$0xff] }
 0x10f   : > { %6993 = vmatpush3.bf16.msra.mxu0 %v8016_v36  ;;  %2809 = vmatprep.mubr.bf16.mxu0 %v1433_v37  ;;  %v1466_v36 = vld [vmem:[#allocation2 + $0x37] sm:$0xff] }
 0x110   : > { %6994 = vmatprep.subr.bf16.mxu0 %v7227_v31  ;;  %2963 = vmatmul.mubr.bf16.vlgmr.msra.gmra.mrb[64].mxu1 %v1528_v2  ;;  %v1498_v37 = vmul.f32 %v7749_v3, %v1466_v36  ;;  %v1468_v2 = vld [vmem:[#allocation2 + $0x47] sm:$0xff] }
 0x111   : > { %2970 = vmatprep.mubr.bf16.mxu1 %v1593_v42  ;;  %v1500_v36 = vmul.f32 %v7787_v21, %v1468_v2  ;;  %v7307_v3 = vld [vmem:[#allocation2 + $0x61] sm:$0xff] }
 0x112   : > { %v1529_v25 = vpack.c.bf16 %v1467_v55, %v1498_v37  ;;  %v1567_v55 = vld [vmem:[#allocation2 + $0x60] sm:$0xff] }
 0x113   : > { %6995 = vmatpush3.bf16.msra.mxu0 %v7227_v31  ;;  %v1564_v31 = vld [vmem:[#allocation2 + $0x48] sm:$0xff]  ;;  %v1530_v37 = vpack.c.bf16 %v1469_v26, %v1500_v36  ;;  %v1569_v26 = vld [vmem:[#allocation2 + $0x70] sm:$0xff] }
 0x114   : > { %6996 = vmatprep.subr.bf16.mxu0 %v7228_v19  ;;  %v1472_v36 = vld [vmem:[#allocation2 + $0x67] sm:$0xff] }
 0x116   : > { %2810 = vmatmul.mubr.bf16.gmra.mrb[68].mxu0 %v1592_v1  ;;  %v1594_v1 = vpack.c.bf16 %v1565_v28, %v1564_v31  ;;  %v7308_v31 = vld [vmem:[#allocation2 + $0x59] sm:$0xff]  ;;  %v1595_v28 = vpack.c.bf16 %v1567_v55, %v1566_v43 }
 0x117   : > { %2817 = vmatprep.mubr.bf16.mxu0 %v1434_v7  ;;  %6997 = vmatpush3.bf16.msra.mxu0 %v7228_v19  ;;  %v7231_v7 = vld [vmem:[#allocation7 + $0x228] sm:$0xff]   ;;  %v1409_v19 = vmul.f32 %v7307_v3, %v7892_v49  ;;  %v1411_v3 = vmul.f32 %v7914_v33, %v7937_v62  ;;  %v1413_v62 = vmul.f32 %v7942_v9, %v7988_v63 }
 0x118   : > { %6998 = vmatprep.subr.bf16.mxu0 %v7229_v41  ;;  %2971 = vmatmul.mubr.bf16.gmra.mrb[68].mxu1 %v1529_v25  ;;  %v1502_v25 = vmul.f32 %v7806_v46, %v1470_v39  ;;  %v1504_v39 = vmul.f32 %v7863_v22, %v1472_v36  ;;  %v9809_v36 = vld [vmem:[#allocation26_spill] sm:$0xff] }
 0x119   : > { %2978 = vmatprep.mubr.bf16.mxu1 %v1594_v1  ;;  %v1437_v43 = vpack.c.bf16 %v1411_v3, %v7957_v48  ;;  %v1438_v55 = vpack.c.bf16 %v1413_v62, %v7998_v20  ;;  %v7309_v20 = vld [vmem:[#allocation2 + $0x87] sm:$0xff]  ;;  %v1419_v62 = vmul.f32 %v8062_v5, %v8141_v52 }
 0x11a   : > { %v1508_v3 = vmul.f32 %v7309_v20, %v7911_v30 }
 0x11b   : > { %6999 = vmatpush3.bf16.msra.mxu0 %v7229_v41  ;;  %v1436_v41 = vpack.c.bf16 %v1409_v19, %v7308_v31  ;;  %v1317_v31 = vld [vmem:[#allocation2 + $0x80] sm:$0xff] }
 0x11c   : > { %7000 = vmatprep.subr.bf16.mxu0 %v7230_v24 }
 0x11e   : > { %2818 = vmatmul.mubr.bf16.gmra.mrb[72].mxu0 %v1593_v42  ;;  %v7233_v42 = vld [vmem:[#allocation7 + $0x238] sm:$0xff]  }
 0x11f   : > { %2825 = vmatprep.mubr.bf16.mxu0 %v1435_v29  ;;  %7001 = vmatpush3.bf16.msra.mxu0 %v7230_v24  ;;  %v1471_v24 = vld [vmem:[#allocation2 + $0x5f] sm:$0xff]  ;;  %v1568_v29 = vld [vmem:[#allocation2 + $0x68] sm:$0xff] }
 0x120   : > { %7002 = vmatprep.subr.bf16.mxu0 %v7231_v7  ;;  %2979 = vmatmul.mubr.bf16.gmra.mrb[72].mxu1 %v1530_v37  ;;  %v1531_v2 = vpack.c.bf16 %v1471_v24, %v1502_v25  ;;  %v1316_v37 = vld [vmem:[#allocation2 + $0x78] sm:$0xff]  ;;  %v1318_v24 = vld [vmem:[#allocation2 + $0x88] sm:$0xff] }
 0x121   : > { %2986 = vmatprep.mubr.bf16.mxu1 %v1595_v28  ;;  %v1342_v63 = vpack.c.bf16 %v1317_v31, %v1316_v37 }
 0x123   : > { %7003 = vmatpush3.bf16.msra.mxu0 %v7231_v7  ;;  %v1596_v7 = vpack.c.bf16 %v1569_v26, %v1568_v29  ;;  %v1319_v29 = vld [vmem:[#allocation2 + $0x90] sm:$0xff]  ;;  %v1417_v26 = vmul.f32 %v8020_v45, %v8064_v50 }
 0x124   : > { %7004 = vmatprep.subr.bf16.mxu0 %v7232_v40 }
 0x126   : > { %2826 = vmatmul.mubr.bf16.gmra.mrb[76].mxu0 %v1594_v1  ;;  %v1473_v1 = vld [vmem:[#allocation2 + $0x6f] sm:$0xff] }
 0x127   : > { %2833 = vmatprep.mubr.bf16.mxu0 %v1436_v41  ;;  %7005 = vmatpush3.bf16.msra.mxu0 %v7232_v40  ;;  %v1532_v19 = vpack.c.bf16 %v1473_v1, %v1504_v39  ;;  %v1474_v40 = vld [vmem:[#allocation2 + $0x77] sm:$0xff]  ;;  %v1415_v41 = vmul.f32 %v7986_v59, %v8022_v47  ;;  %v1343_v47 = vpack.c.bf16 %v1319_v29, %v1318_v24  ;;  %v9810_v1 = vld [vmem:[#allocation33_spill] sm:$0xff] }
 0x128   : > { %7006 = vmatprep.subr.bf16.mxu0 %v7233_v42  ;;  %2987 = vmatmul.mubr.bf16.gmra.mrb[76].mxu1 %v1531_v2  ;;  %v1506_v48 = vmul.f32 %v7897_v51, %v1474_v40  ;;  %v9807_v2 = vld [vmem:[#allocation28_spill] sm:$0xff]  ;;  %v1421_v40 = vmul.f32 %v8107_v18, %v8169_v61  ;;  %v9819_v29 = vld [vmem:[#allocation49_spill] sm:$0xff] }
 0x129   : > { %2994 = vmatprep.mubr.bf16.mxu1 %v1596_v7  ;;  %v1439_v25 = vpack.c.bf16 %v1415_v41, %v8036_v12  ;;  %v9808_v12 = vld [vmem:[#allocation31_spill] sm:$0xff] }
 0x12a   : > { %v1510_v39 = vmul.f32 %v9809_v36, %v9808_v12  ;;  %v1442_v37 = vpack.c.bf16 %v1421_v40, %v8179_v8  ;;  %v9815_v41 = vld [vmem:[#allocation47_spill] sm:$0xff]  ;;  %v9816_v8 = vld [vmem:[#allocation48_spill] sm:$0xff] }
 0x12b   : > { %7007 = vmatpush3.bf16.msra.mxu0 %v7233_v42 }
 0x12c   : > { %v1535_v50 = vpack.c.bf16 %v8002_v27, %v1510_v39  ;;  %v9813_v27 = vld [vmem:[#allocation38_spill] sm:$0xff] }
 0x12d   : > { %v9823_v39 = vld [vmem:[#allocation22_spill] sm:$0xff] }
 0x12e   : > { %2834 = vmatmul.mubr.bf16.gmra.mrb[80].mxu0 %v1595_v28  ;;  %v1475_v28 = vld [vmem:[#allocation2 + $0x7f] sm:$0xff] }
 0x12f   : > { %2841 = vmatprep.mubr.bf16.mxu0 %v1437_v43  ;;  %v1533_v42 = vpack.c.bf16 %v1475_v28, %v1506_v48  ;;  %v9812_v48 = vld [vmem:[#allocation35_spill] sm:$0xff] }
 0x130   : > { %2995 = vmatmul.mubr.bf16.gmra.mrb[80].mxu1 %v1532_v19  ;;  %v1441_v19 = vpack.c.bf16 %v1419_v62, %v8153_v11  ;;  %v9814_v11 = vld [vmem:[#allocation32_spill] sm:$0xff] }
 0x131   : > { %3002 = vmatprep.mubr.bf16.mxu1 %v7946_v13  ;;  %v7310_v13 = vld [vmem:[#allocation2 + $0x8f] sm:$0xff]  ;;  %v1514_v31 = vmul.f32 %v9814_v11, %v9813_v27 }
 0x132   : > { %v1534_v43 = vpack.c.bf16 %v7310_v13, %v1508_v3  ;;  %v9821_v13 = vld [vmem:[#allocation40_spill] sm:$0xff] }
 0x133   : > { %v1537_v61 = vpack.c.bf16 %v8102_v44, %v1514_v31 }
 0x136   : > { %2842 = vmatmul.mubr.bf16.gmra.mrb[84].mxu0 %v1596_v7  ;;  %v1440_v7 = vpack.c.bf16 %v1417_v26, %v8097_v17  ;;  %v9811_v17 = vld [vmem:[#allocation29_spill] sm:$0xff] }
 0x137   : > { %2849 = vmatprep.mubr.bf16.mxu0 %v1438_v55  ;;  %v1512_v55 = vmul.f32 %v9811_v17, %v8026_v60  ;;  %v1423_v60 = vmul.f32 %v8117_v54, %v8196_v57  ;;  %v7240_v17 = vld [vmem:[#allocation9 + $0x58] sm:$0xff]  }
 0x138   : > { %3003 = vmatmul.mubr.bf16.gmra.mrb[84].mxu1 %v1533_v42  ;;  %v1425_v42 = vmul.f32 %v8129_v53, %v8222_v16  ;;  %v9820_v16 = vld [vmem:[#allocation51_spill] sm:$0xff] }
 0x139   : > { %3010 = vmatprep.mubr.bf16.mxu1 %v9807_v2  ;;  %v1536_v52 = vpack.c.bf16 %v9812_v48, %v1512_v55  ;;  %v1443_v28 = vpack.c.bf16 %v1423_v60, %v8210_v34  ;;  %v9824_v55 = vld [vmem:[#allocation52_spill] sm:$0xff] }
 0x13a   : > { %v1444_v34 = vpack.c.bf16 %v1425_v42, %v8232_v0  ;;  %v9826_v42 = vld [vmem:[#allocation42_spill] sm:$0xff] }
 0x13e   : > { %2850 = vmatmul.mubr.bf16.gmra.mrb[88].mxu0 %v1342_v63  ;;  %v9817_v63 = vld [vmem:[#allocation37_spill] sm:$0xff] }
 0x13f   : > { %2857 = vmatprep.mubr.bf16.mxu0 %v1439_v25  ;;  %v9818_v25 = vld [vmem:[#allocation50_spill] sm:$0xff] }
 0x140   : > { %3011 = vmatmul.mubr.bf16.gmra.mrb[88].mxu1 %v1534_v43  ;;  %v1518_v43 = vmul.f32 %v9821_v13, %v9820_v16 }
 0x141   : > { %3018 = vmatprep.mubr.bf16.mxu1 %v9810_v1 }
 0x142   : > { %v1539_v40 = vpack.c.bf16 %v9824_v55, %v1518_v43  ;;  %v7235_v55 = vld [vmem:[#allocation9] sm:$0xff]  }
 0x146   : > { %2858 = vmatmul.mubr.bf16.gmra.mrb[92].mxu0 %v1343_v47  ;;  %v8361_v47 = vld [vmem:[%s9573_s3] ss:$0 sm:$0xff] }
 0x147   : > { %2865 = vmatprep.mubr.bf16.mxu0 %v1440_v7  ;;  %v9822_v7 = vld [vmem:[#allocation45_spill] sm:$0xff] }
 0x148   : > { %3019 = vmatmul.mubr.bf16.gmra.mrb[92].mxu1 %v1535_v50  ;;  %v1427_v12 = vmul.f32 %v9822_v7, %v8254_v6 }
 0x149   : > { %3026 = vmatprep.mubr.bf16.mxu1 %v8055_v56 }
 0x14e   : > { %2866 = vmatmul.mubr.bf16.gmra.mrb[96].mxu0 %v9810_v1 }
 0x14f   : > { %2873 = vmatprep.mubr.bf16.mxu0 %v1441_v19 }
 0x150   : > { %3027 = vmatmul.mubr.bf16.gmra.mrb[96].mxu1 %v1536_v52 }
 0x151   : > { %3034 = vmatprep.mubr.bf16.mxu1 %v9815_v41 }
 0x156   : > { %2874 = vmatmul.mubr.bf16.gmra.mrb[100].mxu0 %v8055_v56  ;;  %v1516_v56 = vmul.f32 %v9817_v63, %v9816_v8 }
 0x157   : > { %2881 = vmatprep.mubr.bf16.mxu0 %v1442_v37  ;;  %v1445_v37 = vpack.c.bf16 %v1427_v12, %v8260_v15 }
 0x158   : > { %3035 = vmatmul.mubr.bf16.gmra.mrb[100].mxu1 %v1537_v61  ;;  %v1538_v44 = vpack.c.bf16 %v9819_v29, %v1516_v56  ;;  %v9825_v56 = vld [vmem:[#allocation54_spill] sm:$0xff] }
 0x159   : > { %3042 = vmatprep.mubr.bf16.mxu1 %v9818_v25 }
 0x15e   : > { %2882 = vmatmul.mubr.bf16.gmra.mrb[104].mxu0 %v9815_v41 }
 0x15f   : > { %2889 = vmatprep.mubr.bf16.mxu0 %v1443_v28 }
 0x160   : > { %3043 = vmatmul.mubr.bf16.gmra.mrb[104].mxu1 %v1538_v44 }
 0x161   : > { %v6064_v20 = vpop.f32.mrb[0].mxu0  ;;  %3050 = vmatprep.mubr.bf16.mxu1 %v9823_v39 }
 0x162   : > { %v6065_v57 = vpop.f32.mrb[1].mxu0 }
 0x163   : > { %v6066_v3 = vadd.f32 %v6065_v57, %v6064_v20  ;;  %v6067_v24 = vpop.f32.mrb[2].mxu0  ;;  %v6176_v1 = vpop.f32.mrb[0].mxu1  ;;  %v9827_v20 = vld [vmem:[#allocation53_spill] sm:$0xff]  ;;  %v9828_v57 = vld [vmem:[#allocation56_spill] sm:$0xff] }
 0x164   : > { %v6068_v26 = vpop.f32.mrb[3].mxu0  ;;  %v6177_v19 = vpop.f32.mrb[1].mxu1  ;;  %v1429_v15 = vmul.f32 %v9827_v20, %v8273_v4 }
 0x165   : > { %v6069_v2 = vadd.f32 %v6068_v26, %v6067_v24  ;;  %v2482_v0 = vadd.f32 %v6066_v3, %v8361_v47  ;;  %v6178_v31 = vadd.f32 %v6177_v19, %v6176_v1  ;;  %v6179_v60 = vpop.f32.mrb[2].mxu1  ;;  %v7234_v19 = vld [vmem:[#allocation9 + $0x40] sm:$0xff]  }
 0x166   : > { %2890 = vmatmul.mubr.bf16.gmra.mrb[108].mxu0 %v9818_v25  ;;  %v6180_v6 = vpop.f32.mrb[3].mxu1  ;;  %v1520_v25 = vmul.f32 %v9826_v42, %v9825_v56  ;;  %6520 = vmatprep.subr.bf16.mxu1 %v7234_v19  ;;  %v9842_v42 = vld [vmem:[#allocation19_spill] sm:$0xff] }
 0x167   : > { %2897 = vmatprep.mubr.bf16.mxu0 %v1444_v34  ;;  %v2485_v27 = vadd.f32 %v6069_v2, %v8361_v47  ;;  %v6181_v28 = vadd.f32 %v6180_v6, %v6179_v60  ;;  %v8373_v8 = vadd.f32 %v6178_v31, %v2482_v0  ;;  %v9829_v2 = vld [vmem:[#allocation55_spill] sm:$0xff]  ;;  %v8396_v6 = vld [vmem:[#allocation2 + $0x109] sm:$0xff]  ;;  %6521 = vmatpush3.bf16.msra.mxu1 %v7235_v55 }
 0x168   : > { %3051 = vmatmul.mubr.bf16.gmra.mrb[108].mxu1 %v1539_v40  ;;  %v1540_v16 = vpack.c.bf16 %v9829_v2, %v1520_v25  ;;  %v9834_v55 = vld [vmem:[#allocation46_spill] sm:$0xff] }
 0x169   : > { %v6070_v62 = vpop.f32.mrb[4].mxu0  ;;  %3058 = vmatprep.mubr.bf16.mxu1 %v9828_v57  ;;  %v8380_v3 = vadd.f32 %v6181_v28, %v2485_v27  ;;  %v9830_v27 = vld [vmem:[#allocation57_spill] sm:$0xff] }
 0x16a   : > { %v6071_v50 = vpop.f32.mrb[5].mxu0 }
 0x16b   : > { %v6072_v48 = vadd.f32 %v6071_v50, %v6070_v62  ;;  %v6073_v52 = vpop.f32.mrb[6].mxu0  ;;  %v6182_v44 = vpop.f32.mrb[4].mxu1  ;;  %v8386_v50 = vld [vmem:[#allocation2 + $0x111] sm:$0xff] }
 0x16c   : > { %v6074_v41 = vpop.f32.mrb[7].mxu0  ;;  %v6183_v34 = vpop.f32.mrb[5].mxu1  ;;  %v1431_v60 = vmul.f32 %v8244_v38, %v8386_v50 }
 0x16d   : > { %v6075_v61 = vadd.f32 %v6074_v41, %v6073_v52  ;;  %v2490_v29 = vadd.f32 %v6072_v48, %v8361_v47  ;;  %v6184_v0 = vadd.f32 %v6183_v34, %v6182_v44  ;;  %v6185_v4 = vpop.f32.mrb[6].mxu1  ;;  %v9832_v41 = vld [vmem:[#allocation27_spill] sm:$0xff] }
 0x16e   : > { %2898 = vmatmul.mubr.bf16.gmra.mrb[112].mxu0 %v9823_v39  ;;  %v1446_v39 = vpack.c.bf16 %v1429_v15, %v8279_v32  ;;  %v6186_v40 = vpop.f32.mrb[7].mxu1  ;;  %v9831_v32 = vld [vmem:[#allocation44_spill] sm:$0xff] }
 0x16f   : > { %2905 = vmatprep.mubr.bf16.mxu0 %v1445_v37  ;;  %v2493_v62 = vadd.f32 %v6075_v61, %v8361_v47  ;;  %v6187_v52 = vadd.f32 %v6186_v40, %v6185_v4  ;;  %v8389_v37 = vadd.f32 %v6184_v0, %v2490_v29  ;;  %v1522_v31 = vmul.f32 %v9831_v32, %v9830_v27 }
 0x170   : > { %3059 = vmatmul.mubr.bf16.gmra.mrb[112].mxu1 %v1540_v16 }
 0x171   : > { %v6076_v24 = vpop.f32.mrb[8].mxu0  ;;  %3066 = vmatprep.mubr.bf16.mxu1 %v9832_v41  ;;  %v8398_v61 = vadd.f32 %v6187_v52, %v2493_v62  ;;  %v7312_v62 = vld [vmem:[#allocation2 + $0x110] sm:$0xff] }
 0x172   : > { %v6077_v26 = vpop.f32.mrb[9].mxu0 }
 0x173   : > { %v6078_v43 = vadd.f32 %v6077_v26, %v6076_v24  ;;  %v6079_v12 = vpop.f32.mrb[10].mxu0  ;;  %v6188_v25 = vpop.f32.mrb[8].mxu1  ;;  %v1541_v24 = vpack.c.bf16 %v8249_v14, %v1522_v31  ;;  %v1447_v26 = vpack.c.bf16 %v1431_v60, %v8396_v6  ;;  %v9833_v14 = vld [vmem:[#allocation60_spill] sm:$0xff] }
 0x174   : > { %v6080_v1 = vpop.f32.mrb[11].mxu0  ;;  %v1524_v40 = vmul.f32 %v9834_v55, %v9833_v14 }
 0x175   : > { %v6081_v48 = vadd.f32 %v6080_v1, %v6079_v12  ;;  %v2498_v56 = vadd.f32 %v6078_v43, %v8361_v47 }
 0x176   : > { %2906 = vmatmul.mubr.bf16.gmra.mrb[116].mxu0 %v9828_v57  ;;  %v6189_v57 = vpop.f32.mrb[9].mxu1 }
 0x177   : > { %2913 = vmatprep.mubr.bf16.mxu0 %v1446_v39  ;;  %v2501_v34 = vadd.f32 %v6081_v48, %v8361_v47  ;;  %v6190_v2 = vadd.f32 %v6189_v57, %v6188_v25  ;;  %v6191_v16 = vpop.f32.mrb[10].mxu1  ;;  %v7311_v39 = vld [vmem:[#allocation2 + $0x108] sm:$0xff]  ;;  %v9835_v48 = vld [vmem:[#allocation15_spill] sm:$0xff] }
 0x178   : > { %v1606_v0 = vpack.c.bf16 %v7312_v62, %v7311_v39  ;;  %v6192_v4 = vpop.f32.mrb[11].mxu1  ;;  %3067 = vmatmul.mubr.bf16.gmra.mrb[116].mxu1 %v1541_v24  ;;  %v1657_v52 = vmul.f32 %v9835_v48, %v8276_v23  ;;  %v1494_v39 = vld [vmem:[#allocation2 + $0x117] sm:$0xff] }
 0x179   : > { %v6082_v28 = vpop.f32.mrb[12].mxu0  ;;  %v6193_v43 = vadd.f32 %v6192_v4, %v6191_v16  ;;  %v8405_v19 = vadd.f32 %v6190_v2, %v2498_v56  ;;  %v7236_v62 = vld [vmem:[#allocation9 + $0x48] sm:$0xff]  }
 0x17a   : > { %v6083_v15 = vpop.f32.mrb[13].mxu0  ;;  %3074 = vmatprep.mubr.bf16.mxu1 %v1606_v0  ;;  %6522 = vmatprep.subr.bf16.mxu1 %v7236_v62 }
 0x17b   : > { %v6084_v29 = vadd.f32 %v6083_v15, %v6082_v28  ;;  %v6085_v44 = vpop.f32.mrb[14].mxu0  ;;  %v8411_v27 = vadd.f32 %v6193_v43, %v2501_v34  ;;  %v6194_v28 = vpop.f32.mrb[12].mxu1 }
 0x17c   : > { %v6086_v12 = vpop.f32.mrb[15].mxu0  ;;  %v6195_v15 = vpop.f32.mrb[13].mxu1 }
 0x17d   : > { %v6087_v1 = vadd.f32 %v6086_v12, %v6085_v44  ;;  %v2506_v60 = vadd.f32 %v6084_v29, %v8361_v47  ;;  %v1688_v44 = vpack.c.bf16 %v1657_v52, %v8285_v10  ;;  %v6196_v2 = vadd.f32 %v6195_v15, %v6194_v28  ;;  %v6197_v16 = vpop.f32.mrb[14].mxu1  ;;  %v7313_v12 = vld [vmem:[#allocation2 + $0x8] sm:$0xff]  ;;  %v7237_v29 = vld [vmem:[#allocation9 + $0x8] sm:$0xff]   ;;  %v9838_v10 = vld [vmem:[#allocation58_spill] sm:$0xff] }
 0x17e   : > { %2914 = vmatmul.mubr.bf16.gmra.mrb[120].mxu0 %v9832_v41  ;;  %v9836_v41 = vld [vmem:[#allocation61_spill] sm:$0xff]  ;;  %v8417_v34 = vpack.c.bf16 %v7313_v12, %v7313_v12  ;;  %v6198_v4 = vpop.f32.mrb[15].mxu1  ;;  %v9839_v52 = vld [vmem:[#allocation18_spill] sm:$0xff]  ;;  %v1495_v15 = vld [vmem:[#allocation2 + $0x11f] sm:$0xff]  ;;  %6523 = vmatpush3.bf16.msra.mxu1 %v7237_v29 }
 0x17f   : > { %2921 = vmatprep.mubr.bf16.mxu0 %v1447_v26  ;;  %v1542_v56 = vpack.c.bf16 %v9836_v41, %v1524_v40  ;;  %v2509_v26 = vadd.f32 %v6087_v1, %v8361_v47  ;;  %v6199_v14 = vadd.f32 %v6198_v4, %v6197_v16  ;;  %v9837_v40 = vld [vmem:[#allocation17_spill] sm:$0xff]  ;;  %v1526_v1 = vmul.f32 %v9838_v10, %v1494_v39  ;;  %v9841_v39 = vld [vmem:[#allocation63_spill] sm:$0xff] }
 0x180   : > { %v1661_v28 = vmul.f32 %v9839_v52, %v8298_v58  ;;  %v1631_v58 = vld [vmem:[#allocation2 + $0x61] sm:$0xff]  ;;  %v1633_v29 = vld [vmem:[#allocation2 + $0x71] sm:$0xff] }
 0x181   : > { %v6088_v31 = vpop.f32.mrb[16].mxu0  ;;  %3075 = vmatmul.mubr.bf16.gmra.mrb[120].mxu1 %v1542_v56  ;;  %v8427_v41 = vadd.f32 %v6199_v14, %v2509_v26  ;;  %v1663_v13 = vmul.f32 %v9842_v42, %v1631_v58 }
 0x182   : > { %v6089_v25 = vpop.f32.mrb[17].mxu0  ;;  %3082 = vmatprep.mubr.bf16.mxu1 %v8417_v34  ;;  %v1690_v62 = vpack.c.bf16 %v1661_v28, %v9841_v39  ;;  %v1665_v28 = vmul.f32 %v7892_v49, %v1633_v29 }
 0x183   : > { %v6090_v57 = vadd.f32 %v6089_v25, %v6088_v31  ;;  %v6091_v24 = vpop.f32.mrb[18].mxu0  ;;  %v1659_v31 = vmul.f32 %v9837_v40, %v8287_v35  ;;  %v8421_v25 = vadd.f32 %v6196_v2, %v2506_v60  ;;  %v6200_v35 = vpop.f32.mrb[16].mxu1  ;;  %v9840_v2 = vld [vmem:[#allocation62_spill] sm:$0xff] }
 0x184   : > { %v6092_v23 = vpop.f32.mrb[19].mxu0  ;;  %v6201_v56 = vpop.f32.mrb[17].mxu1 }
 0x185   : > { %v6093_v43 = vadd.f32 %v6092_v23, %v6091_v24  ;;  %v2514_v24 = vadd.f32 %v6090_v57, %v8361_v47  ;;  %v1689_v16 = vpack.c.bf16 %v1659_v31, %v9840_v2  ;;  %v1543_v23 = vpack.c.bf16 %v1495_v15, %v1526_v1  ;;  %v6203_v26 = vpop.f32.mrb[18].mxu1  ;;  %v1630_v1 = vld [vmem:[#allocation2 + $0x59] sm:$0xff]  ;;  %v1632_v15 = vld [vmem:[#allocation2 + $0x69] sm:$0xff] }
 0x186   : > { %2922 = vmatmul.mubr.bf16.gmra.mrb[124].mxu0 %v1606_v0  ;;  %v6202_v10 = vadd.f32 %v6201_v56, %v6200_v35  ;;  %v6204_v55 = vpop.f32.mrb[19].mxu1  ;;  %v1691_v56 = vpack.c.bf16 %v1663_v13, %v1630_v1  ;;  %v1692_v39 = vpack.c.bf16 %v1665_v28, %v1632_v15  ;;  %v1634_v1 = vld [vmem:[#allocation2 + $0x79] sm:$0xff] }
 0x187   : > { %7008 = vmatprep.mubr.bf16.mxu0 %v1688_v44  ;;  %v2517_v4 = vadd.f32 %v6093_v43, %v8361_v47  ;;  %v6205_v57 = vadd.f32 %v6204_v55, %v6203_v26  ;;  %v1637_v26 = vld [vmem:[#allocation2 + $0x91] sm:$0xff] }
 0x188   : > { %v8434_v31 = vadd.f32 %v6202_v10, %v2514_v24  ;;  %v1635_v10 = vld [vmem:[#allocation2 + $0x81] sm:$0xff]  ;;  %v1669_v28 = vmul.f32 %v7942_v9, %v1637_v26 }
 0x189   : > { %v6094_v0 = vpop.f32.mrb[20].mxu0  ;;  %3083 = vmatmul.mubr.bf16.gmra.mrb[124].mxu1 %v1543_v23 }
 0x18a   : > { %v6095_v60 = vpop.f32.mrb[21].mxu0  ;;  %4843 = vmatprep.mubr.bf16.mxu1 %v8417_v34 }
 0x18b   : > { %v6096_v12 = vadd.f32 %v6095_v60, %v6094_v0  ;;  %v6097_v44 = vpop.f32.mrb[22].mxu0  ;;  %v8437_v0 = vadd.f32 %v6205_v57, %v2517_v4  ;;  %v6206_v60 = vpop.f32.mrb[20].mxu1  ;;  %v7239_v4 = vld [vmem:[#allocation9 + $0x10] sm:$0xff]  }
 0x18c   : > { %v6098_v14 = vpop.f32.mrb[23].mxu0  ;;  %v6207_v55 = vpop.f32.mrb[21].mxu1 }
 0x18d   : > { %v6099_v32 = vadd.f32 %v6098_v14, %v6097_v44  ;;  %v2522_v35 = vadd.f32 %v6096_v12, %v8361_v47  ;;  %v6208_v23 = vadd.f32 %v6207_v55, %v6206_v60  ;;  %v7238_v14 = vld [vmem:[#allocation9 + $0x50] sm:$0xff]   ;;  %v1667_v12 = vmul.f32 %v7914_v33, %v1635_v10 }
 0x18e   : > { %7009 = vmatmul.mubr.bf16.vlgmr.msra.gmra.mrb[128].mxu0 %v1689_v16  ;;  %6524 = vmatprep.subr.bf16.mxu1 %v7238_v14 }
 0x18f   : > { %7012 = vmatprep.mubr.bf16.mxu0 %v1690_v62  ;;  %v2525_v24 = vadd.f32 %v6099_v32, %v8361_v47  ;;  %v6209_v62 = vpop.f32.mrb[22].mxu1  ;;  %v8442_v13 = vadd.f32 %v6208_v23, %v2522_v35  ;;  %6525 = vmatpush3.bf16.msra.mxu1 %v7239_v4  ;;  %v1636_v32 = vld [vmem:[#allocation2 + $0x89] sm:$0xff]  ;;  %v1639_v23 = vld [vmem:[#allocation2 + $0xa1] sm:$0xff]  ;;  %v1641_v4 = vld [vmem:[#allocation2 + $0xb1] sm:$0xff] }
 0x190   : > { %v6210_v29 = vpop.f32.mrb[23].mxu1  ;;  %v1694_v35 = vpack.c.bf16 %v1669_v28, %v1636_v32  ;;  %v1640_v28 = vld [vmem:[#allocation2 + $0xa9] sm:$0xff]  ;;  %6526 = vmatprep.subr.bf16.mxu1 %v7240_v17 }
 0x191   : > { %v6100_v43 = vpop.f32.mrb[24].mxu0  ;;  %v6211_v63 = vadd.f32 %v6210_v29, %v6209_v62 }
 0x192   : > { %v6101_v2 = vpop.f32.mrb[25].mxu0 }
 0x193   : > { %v6102_v16 = vadd.f32 %v6101_v2, %v6100_v43  ;;  %v6103_v44 = vpop.f32.mrb[26].mxu0  ;;  %v8445_v15 = vadd.f32 %v6211_v63, %v2525_v24  ;;  %v6212_v2 = vpop.f32.mrb[24].mxu1 }
 0x194   : > { %v6104_v58 = vpop.f32.mrb[27].mxu0 }
 0x195   : > { %v6105_v57 = vadd.f32 %v6104_v58, %v6103_v44  ;;  %v2530_v60 = vadd.f32 %v6102_v16, %v8361_v47  ;;  %v1693_v44 = vpack.c.bf16 %v1667_v12, %v1634_v1  ;;  %v1671_v16 = vmul.f32 %v7986_v59, %v1639_v23  ;;  %v1638_v12 = vld [vmem:[#allocation2 + $0x99] sm:$0xff]  ;;  %v1643_v23 = vld [vmem:[#allocation2 + $0xc1] sm:$0xff] }
 0x196   : > { %7013 = vmatmul.mubr.bf16.gmra.mrb[132].mxu0 %v1691_v56  ;;  %v6213_v56 = vpop.f32.mrb[25].mxu1  ;;  %v1673_v1 = vmul.f32 %v8020_v45, %v1641_v4  ;;  %v1645_v4 = vld [vmem:[#allocation2 + $0xd1] sm:$0xff] }
 0x197   : > { %7016 = vmatprep.mubr.bf16.mxu0 %v1692_v39  ;;  %v2533_v39 = vadd.f32 %v6105_v57, %v8361_v47  ;;  %v6214_v58 = vadd.f32 %v6213_v56, %v6212_v2  ;;  %v6215_v14 = vpop.f32.mrb[26].mxu1  ;;  %v1695_v56 = vpack.c.bf16 %v1671_v16, %v1638_v12  ;;  %v1642_v12 = vld [vmem:[#allocation2 + $0xb9] sm:$0xff] }
 0x198   : > { %v6216_v29 = vpop.f32.mrb[27].mxu1 }
 0x199   : > { %v6106_v43 = vpop.f32.mrb[28].mxu0  ;;  %v6217_v24 = vadd.f32 %v6216_v29, %v6215_v14  ;;  %v8450_v11 = vadd.f32 %v6214_v58, %v2530_v60 }
 0x19a   : > { %v6107_v55 = vpop.f32.mrb[29].mxu0 }
 0x19b   : > { %v6108_v62 = vadd.f32 %v6107_v55, %v6106_v43  ;;  %v6109_v10 = vpop.f32.mrb[30].mxu0  ;;  %v8453_v32 = vadd.f32 %v6217_v24, %v2533_v39  ;;  %v6218_v2 = vpop.f32.mrb[28].mxu1  ;;  %v7241_v39 = vld [vmem:[#allocation9 + $0x18] sm:$0xff]  }
 0x19c   : > { %v6110_v26 = vpop.f32.mrb[31].mxu0  ;;  %6527 = vmatpush3.bf16.msra.mxu1 %v7241_v39  ;;  %v1649_v39 = vld [vmem:[#allocation2 + $0xf1] sm:$0xff] }
 0x19d   : > { %v6111_v63 = vadd.f32 %v6110_v26, %v6109_v10  ;;  %v2538_v43 = vadd.f32 %v6108_v62, %v8361_v47  ;;  %v6219_v10 = vpop.f32.mrb[29].mxu1  ;;  %v1696_v26 = vpack.c.bf16 %v1673_v1, %v1640_v28  ;;  %v1675_v62 = vmul.f32 %v8062_v5, %v1643_v23 }
 0x19e   : > { %7017 = vmatmul.mubr.bf16.gmra.mrb[136].mxu0 %v1693_v44  ;;  %v6221_v58 = vpop.f32.mrb[30].mxu1  ;;  %v1677_v1 = vmul.f32 %v8107_v18, %v1645_v4 }
 0x19f   : > { %7020 = vmatprep.mubr.bf16.mxu0 %v1694_v35  ;;  %v2541_v60 = vadd.f32 %v6111_v63, %v8361_v47  ;;  %v6220_v35 = vadd.f32 %v6219_v10, %v6218_v2  ;;  %v6222_v24 = vpop.f32.mrb[31].mxu1  ;;  %v1644_v63 = vld [vmem:[#allocation2 + $0xc9] sm:$0xff] }
 0x1a0   : > { %v6223_v36 = vadd.f32 %v6222_v24, %v6221_v58 }
 0x1a1   : > { %v6112_v57 = vpop.f32.mrb[32].mxu0  ;;  %v8458_v16 = vadd.f32 %v6220_v35, %v2538_v43  ;;  %v1698_v43 = vpack.c.bf16 %v1677_v1, %v1644_v63  ;;  %v1647_v35 = vld [vmem:[#allocation2 + $0xe1] sm:$0xff]  ;;  %v1648_v63 = vld [vmem:[#allocation2 + $0xe9] sm:$0xff] }
 0x1a2   : > { %v6113_v55 = vpop.f32.mrb[33].mxu0  ;;  %v8461_v28 = vadd.f32 %v6223_v36, %v2541_v60 }
 0x1a3   : > { %v6114_v14 = vadd.f32 %v6113_v55, %v6112_v57  ;;  %v6115_v44 = vpop.f32.mrb[34].mxu0  ;;  %v6224_v55 = vpop.f32.mrb[32].mxu1 }
 0x1a4   : > { %v6116_v29 = vpop.f32.mrb[35].mxu0 }
 0x1a5   : > { %v6117_v45 = vadd.f32 %v6116_v29, %v6115_v44  ;;  %v2546_v2 = vadd.f32 %v6114_v14, %v8361_v47  ;;  %v1697_v44 = vpack.c.bf16 %v1675_v62, %v1642_v12  ;;  %v1679_v14 = vmul.f32 %v8117_v54, %v1647_v35  ;;  %v1646_v62 = vld [vmem:[#allocation2 + $0xd9] sm:$0xff] }
 0x1a6   : > { %7021 = vmatmul.mubr.bf16.gmra.mrb[140].mxu0 %v1695_v56  ;;  %v6225_v56 = vpop.f32.mrb[33].mxu1  ;;  %v1681_v12 = vmul.f32 %v8129_v53, %v1649_v39  ;;  %v7242_v39 = vld [vmem:[#allocation9 + $0x60] sm:$0xff]  }
 0x1a7   : > { %7024 = vmatprep.mubr.bf16.mxu0 %v1696_v26  ;;  %v2549_v17 = vadd.f32 %v6117_v45, %v8361_v47  ;;  %v6226_v26 = vadd.f32 %v6225_v56, %v6224_v55  ;;  %v6227_v29 = vpop.f32.mrb[34].mxu1  ;;  %v1699_v56 = vpack.c.bf16 %v1679_v14, %v1646_v62  ;;  %6528 = vmatprep.subr.bf16.mxu1 %v7242_v39  ;;  %v1650_v62 = vld [vmem:[#allocation2 + $0xf9] sm:$0xff] }
 0x1a8   : > { %v6228_v24 = vpop.f32.mrb[35].mxu1 }
 0x1a9   : > { %v6118_v57 = vpop.f32.mrb[36].mxu0  ;;  %v8465_v60 = vadd.f32 %v6226_v26, %v2546_v2  ;;  %v6229_v18 = vadd.f32 %v6228_v24, %v6227_v29  ;;  %v1700_v29 = vpack.c.bf16 %v1681_v12, %v1648_v63  ;;  %v1685_v12 = vmul.f32 %v9827_v20, %v8386_v50 }
 0x1aa   : > { %v6119_v10 = vpop.f32.mrb[37].mxu0 }
 0x1ab   : > { %v6120_v58 = vadd.f32 %v6119_v10, %v6118_v57  ;;  %v6121_v23 = vpop.f32.mrb[38].mxu0  ;;  %v8469_v1 = vadd.f32 %v6229_v18, %v2549_v17  ;;  %v6230_v55 = vpop.f32.mrb[36].mxu1  ;;  %v7243_v18 = vld [vmem:[#allocation9 + $0x20] sm:$0xff]  }
 0x1ac   : > { %v6122_v4 = vpop.f32.mrb[39].mxu0  ;;  %6529 = vmatpush3.bf16.msra.mxu1 %v7243_v18 }
 0x1ad   : > { %v6123_v36 = vadd.f32 %v6122_v4, %v6121_v23  ;;  %v2554_v57 = vadd.f32 %v6120_v58, %v8361_v47  ;;  %v6231_v23 = vpop.f32.mrb[37].mxu1 }
 0x1ae   : > { %7025 = vmatmul.mubr.bf16.gmra.mrb[144].mxu0 %v1697_v44  ;;  %v1651_v44 = vld [vmem:[#allocation2 + $0x101] sm:$0xff]  ;;  %v6233_v4 = vpop.f32.mrb[38].mxu1 }
 0x1af   : > { %7028 = vmatprep.mubr.bf16.mxu0 %v1698_v43  ;;  %v2557_v35 = vadd.f32 %v6123_v36, %v8361_v47  ;;  %v6232_v43 = vadd.f32 %v6231_v23, %v6230_v55  ;;  %v6234_v17 = vpop.f32.mrb[39].mxu1  ;;  %v1683_v14 = vmul.f32 %v9822_v7, %v1651_v44  ;;  %v1702_v44 = vpack.c.bf16 %v1685_v12, %v8396_v6  ;;  %v7246_v7 = vld [vmem:[#allocation9 + $0x70] sm:$0xff]  }
 0x1b0   : > { %v6235_v58 = vadd.f32 %v6234_v17, %v6233_v4 }
 0x1b1   : > { %v6124_v45 = vpop.f32.mrb[40].mxu0  ;;  %v8473_v54 = vadd.f32 %v6232_v43, %v2554_v57  ;;  %v1701_v57 = vpack.c.bf16 %v1683_v14, %v1650_v62  ;;  %v1655_v43 = vld [vmem:[#allocation2 + $0x121] sm:$0xff] }
 0x1b2   : > { %v6125_v10 = vpop.f32.mrb[41].mxu0  ;;  %v8478_v36 = vadd.f32 %v6235_v58, %v2557_v35  ;;  %v1654_v58 = vld [vmem:[#allocation2 + $0x119] sm:$0xff] }
 0x1b3   : > { %v6126_v2 = vadd.f32 %v6125_v10, %v6124_v45  ;;  %v6127_v26 = vpop.f32.mrb[42].mxu0  ;;  %v6236_v55 = vpop.f32.mrb[40].mxu1 }
 0x1b4   : > { %v6128_v24 = vpop.f32.mrb[43].mxu0  ;;  %v6237_v23 = vpop.f32.mrb[41].mxu1 }
 0x1b5   : > { %v6129_v53 = vadd.f32 %v6128_v24, %v6127_v26  ;;  %v2562_v45 = vadd.f32 %v6126_v2, %v8361_v47  ;;  %v6238_v4 = vadd.f32 %v6237_v23, %v6236_v55  ;;  %v6239_v24 = vpop.f32.mrb[42].mxu1  ;;  %v1687_v2 = vmul.f32 %v8244_v38, %v1655_v43  ;;  %v7245_v43 = vld [vmem:[#allocation9 + $0x28] sm:$0xff]  }
 0x1b6   : > { %7029 = vmatmul.mubr.bf16.gmra.mrb[148].mxu0 %v1699_v56  ;;  %v6240_v39 = vpop.f32.mrb[43].mxu1 }
 0x1b7   : > { %7032 = vmatprep.mubr.bf16.mxu0 %v1700_v29  ;;  %v2565_v29 = vadd.f32 %v6129_v53, %v8361_v47  ;;  %v8483_v18 = vadd.f32 %v6238_v4, %v2562_v45  ;;  %v6241_v17 = vadd.f32 %v6240_v39, %v6239_v24  ;;  %v7244_v24 = vld [vmem:[#allocation9 + $0x68] sm:$0xff]  }
 0x1b8   : > { %6530 = vmatprep.subr.bf16.mxu1 %v7244_v24 }
 0x1b9   : > { %v6130_v63 = vpop.f32.mrb[44].mxu0  ;;  %v8486_v14 = vadd.f32 %v6241_v17, %v2565_v29  ;;  %6531 = vmatpush3.bf16.msra.mxu1 %v7245_v43 }
 0x1ba   : > { %v6131_v10 = vpop.f32.mrb[45].mxu0  ;;  %6532 = vmatprep.subr.bf16.mxu1 %v7246_v7 }
 0x1bb   : > { %v6132_v26 = vadd.f32 %v6131_v10, %v6130_v63  ;;  %v6133_v56 = vpop.f32.mrb[46].mxu0  ;;  %v6242_v12 = vpop.f32.mrb[44].mxu1  ;;  %v1703_v63 = vpack.c.bf16 %v1687_v2, %v1654_v58 }
 0x1bc   : > { %v6134_v50 = vpop.f32.mrb[47].mxu0  ;;  %v6243_v55 = vpop.f32.mrb[45].mxu1 }
 0x1bd   : > { %v6135_v35 = vadd.f32 %v6134_v50, %v6133_v56  ;;  %v2570_v6 = vadd.f32 %v6132_v26, %v8361_v47  ;;  %v6244_v56 = vadd.f32 %v6243_v55, %v6242_v12  ;;  %v6245_v4 = vpop.f32.mrb[46].mxu1 }
 0x1be   : > { %7033 = vmatmul.mubr.bf16.gmra.mrb[152].mxu0 %v1701_v57 }
 0x1bf   : > { %7036 = vmatprep.mubr.bf16.mxu0 %v1702_v44  ;;  %v2573_v45 = vadd.f32 %v6135_v35, %v8361_v47  ;;  %v6246_v44 = vpop.f32.mrb[47].mxu1  ;;  %v8490_v29 = vadd.f32 %v6244_v56, %v2570_v6 }
 0x1c0   : > { %v6247_v39 = vadd.f32 %v6246_v44, %v6245_v4 }
 0x1c1   : > { %v6136_v62 = vpop.f32.mrb[48].mxu0 }
 0x1c2   : > { %v6137_v53 = vpop.f32.mrb[49].mxu0  ;;  %v8492_v26 = vadd.f32 %v6247_v39, %v2573_v45 }
 0x1c3   : > { %v6138_v10 = vadd.f32 %v6137_v53, %v6136_v62  ;;  %v6139_v23 = vpop.f32.mrb[50].mxu0  ;;  %v6248_v58 = vpop.f32.mrb[48].mxu1 }
 0x1c4   : > { %v6140_v57 = vpop.f32.mrb[51].mxu0  ;;  %v6249_v62 = vpop.f32.mrb[49].mxu1 }
 0x1c5   : > { %v6141_v50 = vadd.f32 %v6140_v57, %v6139_v23  ;;  %v2578_v2 = vadd.f32 %v6138_v10, %v8361_v47  ;;  %v6250_v38 = vadd.f32 %v6249_v62, %v6248_v58  ;;  %v6251_v23 = vpop.f32.mrb[50].mxu1 }
 0x1c6   : > { %7037 = vmatmul.mubr.bf16.gmra.mrb[156].mxu0 %v1703_v63  ;;  %v6252_v56 = vpop.f32.mrb[51].mxu1 }
 0x1c7   : > { %v2581_v55 = vadd.f32 %v6141_v50, %v8361_v47  ;;  %v8496_v63 = vadd.f32 %v6250_v38, %v2578_v2  ;;  %v6253_v57 = vadd.f32 %v6252_v56, %v6251_v23  ;;  %v7248_v56 = vld [vmem:[#allocation9 + $0xc0] sm:$0xff]  }
 0x1c8   : > { %6632 = vmatprep.subr.bf16.mxu0 %v7248_v56 }
 0x1c9   : > { %v6142_v17 = vpop.f32.mrb[52].mxu0  ;;  %v8498_v45 = vadd.f32 %v6253_v57, %v2581_v55 }
 0x1ca   : > { %v6143_v35 = vpop.f32.mrb[53].mxu0 }
 0x1cb   : > { %v6144_v12 = vadd.f32 %v6143_v35, %v6142_v17  ;;  %v6145_v53 = vpop.f32.mrb[54].mxu0  ;;  %v6254_v43 = vpop.f32.mrb[52].mxu1 }
 0x1cc   : > { %v6146_v6 = vpop.f32.mrb[55].mxu0  ;;  %v6255_v39 = vpop.f32.mrb[53].mxu1 }
 0x1cd   : > { %v6147_v4 = vadd.f32 %v6146_v6, %v6145_v53  ;;  %v2586_v10 = vadd.f32 %v6144_v12, %v8361_v47  ;;  %v6256_v58 = vadd.f32 %v6255_v39, %v6254_v43  ;;  %v6257_v62 = vpop.f32.mrb[54].mxu1  ;;  %v7247_v53 = vld [vmem:[#allocation9 + $0x30] sm:$0xff]   ;;  %v7249_v43 = vld [vmem:[#allocation9 + $0x80] sm:$0xff]  }
 0x1ce   : > { %v6258_v38 = vpop.f32.mrb[55].mxu1  ;;  %6533 = vmatpush3.bf16.msra.mxu1 %v7247_v53  ;;  %6633 = vmatpush3.bf16.msra.mxu0 %v7249_v43 }
 0x1cf   : > { %v2589_v50 = vadd.f32 %v6147_v4, %v8361_v47  ;;  %v8502_v23 = vadd.f32 %v6256_v58, %v2586_v10  ;;  %v6259_v55 = vadd.f32 %v6258_v38, %v6257_v62  ;;  %v7250_v62 = vld [vmem:[#allocation9 + $0xc8] sm:$0xff]  }
 0x1d0   : > { %6634 = vmatprep.subr.bf16.mxu0 %v7250_v62 }
 0x1d1   : > { %v6148_v24 = vpop.f32.mrb[56].mxu0  ;;  %v8504_v12 = vadd.f32 %v6259_v55, %v2589_v50 }
 0x1d2   : > { %v6149_v44 = vpop.f32.mrb[57].mxu0 }
 0x1d3   : > { %v6150_v17 = vadd.f32 %v6149_v44, %v6148_v24  ;;  %v6151_v35 = vpop.f32.mrb[58].mxu0  ;;  %v6260_v24 = vpop.f32.mrb[56].mxu1 }
 0x1d4   : > { %v6152_v20 = vpop.f32.mrb[59].mxu0  ;;  %v6261_v44 = vpop.f32.mrb[57].mxu1 }
 0x1d5   : > { %v6153_v2 = vadd.f32 %v6152_v20, %v6151_v35  ;;  %v2594_v57 = vadd.f32 %v6150_v17, %v8361_v47  ;;  %v6262_v10 = vadd.f32 %v6261_v44, %v6260_v24  ;;  %v6263_v35 = vpop.f32.mrb[58].mxu1  ;;  %v7251_v17 = vld [vmem:[#allocation9 + $0x88] sm:$0xff]   ;;  %v7255_v44 = vld [vmem:[#allocation9 + $0x90] sm:$0xff]  }
 0x1d6   : > { %v6264_v7 = vpop.f32.mrb[59].mxu1  ;;  %6635 = vmatpush3.bf16.msra.mxu0 %v7251_v17 }
 0x1d7   : > { %v2597_v20 = vadd.f32 %v6153_v2, %v8361_v47  ;;  %v8508_v53 = vadd.f32 %v6262_v10, %v2594_v57  ;;  %v6265_v38 = vadd.f32 %v6264_v7, %v6263_v35 }
 0x1d9   : > { %v6154_v6 = vpop.f32.mrb[60].mxu0  ;;  %v8510_v55 = vadd.f32 %v6265_v38, %v2597_v20  ;;  %v7254_v20 = vld [vmem:[#allocation9 + $0x38] sm:$0xff]  }
 0x1da   : > { %v6155_v4 = vpop.f32.mrb[61].mxu0 }
 0x1db   : > { %v6156_v39 = vadd.f32 %v6155_v4, %v6154_v6  ;;  %v6157_v5 = vpop.f32.mrb[62].mxu0  ;;  %v7253_v4 = vld [vmem:[#allocation9 + $0xd0] sm:$0xff]   ;;  %v6266_v2 = vpop.f32.mrb[60].mxu1 }
 0x1dc   : > { %v6158_v58 = vpop.f32.mrb[63].mxu0  ;;  %v6267_v59 = vpop.f32.mrb[61].mxu1  ;;  %6636 = vmatprep.subr.bf16.mxu0 %v7253_v4 }
 0x1dd   : > { %v6159_v50 = vadd.f32 %v6158_v58, %v6157_v5  ;;  %v2602_v56 = vadd.f32 %v6156_v39, %v8361_v47  ;;  %v6268_v57 = vadd.f32 %v6267_v59, %v6266_v2  ;;  %v6269_v10 = vpop.f32.mrb[62].mxu1  ;;  %v7252_v58 = vld [vmem:[#allocation9 + $0x78] sm:$0xff]   ;;  %6637 = vmatpush3.bf16.msra.mxu0 %v7255_v44  ;;  %v7259_v2 = vld [vmem:[#allocation9 + $0xa0] sm:$0xff]  }
 0x1de   : > { %v6270_v7 = vpop.f32.mrb[63].mxu1  ;;  %v7256_v39 = vld [vmem:[#allocation9 + $0xd8] sm:$0xff]   ;;  %6534 = vmatprep.subr.bf16.mxu1 %v7252_v58 }
 0x1df   : > { %v2605_v5 = vadd.f32 %v6159_v50, %v8361_v47  ;;  %v8515_v17 = vadd.f32 %v6268_v57, %v2602_v56  ;;  %v6271_v9 = vadd.f32 %v6270_v7, %v6269_v10  ;;  %6535 = vmatpush3.bf16.msra.mxu1 %v7254_v20  ;;  %6638 = vmatprep.subr.bf16.mxu0 %v7256_v39  ;;  %v7258_v50 = vld [vmem:[#allocation9 + $0xe0] sm:$0xff]  }
 0x1e0   : > { %v9843_v10 = vld [vmem:[#allocation14_spill] sm:$0xff] }
 0x1e1   : > { %v6288_v6 = vpop.f32.mrb[64].mxu0  ;;  %v8518_v59 = vadd.f32 %v6271_v9, %v2605_v5  ;;  %v3317_v9 = vld [vmem:[#allocation2 + $0xf] sm:$0xff] }
 0x1e2   : > { %v6289_v24 = vpop.f32.mrb[65].mxu0 }
 0x1e3   : > { %v6290_v43 = vadd.f32 %v6289_v24, %v6288_v6  ;;  %v6291_v30 = vpop.f32.mrb[66].mxu0  ;;  %v7257_v6 = vld [vmem:[#allocation9 + $0x98] sm:$0xff]   ;;  %v7260_v24 = vld [vmem:[#allocation9 + $0xe8] sm:$0xff]   ;;  %v6400_v44 = vpop.f32.mrb[64].mxu1 }
 0x1e4   : > { %v6292_v35 = vpop.f32.mrb[67].mxu0  ;;  %6639 = vmatpush3.bf16.msra.mxu0 %v7257_v6 }
 0x1e5   : > { %v2804_v62 = vadd.f32 %v6290_v43, %v8373_v8  ;;  %v6293_v38 = vadd.f32 %v6292_v35, %v6291_v30  ;;  %v3316_v30 = vld [vmem:[#allocation2 + $0x7] sm:$0xff]  ;;  %v6401_v43 = vpop.f32.mrb[65].mxu1  ;;  %6640 = vmatprep.subr.bf16.mxu0 %v7258_v50 }
 0x1e6   : > { %v3348_v35 = vmul.f32 %v9843_v10, %v3316_v30  ;;  %v6402_v58 = vadd.f32 %v6401_v43, %v6400_v44  ;;  %v7263_v30 = vld [vmem:[#allocation9 + $0x140] sm:$0xff]   ;;  %v7264_v43 = vld [vmem:[#allocation9 + $0xb0] sm:$0xff]  }
 0x1e7   : > { %v2807_v4 = vadd.f32 %v6293_v38, %v8380_v3  ;;  %v6403_v3 = vpop.f32.mrb[66].mxu1  ;;  %6744 = vmatprep.subr.bf16.mxu1 %v7263_v30 }
 0x1e8   : > { %6641 = vmatpush3.bf16.msra.mxu0 %v7259_v2  ;;  %v6404_v5 = vpop.f32.mrb[67].mxu1  ;;  %v3380_v39 = vpack.c.bf16 %v3317_v9, %v3348_v35  ;;  %v8522_v51 = vadd.f32 %v6402_v58, %v2804_v62 }
 0x1e9   : > { %v6294_v47 = vpop.f32.mrb[68].mxu0  ;;  %6642 = vmatprep.subr.bf16.mxu0 %v7260_v24  ;;  %v6405_v6 = vadd.f32 %v6404_v5, %v6403_v3  ;;  %v7265_v24 = vld [vmem:[#allocation9 + $0x100] sm:$0xff]  }
 0x1ea   : > { %v6295_v8 = vpop.f32.mrb[69].mxu0  ;;  %4844 = vmatmul.mubr.bf16.vlgmr.msra.gmra.mrb[128].mxu1 %v3380_v39  ;;  %v7267_v39 = vld [vmem:[#allocation9 + $0xb8] sm:$0xff]  }
 0x1eb   : > { %v6296_v56 = vadd.f32 %v6295_v8, %v6294_v47  ;;  %v6297_v57 = vpop.f32.mrb[70].mxu0  ;;  %v7261_v47 = vld [vmem:[#allocation9 + $0xa8] sm:$0xff]   ;;  %v8526_v44 = vadd.f32 %v6405_v6, %v2807_v4  ;;  %v7262_v8 = vld [vmem:[#allocation9 + $0xf0] sm:$0xff]   ;;  %6745 = vmatpush3.bf16.msra.mxu1 %v7265_v24 }
 0x1ec   : > { %v6298_v20 = vpop.f32.mrb[71].mxu0  ;;  %6643 = vmatpush3.bf16.msra.mxu0 %v7261_v47 }
 0x1ed   : > { %v2812_v7 = vadd.f32 %v6296_v56, %v8389_v37  ;;  %v6299_v38 = vadd.f32 %v6298_v20, %v6297_v57  ;;  %v6406_v37 = vpop.f32.mrb[68].mxu1  ;;  %v7266_v57 = vld [vmem:[#allocation9 + $0xf8] sm:$0xff]   ;;  %6644 = vmatprep.subr.bf16.mxu0 %v7262_v8 }
 0x1ee   : > { %v6407_v35 = vpop.f32.mrb[69].mxu1 }
 0x1ef   : > { %v2815_v50 = vadd.f32 %v6299_v38, %v8398_v61  ;;  %v6408_v34 = vadd.f32 %v6407_v35, %v6406_v37  ;;  %v6409_v3 = vpop.f32.mrb[70].mxu1 }
 0x1f0   : > { %6645 = vmatpush3.bf16.msra.mxu0 %v7264_v43  ;;  %v6410_v4 = vpop.f32.mrb[71].mxu1 }
 0x1f1   : > { %v6300_v2 = vpop.f32.mrb[72].mxu0  ;;  %6646 = vmatprep.subr.bf16.mxu0 %v7266_v57  ;;  %v6411_v5 = vadd.f32 %v6410_v4, %v6409_v3  ;;  %v8529_v38 = vadd.f32 %v6408_v34, %v2812_v7  ;;  %v7269_v4 = vld [vmem:[#allocation9 + $0x108] sm:$0xff]  }
 0x1f2   : > { %v6301_v56 = vpop.f32.mrb[73].mxu0 }
 0x1f3   : > { %v6302_v62 = vadd.f32 %v6301_v56, %v6300_v2  ;;  %v6303_v58 = vpop.f32.mrb[74].mxu0  ;;  %v8532_v47 = vadd.f32 %v6411_v5, %v2815_v50  ;;  %v6412_v8 = vpop.f32.mrb[72].mxu1 }
 0x1f4   : > { %v6304_v61 = vpop.f32.mrb[75].mxu0  ;;  %6647 = vmatpush3.bf16.msra.mxu0 %v7267_v39  ;;  %v6413_v37 = vpop.f32.mrb[73].mxu1 }
 0x1f5   : > { %v2820_v20 = vadd.f32 %v6302_v62, %v8405_v19  ;;  %v6305_v9 = vadd.f32 %v6304_v61, %v6303_v58  ;;  %v6414_v24 = vadd.f32 %v6413_v37, %v6412_v8  ;;  %v6415_v35 = vpop.f32.mrb[74].mxu1  ;;  %v7268_v61 = vld [vmem:[#allocation9 + $0x148] sm:$0xff]  }
 0x1f6   : > { %v6416_v62 = vpop.f32.mrb[75].mxu1  ;;  %6746 = vmatprep.subr.bf16.mxu1 %v7268_v61 }
 0x1f7   : > { %v2823_v6 = vadd.f32 %v6305_v9, %v8411_v27  ;;  %v6417_v58 = vadd.f32 %v6416_v62, %v6415_v35  ;;  %v8535_v34 = vadd.f32 %v6414_v24, %v2820_v20  ;;  %6747 = vmatpush3.bf16.msra.mxu1 %v7269_v4 }
 0x1f9   : > { %v6306_v2 = vpop.f32.mrb[76].mxu0  ;;  %v8538_v50 = vadd.f32 %v6417_v58, %v2823_v6 }
 0x1fa   : > { %v6307_v30 = vpop.f32.mrb[77].mxu0 }
 0x1fb   : > { %v6308_v43 = vadd.f32 %v6307_v30, %v6306_v2  ;;  %v6309_v56 = vpop.f32.mrb[78].mxu0  ;;  %v6418_v9 = vpop.f32.mrb[76].mxu1 }
 0x1fc   : > { %v6310_v19 = vpop.f32.mrb[79].mxu0  ;;  %v6419_v39 = vpop.f32.mrb[77].mxu1 }
 0x1fd   : > { %v2828_v57 = vadd.f32 %v6308_v43, %v8421_v25  ;;  %v6311_v7 = vadd.f32 %v6310_v19, %v6309_v56  ;;  %v6420_v30 = vadd.f32 %v6419_v39, %v6418_v9  ;;  %v6421_v37 = vpop.f32.mrb[78].mxu1 }
 0x1fe   : > { %v6422_v43 = vpop.f32.mrb[79].mxu1 }
 0x1ff   : > { %v2831_v27 = vadd.f32 %v6311_v7, %v8427_v41  ;;  %v6423_v41 = vadd.f32 %v6422_v43, %v6421_v37  ;;  %v8541_v6 = vadd.f32 %v6420_v30, %v2828_v57  ;;  %v7270_v37 = vld [vmem:[#allocation9 + $0x150] sm:$0xff]  }
 0x200   : > { %6748 = vmatprep.subr.bf16.mxu1 %v7270_v37 }
 0x201   : > { %v6312_v3 = vpop.f32.mrb[80].mxu0  ;;  %v8544_v35 = vadd.f32 %v6423_v41, %v2831_v27 }
 0x202   : > { %v6313_v5 = vpop.f32.mrb[81].mxu0 }
 0x203   : > { %v6314_v2 = vadd.f32 %v6313_v5, %v6312_v3  ;;  %v6315_v8 = vpop.f32.mrb[82].mxu0  ;;  %v6424_v62 = vpop.f32.mrb[80].mxu1 }
 0x204   : > { %v6316_v25 = vpop.f32.mrb[83].mxu0  ;;  %v6425_v58 = vpop.f32.mrb[81].mxu1 }
 0x205   : > { %v2836_v20 = vadd.f32 %v6314_v2, %v8434_v31  ;;  %v6317_v56 = vadd.f32 %v6316_v25, %v6315_v8  ;;  %v6426_v9 = vadd.f32 %v6425_v58, %v6424_v62  ;;  %v6427_v5 = vpop.f32.mrb[82].mxu1  ;;  %v7271_v25 = vld [vmem:[#allocation9 + $0x110] sm:$0xff]  }
 0x206   : > { %v6428_v39 = vpop.f32.mrb[83].mxu1  ;;  %6749 = vmatpush3.bf16.msra.mxu1 %v7271_v25 }
 0x207   : > { %v2839_v24 = vadd.f32 %v6317_v56, %v8437_v0  ;;  %v6429_v8 = vadd.f32 %v6428_v39, %v6427_v5  ;;  %v8547_v57 = vadd.f32 %v6426_v9, %v2836_v20 }
 0x209   : > { %v6318_v19 = vpop.f32.mrb[84].mxu0  ;;  %v8550_v27 = vadd.f32 %v6429_v8, %v2839_v24 }
 0x20a   : > { %v6319_v7 = vpop.f32.mrb[85].mxu0 }
 0x20b   : > { %v6320_v3 = vadd.f32 %v6319_v7, %v6318_v19  ;;  %v6321_v61 = vpop.f32.mrb[86].mxu0  ;;  %v6430_v43 = vpop.f32.mrb[84].mxu1 }
 0x20c   : > { %v6322_v4 = vpop.f32.mrb[87].mxu0  ;;  %v6431_v41 = vpop.f32.mrb[85].mxu1 }
 0x20d   : > { %v2844_v31 = vadd.f32 %v6320_v3, %v8442_v13  ;;  %v6323_v2 = vadd.f32 %v6322_v4, %v6321_v61  ;;  %v6432_v7 = vadd.f32 %v6431_v41, %v6430_v43  ;;  %v6433_v58 = vpop.f32.mrb[86].mxu1 }
 0x20e   : > { %v6434_v3 = vpop.f32.mrb[87].mxu1 }
 0x20f   : > { %v2847_v0 = vadd.f32 %v6323_v2, %v8445_v15  ;;  %v6435_v15 = vadd.f32 %v6434_v3, %v6433_v58  ;;  %v8553_v24 = vadd.f32 %v6432_v7, %v2844_v31  ;;  %v7272_v58 = vld [vmem:[#allocation9 + $0x158] sm:$0xff]  }
 0x210   : > { %6750 = vmatprep.subr.bf16.mxu1 %v7272_v58 }
 0x211   : > { %v6324_v30 = vpop.f32.mrb[88].mxu0  ;;  %v8556_v5 = vadd.f32 %v6435_v15, %v2847_v0 }
 0x212   : > { %v6325_v56 = vpop.f32.mrb[89].mxu0 }
 0x213   : > { %v6326_v19 = vadd.f32 %v6325_v56, %v6324_v30  ;;  %v6327_v62 = vpop.f32.mrb[90].mxu0  ;;  %v6436_v39 = vpop.f32.mrb[88].mxu1 }
 0x214   : > { %v6328_v13 = vpop.f32.mrb[91].mxu0  ;;  %v6437_v8 = vpop.f32.mrb[89].mxu1 }
 0x215   : > { %v2852_v20 = vadd.f32 %v6326_v19, %v8450_v11  ;;  %v6329_v61 = vadd.f32 %v6328_v13, %v6327_v62  ;;  %v6438_v43 = vadd.f32 %v6437_v8, %v6436_v39  ;;  %v6439_v56 = vpop.f32.mrb[90].mxu1  ;;  %v7273_v13 = vld [vmem:[#allocation9 + $0x118] sm:$0xff]  }
 0x216   : > { %v6440_v41 = vpop.f32.mrb[91].mxu1  ;;  %6751 = vmatpush3.bf16.msra.mxu1 %v7273_v13 }
 0x217   : > { %v2855_v9 = vadd.f32 %v6329_v61, %v8453_v32  ;;  %v6441_v62 = vadd.f32 %v6440_v41, %v6439_v56  ;;  %v8559_v31 = vadd.f32 %v6438_v43, %v2852_v20 }
 0x219   : > { %v6330_v4 = vpop.f32.mrb[92].mxu0  ;;  %v8562_v0 = vadd.f32 %v6441_v62, %v2855_v9 }
 0x21a   : > { %v6331_v2 = vpop.f32.mrb[93].mxu0 }
 0x21b   : > { %v6332_v30 = vadd.f32 %v6331_v2, %v6330_v4  ;;  %v6333_v37 = vpop.f32.mrb[94].mxu0  ;;  %v6442_v3 = vpop.f32.mrb[92].mxu1 }
 0x21c   : > { %v6334_v25 = vpop.f32.mrb[95].mxu0  ;;  %v6443_v15 = vpop.f32.mrb[93].mxu1 }
 0x21d   : > { %v2860_v11 = vadd.f32 %v6332_v30, %v8458_v16  ;;  %v6335_v19 = vadd.f32 %v6334_v25, %v6333_v37  ;;  %v6444_v2 = vadd.f32 %v6443_v15, %v6442_v3  ;;  %v6445_v8 = vpop.f32.mrb[94].mxu1 }
 0x21e   : > { %v6446_v30 = vpop.f32.mrb[95].mxu1 }
 0x21f   : > { %v2863_v32 = vadd.f32 %v6335_v19, %v8461_v28  ;;  %v7274_v28 = vld [vmem:[#allocation9 + $0x1c0] sm:$0xff]   ;;  %v6447_v9 = vadd.f32 %v6446_v30, %v6445_v8  ;;  %v8565_v43 = vadd.f32 %v6444_v2, %v2860_v11 }
 0x220   : > { %6856 = vmatprep.subr.bf16.mxu0 %v7274_v28  ;;  %v7277_v2 = vld [vmem:[#allocation9 + $0x120] sm:$0xff]  }
 0x221   : > { %v6336_v7 = vpop.f32.mrb[96].mxu0  ;;  %v8568_v25 = vadd.f32 %v6447_v9, %v2863_v32 }
 0x222   : > { %v6337_v61 = vpop.f32.mrb[97].mxu0 }
 0x223   : > { %v6338_v4 = vadd.f32 %v6337_v61, %v6336_v7  ;;  %v6339_v39 = vpop.f32.mrb[98].mxu0  ;;  %v6448_v19 = vpop.f32.mrb[96].mxu1 }
 0x224   : > { %v6340_v16 = vpop.f32.mrb[99].mxu0  ;;  %v6449_v7 = vpop.f32.mrb[97].mxu1 }
 0x225   : > { %v2868_v20 = vadd.f32 %v6338_v4, %v8465_v60  ;;  %v6341_v37 = vadd.f32 %v6340_v16, %v6339_v39  ;;  %v6450_v13 = vadd.f32 %v6449_v7, %v6448_v19  ;;  %v6451_v61 = vpop.f32.mrb[98].mxu1  ;;  %v7276_v60 = vld [vmem:[#allocation9 + $0x160] sm:$0xff]  }
 0x226   : > { %v6452_v4 = vpop.f32.mrb[99].mxu1  ;;  %6752 = vmatprep.subr.bf16.mxu1 %v7276_v60 }
 0x227   : > { %v2871_v56 = vadd.f32 %v6341_v37, %v8469_v1  ;;  %v6453_v8 = vadd.f32 %v6452_v4, %v6451_v61  ;;  %v8571_v1 = vadd.f32 %v6450_v13, %v2868_v20  ;;  %6753 = vmatpush3.bf16.msra.mxu1 %v7277_v2 }
 0x229   : > { %v6342_v41 = vpop.f32.mrb[100].mxu0  ;;  %v8574_v16 = vadd.f32 %v6453_v8, %v2871_v56 }
 0x22a   : > { %v6343_v62 = vpop.f32.mrb[101].mxu0 }
 0x22b   : > { %v6344_v58 = vadd.f32 %v6343_v62, %v6342_v41  ;;  %v6345_v3 = vpop.f32.mrb[102].mxu0  ;;  %v6454_v37 = vpop.f32.mrb[100].mxu1 }
 0x22c   : > { %v6346_v15 = vpop.f32.mrb[103].mxu0  ;;  %v6455_v9 = vpop.f32.mrb[101].mxu1 }
 0x22d   : > { %v2876_v39 = vadd.f32 %v6344_v58, %v8473_v54  ;;  %v6347_v11 = vadd.f32 %v6346_v15, %v6345_v3  ;;  %v6456_v62 = vadd.f32 %v6455_v9, %v6454_v37  ;;  %v6457_v7 = vpop.f32.mrb[102].mxu1  ;;  %v7280_v9 = vld [vmem:[#allocation9 + $0x168] sm:$0xff]  }
 0x22e   : > { %v6458_v58 = vpop.f32.mrb[103].mxu1  ;;  %6754 = vmatprep.subr.bf16.mxu1 %v7280_v9 }
 0x22f   : > { %v2879_v32 = vadd.f32 %v6347_v11, %v8478_v36  ;;  %v6459_v13 = vadd.f32 %v6458_v58, %v6457_v7  ;;  %v8577_v61 = vadd.f32 %v6456_v62, %v2876_v39  ;;  %v7281_v39 = vld [vmem:[#allocation9 + $0x128] sm:$0xff]  }
 0x230   : > { %6755 = vmatpush3.bf16.msra.mxu1 %v7281_v39 }
 0x231   : > { %v6348_v30 = vpop.f32.mrb[104].mxu0  ;;  %v8580_v56 = vadd.f32 %v6459_v13, %v2879_v32 }
 0x232   : > { %v6349_v28 = vpop.f32.mrb[105].mxu0 }
 0x233   : > { %v6350_v41 = vadd.f32 %v6349_v28, %v6348_v30  ;;  %v6351_v19 = vpop.f32.mrb[106].mxu0  ;;  %v6460_v60 = vpop.f32.mrb[104].mxu1 }
 0x234   : > { %v6352_v54 = vpop.f32.mrb[107].mxu0  ;;  %v6461_v11 = vpop.f32.mrb[105].mxu1 }
 0x235   : > { %v2884_v3 = vadd.f32 %v6350_v41, %v8483_v18  ;;  %v6353_v20 = vadd.f32 %v6352_v54, %v6351_v19  ;;  %v6462_v30 = vadd.f32 %v6461_v11, %v6460_v60  ;;  %v6463_v37 = vpop.f32.mrb[106].mxu1 }
 0x236   : > { %v6464_v33 = vpop.f32.mrb[107].mxu1 }
 0x237   : > { %v2887_v36 = vadd.f32 %v6353_v20, %v8486_v14  ;;  %v6465_v19 = vadd.f32 %v6464_v33, %v6463_v37  ;;  %v8583_v62 = vadd.f32 %v6462_v30, %v2884_v3 }
 0x239   : > { %v6354_v15 = vpop.f32.mrb[108].mxu0  ;;  %v8586_v32 = vadd.f32 %v6465_v19, %v2887_v36 }
 0x23a   : > { %v6355_v4 = vpop.f32.mrb[109].mxu0 }
 0x23b   : > { %v6356_v2 = vadd.f32 %v6355_v4, %v6354_v15  ;;  %v6357_v8 = vpop.f32.mrb[110].mxu0  ;;  %v6466_v54 = vpop.f32.mrb[108].mxu1 }
 0x23c   : > { %v6358_v28 = vpop.f32.mrb[111].mxu0  ;;  %v6467_v20 = vpop.f32.mrb[109].mxu1 }
 0x23d   : > { %v2892_v18 = vadd.f32 %v6356_v2, %v8490_v29  ;;  %v6359_v41 = vadd.f32 %v6358_v28, %v6357_v8  ;;  %v6468_v60 = vadd.f32 %v6467_v20, %v6466_v54  ;;  %v6469_v4 = vpop.f32.mrb[110].mxu1 }
 0x23e   : > { %v6470_v11 = vpop.f32.mrb[111].mxu1 }
 0x23f   : > { %v2895_v14 = vadd.f32 %v6359_v41, %v8492_v26  ;;  %v6471_v2 = vadd.f32 %v6470_v11, %v6469_v4  ;;  %v8589_v8 = vadd.f32 %v6468_v60, %v2892_v18  ;;  %v7285_v18 = vld [vmem:[#allocation9 + $0x130] sm:$0xff]  }
 0x241   : > { %v6360_v7 = vpop.f32.mrb[112].mxu0  ;;  %v8592_v36 = vadd.f32 %v6471_v2, %v2895_v14 }
 0x242   : > { %v6361_v58 = vpop.f32.mrb[113].mxu0 }
 0x243   : > { %v6362_v13 = vadd.f32 %v6361_v58, %v6360_v7  ;;  %v6363_v15 = vpop.f32.mrb[114].mxu0  ;;  %v6472_v37 = vpop.f32.mrb[112].mxu1  ;;  %v7284_v58 = vld [vmem:[#allocation9 + $0x170] sm:$0xff]  }
 0x244   : > { %v6364_v29 = vpop.f32.mrb[115].mxu0  ;;  %v6473_v9 = vpop.f32.mrb[113].mxu1  ;;  %6756 = vmatprep.subr.bf16.mxu1 %v7284_v58 }
 0x245   : > { %v2900_v33 = vadd.f32 %v6362_v13, %v8496_v63  ;;  %v6365_v3 = vadd.f32 %v6364_v29, %v6363_v15  ;;  %v6474_v19 = vadd.f32 %v6473_v9, %v6472_v37  ;;  %v6475_v7 = vpop.f32.mrb[114].mxu1  ;;  %6757 = vmatpush3.bf16.msra.mxu1 %v7285_v18 }
 0x246   : > { %v6476_v20 = vpop.f32.mrb[115].mxu1 }
 0x247   : > { %v2903_v26 = vadd.f32 %v6365_v3, %v8498_v45  ;;  %v6477_v15 = vadd.f32 %v6476_v20, %v6475_v7  ;;  %v8595_v60 = vadd.f32 %v6474_v19, %v2900_v33 }
 0x249   : > { %v6366_v30 = vpop.f32.mrb[116].mxu0  ;;  %v8598_v14 = vadd.f32 %v6477_v15, %v2903_v26 }
 0x24a   : > { %v6367_v28 = vpop.f32.mrb[117].mxu0 }
 0x24b   : > { %v6368_v41 = vadd.f32 %v6367_v28, %v6366_v30  ;;  %v6369_v39 = vpop.f32.mrb[118].mxu0  ;;  %v6478_v29 = vpop.f32.mrb[116].mxu1 }
 0x24c   : > { %v6370_v54 = vpop.f32.mrb[119].mxu0  ;;  %v6479_v3 = vpop.f32.mrb[117].mxu1 }
 0x24d   : > { %v2908_v63 = vadd.f32 %v6368_v41, %v8502_v23  ;;  %v6371_v13 = vadd.f32 %v6370_v54, %v6369_v39  ;;  %v6480_v37 = vadd.f32 %v6479_v3, %v6478_v29  ;;  %v6481_v28 = vpop.f32.mrb[118].mxu1 }
 0x24e   : > { %v6482_v9 = vpop.f32.mrb[119].mxu1 }
 0x24f   : > { %v2911_v45 = vadd.f32 %v6371_v13, %v8504_v12  ;;  %v6483_v39 = vadd.f32 %v6482_v9, %v6481_v28  ;;  %v8601_v19 = vadd.f32 %v6480_v37, %v2908_v63  ;;  %v7289_v63 = vld [vmem:[#allocation9 + $0x138] sm:$0xff]  }
 0x251   : > { %v6372_v4 = vpop.f32.mrb[120].mxu0  ;;  %v8604_v26 = vadd.f32 %v6483_v39, %v2911_v45 }
 0x252   : > { %v6373_v11 = vpop.f32.mrb[121].mxu0 }
 0x253   : > { %v6374_v2 = vadd.f32 %v6373_v11, %v6372_v4  ;;  %v6375_v30 = vpop.f32.mrb[122].mxu0  ;;  %v7288_v11 = vld [vmem:[#allocation9 + $0x178] sm:$0xff]  }
 0x254   : > { %v6376_v23 = vpop.f32.mrb[123].mxu0  ;;  %v6484_v54 = vpop.f32.mrb[120].mxu1  ;;  %6758 = vmatprep.subr.bf16.mxu1 %v7288_v11 }
 0x255   : > { %v2916_v41 = vadd.f32 %v6374_v2, %v8508_v53  ;;  %v6377_v33 = vadd.f32 %v6376_v23, %v6375_v30  ;;  %v6485_v20 = vpop.f32.mrb[121].mxu1  ;;  %6759 = vmatpush3.bf16.msra.mxu1 %v7289_v63 }
 0x256   : > { %v6486_v15 = vadd.f32 %v6485_v20, %v6484_v54  ;;  %v6487_v4 = vpop.f32.mrb[122].mxu1 }
 0x257   : > { %v2919_v12 = vadd.f32 %v6377_v33, %v8510_v55  ;;  %v6488_v3 = vpop.f32.mrb[123].mxu1 }
 0x258   : > { %v6489_v30 = vadd.f32 %v6488_v3, %v6487_v4  ;;  %v8607_v37 = vadd.f32 %v6486_v15, %v2916_v41 }
 0x259   : > { %v6378_v7 = vpop.f32.mrb[124].mxu0 }
 0x25a   : > { %v6379_v58 = vpop.f32.mrb[125].mxu0  ;;  %v8610_v45 = vadd.f32 %v6489_v30, %v2919_v12 }
 0x25b   : > { %v6380_v13 = vadd.f32 %v6379_v58, %v6378_v7  ;;  %v6381_v18 = vpop.f32.mrb[126].mxu0 }
 0x25c   : > { %v6382_v29 = vpop.f32.mrb[127].mxu0  ;;  %v6490_v23 = vpop.f32.mrb[124].mxu1 }
 0x25d   : > { %v2924_v53 = vadd.f32 %v6380_v13, %v8515_v17  ;;  %v6383_v2 = vadd.f32 %v6382_v29, %v6381_v18  ;;  %v6491_v39 = vpop.f32.mrb[125].mxu1 }
 0x25e   : > { %v6492_v54 = vadd.f32 %v6491_v39, %v6490_v23  ;;  %v6493_v58 = vpop.f32.mrb[126].mxu1 }
 0x25f   : > { %v2927_v55 = vadd.f32 %v6383_v2, %v8518_v59  ;;  %v6494_v18 = vpop.f32.mrb[127].mxu1 }
 0x260   : > { %v6495_v15 = vadd.f32 %v6494_v18, %v6493_v58  ;;  %v8616_v29 = vadd.f32 %v6492_v54, %v2924_v53  ;;  %v9845_v58 = vld [vmem:[#allocation16_spill] sm:$0xff] }
 0x261   : > { %v7010_v28 = vpop.f32.mrb[128].mxu0 }
 0x262   : > { %v3134_v9 = vadd.f32 %v7010_v28, %v8529_v38  ;;  %v3125_v33 = vpop.f32.mrb[129].mxu0  ;;  %v8618_v11 = vadd.f32 %v6495_v15, %v2927_v55 }
 0x263   : > { %v3126_v7 = vadd.f32 %v3125_v33, %v8522_v51  ;;  %v7011_v17 = vpop.f32.mrb[130].mxu0 }
 0x264   : > { %v3254_v20 = vmax.f32 %v3134_v9, 0.0  ;;  %v3137_v41 = vadd.f32 %v7011_v17, %v8532_v47  ;;  %v3128_v13 = vpop.f32.mrb[131].mxu0  ;;  %v8623_v9 = vld [vmem:[#allocation9 + $0x200] sm:$0xff]  }
 0x265   : > { %v3252_v59 = vmax.f32 %v3126_v7, 0.0  ;;  %v3129_v12 = vadd.f32 %v3128_v13, %v8526_v44  ;;  %9844 = vst [vmem:[#allocation28_spill] sm:$0xff] %v8623_v9  ;;  %v3476_v17 = vld [vmem:[#allocation2 + $0x9] sm:$0xff]  ;;  %7040 = vmatprep.subr.bf16.mxu1 %v8623_v9 }
 0x266   : > { %3286 = vst [vmem:[#allocation2 + $0x28] sm:$0xff] %v3254_v20  ;;  %v3255_v4 = vmax.f32 %v3137_v41, 0.0 }
 0x267   : > { %3284 = vst [vmem:[#allocation2 + $0x18] sm:$0xff] %v3252_v59  ;;  %v3253_v38 = vmax.f32 %v3129_v12, 0.0 }
 0x268   : > { %3287 = vst [vmem:[#allocation2 + $0x30] sm:$0xff] %v3255_v4  ;;  %v3446_v51 = vpack.c.bf16 %v3255_v4, %v3254_v20 }
 0x269   : > { %3285 = vst [vmem:[#allocation2 + $0x20] sm:$0xff] %v3253_v38  ;;  %v7014_v3 = vpop.f32.mrb[132].mxu0  ;;  %v3445_v2 = vpack.c.bf16 %v3253_v38, %v3252_v59 }
 0x26a   : > { %v3150_v47 = vadd.f32 %v7014_v3, %v8541_v6  ;;  %v3141_v63 = vpop.f32.mrb[133].mxu0  ;;  %v7275_v3 = vld [vmem:[#allocation9 + $0x180] sm:$0xff]  }
 0x26b   : > { %v3142_v30 = vadd.f32 %v3141_v63, %v8535_v34  ;;  %v7015_v44 = vpop.f32.mrb[134].mxu0  ;;  %4851 = vmatprep.mubr.bf16.mxu1 %v3445_v2 }
 0x26c   : > { %v3258_v28 = vmax.f32 %v3150_v47, 0.0  ;;  %v3153_v53 = vadd.f32 %v7015_v44, %v8544_v35  ;;  %v3144_v23 = vpop.f32.mrb[135].mxu0  ;;  %v7278_v44 = vld [vmem:[#allocation9 + $0x1c8] sm:$0xff]  }
 0x26d   : > { %v3256_v33 = vmax.f32 %v3142_v30, 0.0  ;;  %v3145_v55 = vadd.f32 %v3144_v23, %v8538_v50 }
 0x26e   : > { %3290 = vst [vmem:[#allocation2 + $0x48] sm:$0xff] %v3258_v28  ;;  %v3259_v39 = vmax.f32 %v3153_v53, 0.0  ;;  %v3572_v7 = vld [vmem:[#allocation2 + $0x17] sm:$0xff] }
 0x26f   : > { %v3477_v54 = vld [vmem:[#allocation2 + $0x11] sm:$0xff]  ;;  %3288 = vst [vmem:[#allocation2 + $0x38] sm:$0xff] %v3256_v33  ;;  %v3257_v34 = vmax.f32 %v3145_v55, 0.0  ;;  %v3604_v6 = vmul.f32 %v9843_v10, %v3572_v7  ;;  %v3350_v20 = vmul.f32 %v9845_v58, %v3572_v7  ;;  %v9901_v10 = vld [vmem:[#allocation53_spill] sm:$0xff] }
 0x270   : > { %v3509_v35 = vmul.f32 %v9835_v48, %v3477_v54  ;;  %3291 = vst [vmem:[#allocation2 + $0x50] sm:$0xff] %v3259_v39  ;;  %v3573_v41 = vld [vmem:[#allocation2 + $0x1f] sm:$0xff]  ;;  %v3574_v13 = vld [vmem:[#allocation2 + $0x27] sm:$0xff]  ;;  %v8630_v18 = vpack.c.bf16 %v3259_v39, %v3258_v28  ;;  %v3575_v63 = vld [vmem:[#allocation2 + $0x2f] sm:$0xff] }
 0x271   : > { %3289 = vst [vmem:[#allocation2 + $0x40] sm:$0xff] %v3257_v34  ;;  %v7018_v50 = vpop.f32.mrb[136].mxu0  ;;  %v3636_v59 = vpack.c.bf16 %v3573_v41, %v3604_v6  ;;  %v3381_v12 = vpack.c.bf16 %v3573_v41, %v3350_v20  ;;  %v3606_v4 = vmul.f32 %v9845_v58, %v3574_v13  ;;  %v3479_v38 = vld [vmem:[#allocation2 + $0x21] sm:$0xff]  ;;  %v3447_v30 = vpack.c.bf16 %v3257_v34, %v3256_v33  ;;  %v7279_v34 = vld [vmem:[#allocation9 + $0x188] sm:$0xff]  }
 0x272   : > { %v3540_v15 = vpack.c.bf16 %v3509_v35, %v3476_v17  ;;  %v3166_v2 = vadd.f32 %v7018_v50, %v8553_v24  ;;  %v3157_v47 = vpop.f32.mrb[137].mxu0  ;;  %v8636_v55 = vmul.f32 %v9835_v48, %v3479_v38  ;;  %v8639_v24 = vld [vmem:[#allocation2 + $0x19] sm:$0xff]  ;;  %v7297_v48 = vld [vmem:[#allocation9 + $0x1f8] sm:$0xff]  }
 0x273   : > { %v3158_v53 = vadd.f32 %v3157_v47, %v8547_v57  ;;  %v7019_v23 = vpop.f32.mrb[138].mxu0  ;;  %5004 = vmatprep.mubr.bf16.mxu0 %v3636_v59  ;;  %4852 = vmatmul.mubr.bf16.gmra.mrb[132].mxu1 %v3381_v12  ;;  %v3637_v28 = vpack.c.bf16 %v3575_v63, %v3606_v4  ;;  %v3352_v57 = vmul.f32 %v7787_v21, %v3574_v13 }
 0x274   : > { %v3262_v39 = vmax.f32 %v3166_v2, 0.0  ;;  %v3169_v7 = vadd.f32 %v7019_v23, %v8556_v5  ;;  %v3160_v17 = vpop.f32.mrb[139].mxu0  ;;  %5005 = vmatmul.mubr.bf16.vlgmr.msra.gmra.mrb[160].mxu0 %v3540_v15  ;;  %4859 = vmatprep.mubr.bf16.mxu1 %v3446_v51  ;;  %v3511_v5 = vmul.f32 %v9837_v40, %v3479_v38  ;;  %v7282_v51 = vld [vmem:[#allocation9 + $0x1d0] sm:$0xff]  }
 0x275   : > { %v3260_v54 = vmax.f32 %v3158_v53, 0.0  ;;  %v3161_v33 = vadd.f32 %v3160_v17, %v8550_v27  ;;  %5012 = vmatprep.mubr.bf16.mxu0 %v3637_v28  ;;  %6857 = vmatpush3.bf16.msra.mxu0 %v7275_v3  ;;  %v3382_v4 = vpack.c.bf16 %v3575_v63, %v3352_v57  ;;  %v7283_v3 = vld [vmem:[#allocation9 + $0x190] sm:$0xff]   ;;  %v8658_v53 = vld [vmem:[#allocation2 + $0x29] sm:$0xff] }
 0x276   : > { %3294 = vst [vmem:[#allocation2 + $0x68] sm:$0xff] %v3262_v39  ;;  %v3263_v20 = vmax.f32 %v3169_v7, 0.0  ;;  %v3576_v35 = vld [vmem:[#allocation2 + $0x37] sm:$0xff]  ;;  %6858 = vmatprep.subr.bf16.mxu0 %v7278_v44  ;;  %v3541_v44 = vpack.c.bf16 %v3511_v5, %v8639_v24  ;;  %9848 = vst [vmem:[#allocation35_spill] sm:$0xff] %v8658_v53  ;;  %v7286_v28 = vld [vmem:[#allocation9 + $0x1d8] sm:$0xff]  }
 0x277   : > { %v3481_v41 = vld [vmem:[#allocation2 + $0x31] sm:$0xff]  ;;  %3292 = vst [vmem:[#allocation2 + $0x58] sm:$0xff] %v3260_v54  ;;  %v3261_v50 = vmax.f32 %v3161_v33, 0.0  ;;  %v3608_v27 = vmul.f32 %v7787_v21, %v3576_v35 }
 0x278   : > { %3295 = vst [vmem:[#allocation2 + $0x70] sm:$0xff] %v3263_v20  ;;  %v8647_v59 = vld [vmem:[#allocation2 + $0x3f] sm:$0xff]  ;;  %v8649_v13 = vpack.c.bf16 %v3263_v20, %v3262_v39  ;;  %v8652_v12 = vmul.f32 %v9837_v40, %v3481_v41  ;;  %v8663_v39 = vmul.f32 %v9845_v58, %v3576_v35  ;;  %v8667_v33 = vld [vmem:[#allocation2 + $0x47] sm:$0xff] }
 0x279   : > { %9846 = vst [vmem:[#allocation31_spill] sm:$0xff] %v8647_v59  ;;  %3293 = vst [vmem:[#allocation2 + $0x60] sm:$0xff] %v3261_v50  ;;  %v7022_v15 = vpop.f32.mrb[140].mxu0  ;;  %v8654_v38 = vld [vmem:[#allocation2 + $0x41] sm:$0xff]  ;;  %6859 = vmatpush3.bf16.msra.mxu0 %v7279_v34  ;;  %v8660_v23 = vpack.c.bf16 %v3261_v50, %v3260_v54  ;;  %v3638_v17 = vpack.c.bf16 %v8647_v59, %v3608_v27  ;;  %v7292_v27 = vld [vmem:[#allocation9 + $0x1e8] sm:$0xff]  }
 0x27a   : > { %9847 = vst [vmem:[#allocation33_spill] sm:$0xff] %v8652_v12  ;;  %v3182_v2 = vadd.f32 %v7022_v15, %v8565_v43  ;;  %v3173_v47 = vpop.f32.mrb[141].mxu0  ;;  %6860 = vmatprep.subr.bf16.mxu0 %v7282_v51  ;;  %9849 = vst [vmem:[#allocation38_spill] sm:$0xff] %v8663_v39  ;;  %v8673_v54 = vmul.f32 %v9839_v52, %v8654_v38  ;;  %v3354_v51 = vmul.f32 %v7806_v46, %v3576_v35  ;;  %v7287_v50 = vld [vmem:[#allocation9 + $0x198] sm:$0xff]  }
 0x27b   : > { %v3174_v63 = vadd.f32 %v3173_v47, %v8559_v31  ;;  %v7023_v7 = vpop.f32.mrb[142].mxu0  ;;  %4860 = vmatmul.mubr.bf16.gmra.mrb[136].mxu1 %v3382_v4  ;;  %v8676_v31 = vld [vmem:[#allocation2 + $0x39] sm:$0xff]  ;;  %v3610_v47 = vmul.f32 %v7806_v46, %v8667_v33 }
 0x27c   : > { %9850 = vst [vmem:[#allocation47_spill] sm:$0xff] %v8673_v54  ;;  %v3266_v57 = vmax.f32 %v3182_v2, 0.0  ;;  %v3185_v34 = vadd.f32 %v7023_v7, %v8568_v25  ;;  %v3176_v58 = vpop.f32.mrb[143].mxu0  ;;  %5013 = vmatmul.mubr.bf16.gmra.mrb[164].mxu0 %v3541_v44  ;;  %4867 = vmatprep.mubr.bf16.mxu1 %v3447_v30  ;;  %9851 = vst [vmem:[#allocation48_spill] sm:$0xff] %v8676_v31  ;;  %v3513_v25 = vmul.f32 %v9839_v52, %v3481_v41  ;;  %v7290_v30 = vld [vmem:[#allocation9 + $0x1e0] sm:$0xff]  }
 0x27d   : > { %v3264_v20 = vmax.f32 %v3174_v63, 0.0  ;;  %v3177_v5 = vadd.f32 %v3176_v58, %v8562_v0  ;;  %5020 = vmatprep.mubr.bf16.mxu0 %v3638_v17  ;;  %6861 = vmatpush3.bf16.msra.mxu0 %v7283_v3  ;;  %v8689_v0 = vmul.f32 %v7787_v21, %v8667_v33  ;;  %v8691_v3 = vld [vmem:[#allocation2 + $0x4f] sm:$0xff]  ;;  %v3383_v7 = vpack.c.bf16 %v8647_v59, %v3354_v51 }
 0x27e   : > { %3298 = vst [vmem:[#allocation2 + $0x88] sm:$0xff] %v3266_v57  ;;  %v3267_v15 = vmax.f32 %v3185_v34, 0.0  ;;  %v8683_v4 = vld [vmem:[#allocation2 + $0x51] sm:$0xff]  ;;  %6862 = vmatprep.subr.bf16.mxu0 %v7286_v28  ;;  %9853 = vst [vmem:[#allocation49_spill] sm:$0xff] %v8691_v3 }
 0x27f   : > { %9852 = vst [vmem:[#allocation50_spill] sm:$0xff] %v8689_v0  ;;  %3296 = vst [vmem:[#allocation2 + $0x78] sm:$0xff] %v3264_v20  ;;  %v3265_v35 = vmax.f32 %v3177_v5, 0.0  ;;  %v8695_v44 = vld [vmem:[#allocation2 + $0x57] sm:$0xff]  ;;  %v8701_v28 = vmul.f32 %v9842_v42, %v8683_v4 }
 0x280   : > { %3299 = vst [vmem:[#allocation2 + $0x90] sm:$0xff] %v3267_v15  ;;  %v8697_v41 = vpack.c.bf16 %v3267_v15, %v3266_v57  ;;  %v8706_v17 = vld [vmem:[#allocation2 + $0x61] sm:$0xff]  ;;  %v7291_v34 = vld [vmem:[#allocation9 + $0x1a0] sm:$0xff]   ;;  %v3542_v57 = vpack.c.bf16 %v3513_v25, %v8658_v53  ;;  %v8716_v21 = vmul.f32 %v7806_v46, %v8695_v44 }
 0x281   : > { %9854 = vst [vmem:[#allocation51_spill] sm:$0xff] %v8701_v28  ;;  %3297 = vst [vmem:[#allocation2 + $0x80] sm:$0xff] %v3265_v35  ;;  %v7026_v63 = vpop.f32.mrb[144].mxu0  ;;  %6863 = vmatpush3.bf16.msra.mxu0 %v7287_v50  ;;  %v8710_v15 = vld [vmem:[#allocation2 + $0x49] sm:$0xff]  ;;  %v8712_v2 = vpack.c.bf16 %v3265_v35, %v3264_v20  ;;  %v3639_v50 = vpack.c.bf16 %v8691_v3, %v3610_v47  ;;  %v8728_v25 = vmul.f32 %v7892_v49, %v8706_v17  ;;  %v7293_v20 = vld [vmem:[#allocation9 + $0x1a8] sm:$0xff]  }
 0x282   : > { %v3198_v58 = vadd.f32 %v7026_v63, %v8577_v61  ;;  %v3189_v5 = vpop.f32.mrb[145].mxu0  ;;  %9855 = vst [vmem:[#allocation22_spill] sm:$0xff] %v8710_v15  ;;  %6864 = vmatprep.subr.bf16.mxu0 %v7290_v30  ;;  %9856 = vst [vmem:[#allocation52_spill] sm:$0xff] %v8716_v21  ;;  %v8720_v61 = vld [vmem:[#allocation2 + $0x5f] sm:$0xff]  ;;  %v8722_v63 = vld [vmem:[#allocation2 + $0x67] sm:$0xff] }
 0x283   : > { %v3190_v51 = vadd.f32 %v3189_v5, %v8571_v1  ;;  %v7027_v43 = vpop.f32.mrb[146].mxu0  ;;  %4868 = vmatmul.mubr.bf16.gmra.mrb[140].mxu1 %v3383_v7  ;;  %9857 = vst [vmem:[#allocation54_spill] sm:$0xff] %v8720_v61  ;;  %9858 = vst [vmem:[#allocation56_spill] sm:$0xff] %v8728_v25  ;;  %v8732_v1 = vld [vmem:[#allocation2 + $0x59] sm:$0xff]  ;;  %v3356_v5 = vmul.f32 %v7863_v22, %v8667_v33  ;;  %v8747_v33 = vmul.f32 %v7863_v22, %v8722_v63 }
 0x284   : > { %v3270_v30 = vmax.f32 %v3198_v58, 0.0  ;;  %v3201_v46 = vadd.f32 %v7027_v43, %v8580_v56  ;;  %v3192_v35 = vpop.f32.mrb[147].mxu0  ;;  %5021 = vmatmul.mubr.bf16.gmra.mrb[168].mxu0 %v3542_v57  ;;  %4875 = vmatprep.mubr.bf16.mxu1 %v8630_v18  ;;  %9859 = vst [vmem:[#allocation55_spill] sm:$0xff] %v8732_v1  ;;  %v3515_v43 = vmul.f32 %v9842_v42, %v8654_v38  ;;  %v7294_v57 = vld [vmem:[#allocation9 + $0x1f0] sm:$0xff]  }
 0x285   : > { %v3268_v47 = vmax.f32 %v3190_v51, 0.0  ;;  %v3193_v7 = vadd.f32 %v3192_v35, %v8574_v16  ;;  %5028 = vmatprep.mubr.bf16.mxu0 %v3639_v50  ;;  %6865 = vmatpush3.bf16.msra.mxu0 %v7291_v34  ;;  %9860 = vst [vmem:[#allocation57_spill] sm:$0xff] %v8747_v33  ;;  %v3612_v51 = vmul.f32 %v7863_v22, %v8695_v44  ;;  %v8751_v50 = vld [vmem:[#allocation2 + $0x6f] sm:$0xff]  ;;  %v7296_v22 = vld [vmem:[#allocation9 + $0x1b0] sm:$0xff]  }
 0x286   : > { %3302 = vst [vmem:[#allocation2 + $0xa8] sm:$0xff] %v3270_v30  ;;  %v3271_v56 = vmax.f32 %v3201_v46, 0.0  ;;  %v8741_v18 = vld [vmem:[#allocation2 + $0x71] sm:$0xff]  ;;  %6866 = vmatprep.subr.bf16.mxu0 %v7292_v27  ;;  %9861 = vst [vmem:[#allocation27_spill] sm:$0xff] %v8751_v50  ;;  %v9862_v27 = vld [vmem:[#allocation24_spill] sm:$0xff] }
 0x287   : > { %3300 = vst [vmem:[#allocation2 + $0x98] sm:$0xff] %v3268_v47  ;;  %v3269_v34 = vmax.f32 %v3193_v7, 0.0  ;;  %v8753_v46 = vld [vmem:[#allocation2 + $0x77] sm:$0xff]  ;;  %v8759_v35 = vmul.f32 %v9862_v27, %v8741_v18  ;;  %v3384_v7 = vpack.c.bf16 %v8691_v3, %v3356_v5  ;;  %v9865_v16 = vld [vmem:[#allocation21_spill] sm:$0xff]  ;;  %v9883_v28 = vld [vmem:[#allocation32_spill] sm:$0xff] }
 0x288   : > { %3303 = vst [vmem:[#allocation2 + $0xb0] sm:$0xff] %v3271_v56  ;;  %v8755_v38 = vpack.c.bf16 %v3271_v56, %v3270_v30  ;;  %v8764_v6 = vld [vmem:[#allocation2 + $0x81] sm:$0xff]  ;;  %v3543_v30 = vpack.c.bf16 %v3515_v43, %v8676_v31  ;;  %v8768_v56 = vld [vmem:[#allocation2 + $0x69] sm:$0xff]  ;;  %v8774_v33 = vmul.f32 %v9865_v16, %v8753_v46  ;;  %v9893_v31 = vld [vmem:[#allocation43_spill] sm:$0xff] }
 0x289   : > { %9863 = vst [vmem:[#allocation60_spill] sm:$0xff] %v8759_v35  ;;  %3301 = vst [vmem:[#allocation2 + $0xa0] sm:$0xff] %v3269_v34  ;;  %v7030_v58 = vpop.f32.mrb[148].mxu0  ;;  %6867 = vmatpush3.bf16.msra.mxu0 %v7293_v20  ;;  %v8770_v40 = vpack.c.bf16 %v3269_v34, %v3268_v47  ;;  %v3640_v20 = vpack.c.bf16 %v8720_v61, %v3612_v51  ;;  %v9868_v43 = vld [vmem:[#allocation25_spill] sm:$0xff]  ;;  %v9875_v35 = vld [vmem:[#allocation26_spill] sm:$0xff] }
 0x28a   : > { %v3214_v42 = vadd.f32 %v7030_v58, %v8589_v8  ;;  %v3205_v52 = vpop.f32.mrb[149].mxu0  ;;  %9864 = vst [vmem:[#allocation61_spill] sm:$0xff] %v8768_v56  ;;  %6868 = vmatprep.subr.bf16.mxu0 %v7294_v57  ;;  %9866 = vst [vmem:[#allocation62_spill] sm:$0xff] %v8774_v33  ;;  %v8778_v8 = vld [vmem:[#allocation2 + $0x7f] sm:$0xff]  ;;  %v8780_v58 = vld [vmem:[#allocation2 + $0x87] sm:$0xff]  ;;  %v8786_v57 = vmul.f32 %v9868_v43, %v8764_v6 }
 0x28b   : > { %v3206_v5 = vadd.f32 %v3205_v52, %v8583_v62  ;;  %v7031_v21 = vpop.f32.mrb[150].mxu0  ;;  %4876 = vmatmul.mubr.bf16.gmra.mrb[144].mxu1 %v3384_v7  ;;  %9867 = vst [vmem:[#allocation63_spill] sm:$0xff] %v8778_v8  ;;  %v8790_v52 = vld [vmem:[#allocation2 + $0x79] sm:$0xff]  ;;  %v3358_v7 = vmul.f32 %v9865_v16, %v8695_v44  ;;  %v7298_v47 = vld [vmem:[#allocation9 + $0x1b8] sm:$0xff]  }
 0x28c   : > { %9869 = vst [vmem:[#allocation16_spill] sm:$0xff] %v8786_v57  ;;  %v3274_v34 = vmax.f32 %v3214_v42, 0.0  ;;  %v3217_v25 = vadd.f32 %v7031_v21, %v8592_v36  ;;  %v3208_v0 = vpop.f32.mrb[151].mxu0  ;;  %5029 = vmatmul.mubr.bf16.gmra.mrb[172].mxu0 %v3543_v30  ;;  %4883 = vmatprep.mubr.bf16.mxu1 %v8660_v23  ;;  %v3517_v21 = vmul.f32 %v7892_v49, %v8683_v4 }
 0x28d   : > { %v3272_v62 = vmax.f32 %v3206_v5, 0.0  ;;  %v3209_v51 = vadd.f32 %v3208_v0, %v8586_v32  ;;  %5036 = vmatprep.mubr.bf16.mxu0 %v3640_v20  ;;  %6869 = vmatpush3.bf16.msra.mxu0 %v7296_v22  ;;  %v9870_v0 = vld [vmem:[#allocation23_spill] sm:$0xff]  ;;  %v3614_v22 = vmul.f32 %v9865_v16, %v8722_v63  ;;  %v8809_v5 = vld [vmem:[#allocation2 + $0x8f] sm:$0xff] }
 0x28e   : > { %3306 = vst [vmem:[#allocation2 + $0xc8] sm:$0xff] %v3274_v34  ;;  %v3275_v36 = vmax.f32 %v3217_v25, 0.0  ;;  %v8799_v23 = vld [vmem:[#allocation2 + $0x91] sm:$0xff]  ;;  %6870 = vmatprep.subr.bf16.mxu0 %v7297_v48  ;;  %v8805_v30 = vmul.f32 %v9870_v0, %v8780_v58  ;;  %9872 = vst [vmem:[#allocation23_spill] sm:$0xff] %v8809_v5 }
 0x28f   : > { %3304 = vst [vmem:[#allocation2 + $0xb8] sm:$0xff] %v3272_v62  ;;  %v3273_v44 = vmax.f32 %v3209_v51, 0.0  ;;  %v8811_v25 = vld [vmem:[#allocation2 + $0x97] sm:$0xff]  ;;  %v3385_v51 = vpack.c.bf16 %v8720_v61, %v3358_v7  ;;  %v3641_v7 = vpack.c.bf16 %v8751_v50, %v3614_v22 }
 0x290   : > { %9871 = vst [vmem:[#allocation21_spill] sm:$0xff] %v8805_v30  ;;  %3307 = vst [vmem:[#allocation2 + $0xd0] sm:$0xff] %v3275_v36  ;;  %v8813_v4 = vpack.c.bf16 %v3275_v36, %v3274_v34  ;;  %v9873_v48 = vld [vmem:[#allocation30_spill] sm:$0xff]  ;;  %v8822_v49 = vld [vmem:[#allocation2 + $0xa1] sm:$0xff]  ;;  %v3544_v34 = vpack.c.bf16 %v3517_v21, %v8710_v15  ;;  %v8832_v3 = vmul.f32 %v9875_v35, %v8811_v25 }
 0x291   : > { %v8817_v20 = vmul.f32 %v9873_v48, %v8799_v23  ;;  %3305 = vst [vmem:[#allocation2 + $0xc0] sm:$0xff] %v3273_v44  ;;  %v7034_v42 = vpop.f32.mrb[152].mxu0  ;;  %6871 = vmatpush3.bf16.msra.mxu0 %v7298_v47  ;;  %v8826_v36 = vld [vmem:[#allocation2 + $0x89] sm:$0xff]  ;;  %v8828_v57 = vpack.c.bf16 %v3273_v44, %v3272_v62  ;;  %v8836_v47 = vld [vmem:[#allocation2 + $0x9f] sm:$0xff] }
 0x292   : > { %v3230_v16 = vadd.f32 %v7034_v42, %v8601_v19  ;;  %v3221_v33 = vpop.f32.mrb[153].mxu0  ;;  %9876 = vst [vmem:[#allocation26_spill] sm:$0xff] %v8832_v3  ;;  %v8838_v19 = vld [vmem:[#allocation2 + $0xa7] sm:$0xff]  ;;  %v9877_v62 = vld [vmem:[#allocation34_spill] sm:$0xff] }
 0x293   : > { %9874 = vst [vmem:[#allocation64_spill] sm:$0xff] %v8817_v20  ;;  %v3222_v32 = vadd.f32 %v3221_v33, %v8595_v60  ;;  %v7035_v30 = vpop.f32.mrb[154].mxu0  ;;  %4884 = vmatmul.mubr.bf16.gmra.mrb[148].mxu1 %v3385_v51  ;;  %v8844_v21 = vmul.f32 %v9877_v62, %v8822_v49  ;;  %v8848_v60 = vld [vmem:[#allocation2 + $0x99] sm:$0xff]  ;;  %v3360_v51 = vmul.f32 %v9870_v0, %v8722_v63 }
 0x294   : > { %v3278_v44 = vmax.f32 %v3230_v16, 0.0  ;;  %v3233_v61 = vadd.f32 %v7035_v30, %v8604_v26  ;;  %v3224_v15 = vpop.f32.mrb[155].mxu0  ;;  %5037 = vmatmul.mubr.bf16.gmra.mrb[176].mxu0 %v3544_v34  ;;  %4891 = vmatprep.mubr.bf16.mxu1 %v8649_v13  ;;  %v3519_v26 = vmul.f32 %v9862_v27, %v8706_v17  ;;  %v3616_v63 = vmul.f32 %v9870_v0, %v8753_v46  ;;  %v8867_v34 = vld [vmem:[#allocation2 + $0xaf] sm:$0xff] }
 0x295   : > { %9878 = vst [vmem:[#allocation34_spill] sm:$0xff] %v8844_v21  ;;  %v3276_v33 = vmax.f32 %v3222_v32, 0.0  ;;  %v3225_v22 = vadd.f32 %v3224_v15, %v8598_v14  ;;  %5044 = vmatprep.mubr.bf16.mxu0 %v3641_v7  ;;  %v9879_v32 = vld [vmem:[#allocation29_spill] sm:$0xff]  ;;  %v9881_v7 = vld [vmem:[#allocation36_spill] sm:$0xff] }
 0x296   : > { %3310 = vst [vmem:[#allocation2 + $0xe8] sm:$0xff] %v3278_v44  ;;  %v3279_v16 = vmax.f32 %v3233_v61, 0.0  ;;  %v8857_v30 = vld [vmem:[#allocation2 + $0xb1] sm:$0xff]  ;;  %v8863_v14 = vmul.f32 %v9879_v32, %v8838_v19  ;;  %v3545_v20 = vpack.c.bf16 %v3519_v26, %v8732_v1 }
 0x297   : > { %3308 = vst [vmem:[#allocation2 + $0xd8] sm:$0xff] %v3276_v33  ;;  %v3277_v15 = vmax.f32 %v3225_v22, 0.0  ;;  %v8869_v61 = vld [vmem:[#allocation2 + $0xb7] sm:$0xff]  ;;  %v8875_v42 = vmul.f32 %v9881_v7, %v8857_v30  ;;  %v3386_v22 = vpack.c.bf16 %v8751_v50, %v3360_v51  ;;  %v3642_v51 = vpack.c.bf16 %v8778_v8, %v3616_v63 }
 0x298   : > { %9880 = vst [vmem:[#allocation29_spill] sm:$0xff] %v8863_v14  ;;  %3311 = vst [vmem:[#allocation2 + $0xf0] sm:$0xff] %v3279_v16  ;;  %v8871_v17 = vpack.c.bf16 %v3279_v16, %v3278_v44  ;;  %v8880_v3 = vld [vmem:[#allocation2 + $0xc1] sm:$0xff]  ;;  %v8884_v44 = vld [vmem:[#allocation2 + $0xa9] sm:$0xff]  ;;  %v8890_v39 = vmul.f32 %v9883_v28, %v8869_v61 }
 0x299   : > { %9882 = vst [vmem:[#allocation36_spill] sm:$0xff] %v8875_v42  ;;  %3309 = vst [vmem:[#allocation2 + $0xe0] sm:$0xff] %v3277_v15  ;;  %v7038_v27 = vpop.f32.mrb[156].mxu0  ;;  %v8886_v16 = vpack.c.bf16 %v3277_v15, %v3276_v33  ;;  %v8894_v50 = vld [vmem:[#allocation2 + $0xbf] sm:$0xff] }
 0x29a   : > { %v3246_v0 = vadd.f32 %v7038_v27, %v8616_v29  ;;  %v3237_v21 = vpop.f32.mrb[157].mxu0  ;;  %9884 = vst [vmem:[#allocation32_spill] sm:$0xff] %v8890_v39  ;;  %v8896_v29 = vld [vmem:[#allocation2 + $0xc7] sm:$0xff]  ;;  %v9885_v33 = vld [vmem:[#allocation39_spill] sm:$0xff] }
 0x29b   : > { %v3238_v13 = vadd.f32 %v3237_v21, %v8607_v37  ;;  %v7039_v14 = vpop.f32.mrb[158].mxu0  ;;  %4892 = vmatmul.mubr.bf16.gmra.mrb[152].mxu1 %v3386_v22  ;;  %v8902_v26 = vmul.f32 %v9885_v33, %v8880_v3  ;;  %v8906_v37 = vld [vmem:[#allocation2 + $0xb9] sm:$0xff]  ;;  %v3362_v22 = vmul.f32 %v9875_v35, %v8753_v46 }
 0x29c   : > { %v3282_v15 = vmax.f32 %v3246_v0, 0.0  ;;  %v3249_v1 = vadd.f32 %v7039_v14, %v8618_v11  ;;  %v3240_v59 = vpop.f32.mrb[159].mxu0  ;;  %5045 = vmatmul.mubr.bf16.gmra.mrb[180].mxu0 %v3545_v20  ;;  %4899 = vmatprep.mubr.bf16.mxu1 %v8712_v2  ;;  %v3521_v11 = vmul.f32 %v9868_v43, %v8741_v18  ;;  %v3618_v14 = vmul.f32 %v9875_v35, %v8780_v58  ;;  %v9891_v27 = vld [vmem:[#allocation40_spill] sm:$0xff]  ;;  %v8942_v35 = vld [vmem:[#allocation2 + $0xc9] sm:$0xff] }
 0x29d   : > { %9886 = vst [vmem:[#allocation39_spill] sm:$0xff] %v8902_v26  ;;  %v3280_v21 = vmax.f32 %v3238_v13, 0.0  ;;  %v3241_v63 = vadd.f32 %v3240_v59, %v8610_v45  ;;  %5052 = vmatprep.mubr.bf16.mxu0 %v3642_v51  ;;  %v9887_v45 = vld [vmem:[#allocation37_spill] sm:$0xff] }
 0x29e   : > { %3314 = vst [vmem:[#allocation2 + $0x108] sm:$0xff] %v3282_v15  ;;  %v3283_v0 = vmax.f32 %v3249_v1, 0.0  ;;  %v8915_v20 = vld [vmem:[#allocation2 + $0xd7] sm:$0xff]  ;;  %v8923_v59 = vmul.f32 %v9887_v45, %v8896_v29  ;;  %v8927_v1 = vld [vmem:[#allocation2 + $0xcf] sm:$0xff]  ;;  %v3546_v26 = vpack.c.bf16 %v3521_v11, %v8768_v56 }
 0x29f   : > { %v8917_v2 = vld [vmem:[#allocation2 + $0xd1] sm:$0xff]  ;;  %3312 = vst [vmem:[#allocation2 + $0xf8] sm:$0xff] %v3280_v21  ;;  %v3281_v46 = vmax.f32 %v3241_v63, 0.0  ;;  %v9889_v51 = vld [vmem:[#allocation41_spill] sm:$0xff]  ;;  %v8939_v43 = vmul.f32 %v9891_v27, %v8915_v20  ;;  %v3387_v63 = vpack.c.bf16 %v8778_v8, %v3362_v22 }
 0x2a0   : > { %9888 = vst [vmem:[#allocation37_spill] sm:$0xff] %v8923_v59  ;;  %3315 = vst [vmem:[#allocation2 + $0x110] sm:$0xff] %v3283_v0  ;;  %v8929_v18 = vld [vmem:[#allocation2 + $0xdf] sm:$0xff]  ;;  %v8933_v15 = vmul.f32 %v9889_v51, %v8917_v2  ;;  %v8944_v39 = vld [vmem:[#allocation2 + $0xe7] sm:$0xff]  ;;  %v3643_v59 = vpack.c.bf16 %v8809_v5, %v3618_v14 }
 0x2a1   : > { %9892 = vst [vmem:[#allocation40_spill] sm:$0xff] %v8939_v43  ;;  %3313 = vst [vmem:[#allocation2 + $0x100] sm:$0xff] %v3281_v46  ;;  %v8946_v0 = vld [vmem:[#allocation2 + $0xe1] sm:$0xff]  ;;  %v8949_v42 = vpack.c.bf16 %v3281_v46, %v3280_v21  ;;  %v8961_v8 = vld [vmem:[#allocation2 + $0xd9] sm:$0xff]  ;;  %v3364_v46 = vmul.f32 %v9879_v32, %v8780_v58 }
 0x2a2   : > { %9890 = vst [vmem:[#allocation41_spill] sm:$0xff] %v8933_v15  ;;  %v8956_v54 = vmul.f32 %v9893_v31, %v8946_v0  ;;  %v9895_v21 = vld [vmem:[#allocation42_spill] sm:$0xff]  ;;  %v9897_v58 = vld [vmem:[#allocation45_spill] sm:$0xff] }
 0x2a3   : > { %4900 = vmatmul.mubr.bf16.gmra.mrb[156].mxu1 %v3387_v63  ;;  %v8965_v11 = vmul.f32 %v9895_v21, %v8944_v39  ;;  %v8969_v14 = vld [vmem:[#allocation2 + $0xef] sm:$0xff]  ;;  %v9899_v63 = vld [vmem:[#allocation44_spill] sm:$0xff] }
 0x2a4   : > { %9894 = vst [vmem:[#allocation43_spill] sm:$0xff] %v8956_v54  ;;  %5053 = vmatmul.mubr.bf16.gmra.mrb[184].mxu0 %v3546_v26  ;;  %4907 = vmatprep.mubr.bf16.mxu1 %v8697_v41  ;;  %v3523_v26 = vmul.f32 %v9873_v48, %v8764_v6  ;;  %v3388_v6 = vpack.c.bf16 %v8809_v5, %v3364_v46  ;;  %v8994_v48 = vld [vmem:[#allocation2 + $0xe9] sm:$0xff] }
 0x2a5   : > { %9896 = vst [vmem:[#allocation42_spill] sm:$0xff] %v8965_v11  ;;  %5060 = vmatprep.mubr.bf16.mxu0 %v3643_v59  ;;  %v3620_v59 = vmul.f32 %v9879_v32, %v8811_v25  ;;  %v9902_v11 = vld [vmem:[#allocation46_spill] sm:$0xff]  ;;  %v3525_v5 = vmul.f32 %v9877_v62, %v8799_v23 }
 0x2a6   : > { %v8975_v22 = vld [vmem:[#allocation2 + $0xf7] sm:$0xff]  ;;  %v3547_v32 = vpack.c.bf16 %v3523_v26, %v8790_v52 }
 0x2a7   : > { %v8977_v41 = vld [vmem:[#allocation2 + $0xf1] sm:$0xff]  ;;  %v8991_v54 = vmul.f32 %v9899_v63, %v8975_v22  ;;  %v3644_v53 = vpack.c.bf16 %v8836_v47, %v3620_v59  ;;  %v9038_v23 = vld [vmem:[#allocation2 + $0x109] sm:$0xff] }
 0x2a8   : > { %v8985_v43 = vmul.f32 %v9897_v58, %v8977_v41  ;;  %v8987_v15 = vld [vmem:[#allocation2 + $0xff] sm:$0xff]  ;;  %v8996_v56 = vld [vmem:[#allocation2 + $0x107] sm:$0xff]  ;;  %v9021_v59 = vld [vmem:[#allocation2 + $0x10f] sm:$0xff] }
 0x2a9   : > { %9900 = vst [vmem:[#allocation44_spill] sm:$0xff] %v8991_v54  ;;  %v8998_v13 = vld [vmem:[#allocation2 + $0x101] sm:$0xff]  ;;  %v9008_v12 = vld [vmem:[#allocation2 + $0xf9] sm:$0xff]  ;;  %v9029_v46 = vld [vmem:[#allocation2 + $0x111] sm:$0xff] }
 0x2aa   : > { %9898 = vst [vmem:[#allocation45_spill] sm:$0xff] %v8985_v43  ;;  %v9005_v9 = vmul.f32 %v9901_v10, %v8998_v13  ;;  %v9017_v43 = vmul.f32 %v9902_v11, %v8996_v56 }
 0x2ab   : > { %4908 = vmatmul.mubr.bf16.gmra.mrb[160].mxu1 %v3388_v6  ;;  %v3366_v6 = vmul.f32 %v9883_v28, %v8811_v25  ;;  %v9035_v25 = vmul.f32 %v9901_v10, %v9029_v46 }
 0x2ac   : > { %5061 = vmatmul.mubr.bf16.gmra.mrb[188].mxu0 %v3547_v32  ;;  %4915 = vmatprep.mubr.bf16.mxu1 %v8770_v40  ;;  %v3622_v40 = vmul.f32 %v9883_v28, %v8838_v19 }
 0x2ad   : > { %5068 = vmatprep.mubr.bf16.mxu0 %v3644_v53  ;;  %v3389_v26 = vpack.c.bf16 %v8836_v47, %v3366_v6  ;;  %v3548_v53 = vpack.c.bf16 %v3525_v5, %v8826_v36  ;;  %v4066_v28 = vpack.c.bf16 %v9035_v25, %v9038_v23  ;;  %v3368_v6 = vmul.f32 %v9887_v45, %v8838_v19 }
 0x2ae   : > { %v3645_v54 = vpack.c.bf16 %v8867_v34, %v3622_v40  ;;  %v3527_v5 = vmul.f32 %v9881_v7, %v8822_v49  ;;  %v3529_v49 = vmul.f32 %v9885_v33, %v8857_v30  ;;  %v3626_v19 = vmul.f32 %v9891_v27, %v8896_v29 }
 0x2af   : > { %v3390_v40 = vpack.c.bf16 %v8867_v34, %v3368_v6  ;;  %v3372_v30 = vmul.f32 %v9895_v21, %v8896_v29  ;;  %v3374_v29 = vmul.f32 %v9899_v63, %v8915_v20 }
 0x2b0   : > { %v3549_v32 = vpack.c.bf16 %v3527_v5, %v8848_v60 }
 0x2b3   : > { %4916 = vmatmul.mubr.bf16.gmra.mrb[164].mxu1 %v3389_v26  ;;  %v3624_v26 = vmul.f32 %v9887_v45, %v8869_v61 }
 0x2b4   : > { %5069 = vmatmul.mubr.bf16.gmra.mrb[192].mxu0 %v3548_v53  ;;  %4923 = vmatprep.mubr.bf16.mxu1 %v8755_v38  ;;  %v3550_v53 = vpack.c.bf16 %v3529_v49, %v8884_v44 }
 0x2b5   : > { %5076 = vmatprep.mubr.bf16.mxu0 %v3645_v54  ;;  %v3646_v38 = vpack.c.bf16 %v8894_v50, %v3624_v26  ;;  %v3370_v54 = vmul.f32 %v9891_v27, %v8869_v61  ;;  %v3531_v26 = vmul.f32 %v9889_v51, %v8880_v3  ;;  %v3533_v3 = vmul.f32 %v9893_v31, %v8917_v2 }
 0x2b6   : > { %v3632_v2 = vmul.f32 %v9902_v11, %v8975_v22 }
 0x2b7   : > { %v3391_v45 = vpack.c.bf16 %v8894_v50, %v3370_v54  ;;  %v3392_v54 = vpack.c.bf16 %v8927_v1, %v3372_v30 }
 0x2bb   : > { %4924 = vmatmul.mubr.bf16.gmra.mrb[168].mxu1 %v3390_v40 }
 0x2bc   : > { %5077 = vmatmul.mubr.bf16.gmra.mrb[196].mxu0 %v3549_v32  ;;  %4931 = vmatprep.mubr.bf16.mxu1 %v8828_v57  ;;  %v3647_v32 = vpack.c.bf16 %v8927_v1, %v3626_v19  ;;  %v3393_v19 = vpack.c.bf16 %v8929_v18, %v3374_v29  ;;  %v3828_v29 = vld [vmem:[#allocation2 + $0x27] sm:$0xff] }
 0x2bd   : > { %5084 = vmatprep.mubr.bf16.mxu0 %v3646_v38  ;;  %v6536_v6 = vpop.f32.mrb[128].mxu1  ;;  %v3628_v38 = vmul.f32 %v9895_v21, %v8915_v20  ;;  %v3630_v21 = vmul.f32 %v9899_v63, %v8944_v39  ;;  %v3535_v20 = vmul.f32 %v9897_v58, %v8946_v0  ;;  %v3537_v0 = vmul.f32 %v9901_v10, %v8977_v41  ;;  %v3669_v10 = vld [vmem:[#allocation2 + $0x20] sm:$0xff]  ;;  %v3668_v41 = vld [vmem:[#allocation2 + $0x18] sm:$0xff] }
 0x2be   : > { %v6537_v5 = vpop.f32.mrb[129].mxu1 }
 0x2bf   : > { %v9063_v57 = vadd.f32 %v6537_v5, %v6536_v6  ;;  %v6539_v61 = vpop.f32.mrb[130].mxu1  ;;  %v3648_v49 = vpack.c.bf16 %v8929_v18, %v3628_v38  ;;  %v3553_v6 = vpack.c.bf16 %v3535_v20, %v8961_v8 }
 0x2c0   : > { %v6540_v27 = vpop.f32.mrb[131].mxu1 }
 0x2c1   : > { %v9069_v40 = vadd.f32 %v6540_v27, %v6539_v61  ;;  %v3554_v61 = vpack.c.bf16 %v3537_v0, %v8994_v48 }
 0x2c3   : > { %4932 = vmatmul.mubr.bf16.gmra.mrb[172].mxu1 %v3391_v45  ;;  %v3552_v45 = vpack.c.bf16 %v3533_v3, %v8942_v35  ;;  %v9906_v3 = vld [vmem:[#allocation33_spill] sm:$0xff] }
 0x2c4   : > { %5085 = vmatmul.mubr.bf16.gmra.mrb[200].mxu0 %v3550_v53  ;;  %4939 = vmatprep.mubr.bf16.mxu1 %v8813_v4  ;;  %v3551_v4 = vpack.c.bf16 %v3531_v26, %v8906_v37  ;;  %v3649_v53 = vpack.c.bf16 %v8969_v14, %v3630_v21  ;;  %v3925_v26 = vld [vmem:[#allocation2 + $0x30] sm:$0xff]  ;;  %v9907_v21 = vld [vmem:[#allocation35_spill] sm:$0xff] }
 0x2c5   : > { %5092 = vmatprep.mubr.bf16.mxu0 %v3647_v32  ;;  %v3650_v32 = vpack.c.bf16 %v8987_v15, %v3632_v2  ;;  %v3926_v2 = vld [vmem:[#allocation2 + $0x38] sm:$0xff] }
 0x2cb   : > { %4940 = vmatmul.mubr.bf16.gmra.mrb[176].mxu1 %v3392_v54  ;;  %v3924_v54 = vld [vmem:[#allocation2 + $0x28] sm:$0xff] }
 0x2cc   : > { %5093 = vmatmul.mubr.bf16.gmra.mrb[204].mxu0 %v3551_v4  ;;  %4947 = vmatprep.mubr.bf16.mxu1 %v8886_v16  ;;  %v3376_v16 = vmul.f32 %v9902_v11, %v8944_v39  ;;  %v7299_v4 = vld [vmem:[#allocation9 + $0x208] sm:$0xff]  }
 0x2cd   : > { %5100 = vmatprep.mubr.bf16.mxu0 %v3648_v49  ;;  %v3956_v49 = vpack.c.bf16 %v3925_v26, %v3924_v54  ;;  %v9917_v26 = vld [vmem:[#allocation51_spill] sm:$0xff]  ;;  %v7304_v54 = vld [vmem:[#allocation9 + $0x230] sm:$0xff]  }
 0x2ce   : > { %v3394_v63 = vpack.c.bf16 %v8969_v14, %v3376_v16  ;;  %v3829_v16 = vld [vmem:[#allocation2 + $0x2f] sm:$0xff] }
 0x2d3   : > { %4948 = vmatmul.mubr.bf16.gmra.mrb[180].mxu1 %v3393_v19 }
 0x2d4   : > { %5101 = vmatmul.mubr.bf16.gmra.mrb[208].mxu0 %v3552_v45  ;;  %4955 = vmatprep.mubr.bf16.mxu1 %v8871_v17  ;;  %v9903_v17 = vld [vmem:[#allocation58_spill] sm:$0xff]  ;;  %v7300_v45 = vld [vmem:[#allocation9 + $0x210] sm:$0xff]  }
 0x2d5   : > { %5108 = vmatprep.mubr.bf16.mxu0 %v3649_v53  ;;  %v3378_v39 = vmul.f32 %v9903_v17, %v8975_v22  ;;  %v3634_v11 = vmul.f32 %v9903_v17, %v8996_v56  ;;  %v9905_v22 = vld [vmem:[#allocation59_spill] sm:$0xff]  ;;  %v3700_v56 = vpack.c.bf16 %v3669_v10, %v3668_v41  ;;  %v3927_v53 = vld [vmem:[#allocation2 + $0x40] sm:$0xff]  ;;  %v9915_v10 = vld [vmem:[#allocation38_spill] sm:$0xff] }
 0x2d6   : > { %v3539_v27 = vmul.f32 %v9905_v22, %v8998_v13  ;;  %v9910_v13 = vld [vmem:[#allocation14_spill] sm:$0xff] }
 0x2d7   : > { %v3395_v5 = vpack.c.bf16 %v8987_v15, %v3378_v39  ;;  %v3651_v30 = vpack.c.bf16 %v9021_v59, %v3634_v11  ;;  %v3860_v19 = vmul.f32 %v9910_v13, %v3828_v29  ;;  %v9912_v39 = vld [vmem:[#allocation48_spill] sm:$0xff]  ;;  %v7302_v11 = vld [vmem:[#allocation9 + $0x220] sm:$0xff]   ;;  %v7305_v29 = vld [vmem:[#allocation9 + $0x238] sm:$0xff]  }
 0x2d8   : > { %v3555_v38 = vpack.c.bf16 %v3539_v27, %v9008_v12  ;;  %v9914_v27 = vld [vmem:[#allocation31_spill] sm:$0xff]  ;;  %v9923_v13 = vld [vmem:[#allocation56_spill] sm:$0xff] }
 0x2d9   : > { %v3892_v20 = vpack.c.bf16 %v3829_v16, %v3860_v19  ;;  %v9916_v41 = vpack.c.bf16 %v9914_v27, %v9915_v10  ;;  %v9924_v19 = vld [vmem:[#allocation55_spill] sm:$0xff]  ;;  %v3932_v16 = vld [vmem:[#allocation2 + $0x68] sm:$0xff]  ;;  %v9935_v10 = vld [vmem:[#allocation16_spill] sm:$0xff] }
 0x2db   : > { %4956 = vmatmul.mubr.bf16.gmra.mrb[184].mxu1 %v3394_v63  ;;  %v7301_v63 = vld [vmem:[#allocation9 + $0x218] sm:$0xff]  }
 0x2dc   : > { %5109 = vmatmul.mubr.bf16.gmra.mrb[212].mxu0 %v3553_v6  ;;  %4963 = vmatprep.mubr.bf16.mxu1 %v8949_v42  ;;  %v9904_v42 = vpack.c.bf16 %v8636_v55, %v8639_v24  ;;  %v9908_v55 = vpack.c.bf16 %v9906_v3, %v9907_v21  ;;  %v9909_v24 = vld [vmem:[#allocation28_spill] sm:$0xff]  ;;  %v3957_v6 = vpack.c.bf16 %v3927_v53, %v3926_v2  ;;  %v9920_v21 = vld [vmem:[#allocation49_spill] sm:$0xff]  ;;  %v3933_v53 = vld [vmem:[#allocation2 + $0x70] sm:$0xff] }
 0x2dd   : > { %5116 = vmatprep.mubr.bf16.mxu0 %v3650_v32  ;;  %v9911_v32 = vld [vmem:[#allocation47_spill] sm:$0xff]  ;;  %v9926_v2 = vld [vmem:[#allocation54_spill] sm:$0xff] }
 0x2de   : > { %v9913_v0 = vpack.c.bf16 %v9911_v32, %v9912_v39  ;;  %v9929_v32 = vld [vmem:[#allocation60_spill] sm:$0xff]  ;;  %v9930_v39 = vld [vmem:[#allocation61_spill] sm:$0xff] }
 0x2e3   : > { %4964 = vmatmul.mubr.bf16.gmra.mrb[188].mxu1 %v3395_v5  ;;  %v3929_v5 = vld [vmem:[#allocation2 + $0x50] sm:$0xff] }
 0x2e4   : > { %5117 = vmatmul.mubr.bf16.gmra.mrb[216].mxu0 %v3554_v61  ;;  %5165 = vmatprep.mubr.bf16.mxu1 %v9904_v42  ;;  %v3928_v61 = vld [vmem:[#allocation2 + $0x48] sm:$0xff] }
 0x2e5   : > { %5124 = vmatprep.mubr.bf16.mxu0 %v3651_v30  ;;  %v7303_v30 = vld [vmem:[#allocation9 + $0x228] sm:$0xff]   ;;  %v3958_v42 = vpack.c.bf16 %v3929_v5, %v3928_v61 }
 0x2e6   : > { %v3934_v5 = vld [vmem:[#allocation2 + $0x78] sm:$0xff] }
 0x2eb   : > { %5166 = vmatmul.mubr.bf16.vlgmr.msra.gmra.mrb[192].mxu1 %v3700_v56  ;;  %v9918_v56 = vld [vmem:[#allocation22_spill] sm:$0xff] }
 0x2ec   : > { %5125 = vmatmul.mubr.bf16.gmra.mrb[220].mxu0 %v3555_v38  ;;  %5173 = vmatprep.mubr.bf16.mxu1 %v9908_v55  ;;  %v9919_v38 = vpack.c.bf16 %v9917_v26, %v9918_v56  ;;  %v9921_v55 = vld [vmem:[#allocation50_spill] sm:$0xff]  ;;  %v3936_v56 = vld [vmem:[#allocation2 + $0x88] sm:$0xff] }
 0x2ed   : > { %5326 = vmatprep.mubr.bf16.mxu0 %v3956_v49  ;;  %7041 = vmatpush3.bf16.msra.mxu1 %v9909_v24  ;;  %v9922_v24 = vpack.c.bf16 %v9920_v21, %v9921_v55  ;;  %v3937_v26 = vld [vmem:[#allocation2 + $0x90] sm:$0xff]  ;;  %v3939_v21 = vld [vmem:[#allocation2 + $0xa0] sm:$0xff]  ;;  %v3938_v55 = vld [vmem:[#allocation2 + $0x98] sm:$0xff] }
 0x2ee   : > { %7042 = vmatprep.subr.bf16.mxu1 %v7299_v4 }
 0x2f1   : > { %7043 = vmatpush3.bf16.msra.mxu1 %v7299_v4  ;;  %v3931_v4 = vld [vmem:[#allocation2 + $0x60] sm:$0xff] }
 0x2f2   : > { %7044 = vmatprep.subr.bf16.mxu1 %v7300_v45 }
 0x2f3   : > { %5174 = vmatmul.mubr.bf16.gmra.mrb[196].mxu1 %v3956_v49  ;;  %v3930_v49 = vld [vmem:[#allocation2 + $0x58] sm:$0xff] }
 0x2f4   : > { %5327 = vmatmul.mubr.bf16.vlgmr.msra.gmra.mrb[224].mxu0 %v3892_v20  ;;  %5181 = vmatprep.mubr.bf16.mxu1 %v9913_v0  ;;  %v3959_v3 = vpack.c.bf16 %v3931_v4, %v3930_v49  ;;  %v3960_v20 = vpack.c.bf16 %v3933_v53, %v3932_v16  ;;  %v9931_v0 = vpack.c.bf16 %v9929_v32, %v9930_v39  ;;  %v9938_v4 = vld [vmem:[#allocation62_spill] sm:$0xff]  ;;  %v3943_v39 = vld [vmem:[#allocation2 + $0xc0] sm:$0xff] }
 0x2f5   : > { %5334 = vmatprep.mubr.bf16.mxu0 %v3957_v6  ;;  %7045 = vmatpush3.bf16.msra.mxu1 %v7300_v45  ;;  %v9925_v45 = vpack.c.bf16 %v9923_v13, %v9924_v19  ;;  %v9943_v13 = vld [vmem:[#allocation21_spill] sm:$0xff]  ;;  %v3941_v16 = vld [vmem:[#allocation2 + $0xb0] sm:$0xff] }
 0x2f6   : > { %7046 = vmatprep.subr.bf16.mxu1 %v7301_v63 }
 0x2f9   : > { %7047 = vmatpush3.bf16.msra.mxu1 %v7301_v63  ;;  %v9927_v63 = vld [vmem:[#allocation52_spill] sm:$0xff] }
 0x2fa   : > { %7048 = vmatprep.subr.bf16.mxu1 %v7302_v11 }
 0x2fb   : > { %5182 = vmatmul.mubr.bf16.gmra.mrb[200].mxu1 %v3957_v6  ;;  %v9928_v6 = vpack.c.bf16 %v9926_v2, %v9927_v63 }
 0x2fc   : > { %5335 = vmatmul.mubr.bf16.gmra.mrb[228].mxu0 %v9916_v41  ;;  %5189 = vmatprep.mubr.bf16.mxu1 %v9919_v38  ;;  %v9936_v41 = vpack.c.bf16 %v9935_v10, %v8790_v52  ;;  %v3962_v38 = vpack.c.bf16 %v3937_v26, %v3936_v56  ;;  %v9942_v52 = vld [vmem:[#allocation23_spill] sm:$0xff] }
 0x2fd   : > { %5342 = vmatprep.mubr.bf16.mxu0 %v3958_v42  ;;  %7049 = vmatpush3.bf16.msra.mxu1 %v7302_v11  ;;  %v3935_v11 = vld [vmem:[#allocation2 + $0x80] sm:$0xff]  ;;  %v9944_v19 = vpack.c.bf16 %v9942_v52, %v9943_v13  ;;  %v3946_v56 = vld [vmem:[#allocation2 + $0xd8] sm:$0xff]  ;;  %v3949_v52 = vld [vmem:[#allocation2 + $0xf0] sm:$0xff] }
 0x2fe   : > { %7050 = vmatprep.subr.bf16.mxu1 %v7303_v30  ;;  %v3961_v61 = vpack.c.bf16 %v3935_v11, %v3934_v5 }
 0x301   : > { %7051 = vmatpush3.bf16.msra.mxu1 %v7303_v30  ;;  %v9932_v30 = vld [vmem:[#allocation27_spill] sm:$0xff] }
 0x302   : > { %7052 = vmatprep.subr.bf16.mxu1 %v7304_v54 }
 0x303   : > { %5190 = vmatmul.mubr.bf16.gmra.mrb[204].mxu1 %v3958_v42  ;;  %v9933_v42 = vld [vmem:[#allocation57_spill] sm:$0xff] }
 0x304   : > { %5343 = vmatmul.mubr.bf16.gmra.mrb[232].mxu0 %v9922_v24  ;;  %5197 = vmatprep.mubr.bf16.mxu1 %v9925_v45  ;;  %v9934_v27 = vpack.c.bf16 %v9932_v30, %v9933_v42  ;;  %v3963_v24 = vpack.c.bf16 %v3939_v21, %v3938_v55  ;;  %v9945_v45 = vld [vmem:[#allocation34_spill] sm:$0xff]  ;;  %v3944_v42 = vld [vmem:[#allocation2 + $0xc8] sm:$0xff] }
 0x305   : > { %5350 = vmatprep.mubr.bf16.mxu0 %v3959_v3  ;;  %7053 = vmatpush3.bf16.msra.mxu1 %v7304_v54  ;;  %v9937_v54 = vld [vmem:[#allocation63_spill] sm:$0xff]  ;;  %v9946_v53 = vpack.c.bf16 %v9945_v45, %v8848_v60  ;;  %v9951_v60 = vld [vmem:[#allocation29_spill] sm:$0xff] }
 0x306   : > { %7054 = vmatprep.subr.bf16.mxu1 %v7305_v29  ;;  %v9939_v49 = vpack.c.bf16 %v9937_v54, %v9938_v4  ;;  %v9952_v5 = vpack.c.bf16 %v8867_v34, %v9951_v60  ;;  %v3947_v34 = vld [vmem:[#allocation2 + $0xe0] sm:$0xff]  ;;  %v9961_v4 = vld [vmem:[#allocation43_spill] sm:$0xff] }
 0x309   : > { %7055 = vmatpush3.bf16.msra.mxu1 %v7305_v29  ;;  %v9940_v29 = vld [vmem:[#allocation64_spill] sm:$0xff] }
 0x30b   : > { %5198 = vmatmul.mubr.bf16.gmra.mrb[208].mxu1 %v3959_v3  ;;  %v9941_v3 = vpack.c.bf16 %v9940_v29, %v8826_v36  ;;  %v9947_v36 = vld [vmem:[#allocation26_spill] sm:$0xff] }
 0x30c   : > { %5351 = vmatmul.mubr.bf16.gmra.mrb[236].mxu0 %v9928_v6  ;;  %5205 = vmatprep.mubr.bf16.mxu1 %v9931_v0  ;;  %v9948_v63 = vpack.c.bf16 %v8836_v47, %v9947_v36  ;;  %v9949_v6 = vld [vmem:[#allocation36_spill] sm:$0xff]  ;;  %v3942_v0 = vld [vmem:[#allocation2 + $0xb8] sm:$0xff]  ;;  %v3945_v47 = vld [vmem:[#allocation2 + $0xd0] sm:$0xff] }
 0x30d   : > { %5358 = vmatprep.mubr.bf16.mxu0 %v3960_v20  ;;  %v9950_v32 = vpack.c.bf16 %v9949_v6, %v8884_v44  ;;  %v3965_v11 = vpack.c.bf16 %v3943_v39, %v3942_v0  ;;  %v9955_v44 = vld [vmem:[#allocation32_spill] sm:$0xff]  ;;  %v9965_v39 = vld [vmem:[#allocation45_spill] sm:$0xff] }
 0x30e   : > { %v9956_v10 = vpack.c.bf16 %v8894_v50, %v9955_v44  ;;  %v9183_v50 = vld [vmem:[%s9574_s4] ss:$0 sm:$0xff] }
 0x30f   : > { %v9963_v6 = vld [vmem:[#allocation40_spill] sm:$0xff] }
 0x313   : > { %5206 = vmatmul.mubr.bf16.gmra.mrb[212].mxu1 %v3960_v20  ;;  %v3940_v20 = vld [vmem:[#allocation2 + $0xa8] sm:$0xff] }
 0x314   : > { %5359 = vmatmul.mubr.bf16.gmra.mrb[240].mxu0 %v9934_v27  ;;  %5213 = vmatprep.mubr.bf16.mxu1 %v9936_v41  ;;  %v3964_v2 = vpack.c.bf16 %v3941_v16, %v3940_v20  ;;  %v3966_v27 = vpack.c.bf16 %v3945_v47, %v3944_v42  ;;  %v9957_v41 = vld [vmem:[#allocation41_spill] sm:$0xff]  ;;  %v4849_v20 = vadd.f32 %v9069_v40, %v9183_v50  ;;  %v3951_v47 = vld [vmem:[#allocation2 + $0x100] sm:$0xff] }
 0x315   : > { %5366 = vmatprep.mubr.bf16.mxu0 %v3961_v61  ;;  %v9958_v26 = vpack.c.bf16 %v9957_v41, %v8942_v35  ;;  %v3948_v16 = vld [vmem:[#allocation2 + $0xe8] sm:$0xff] }
 0x31b   : > { %5214 = vmatmul.mubr.bf16.gmra.mrb[216].mxu1 %v3961_v61  ;;  %v9953_v61 = vld [vmem:[#allocation39_spill] sm:$0xff] }
 0x31c   : > { %5367 = vmatmul.mubr.bf16.gmra.mrb[244].mxu0 %v9939_v49  ;;  %5221 = vmatprep.mubr.bf16.mxu1 %v9941_v3  ;;  %v9954_v30 = vpack.c.bf16 %v9953_v61, %v8906_v37  ;;  %v9959_v37 = vld [vmem:[#allocation37_spill] sm:$0xff]  ;;  %v9962_v49 = vpack.c.bf16 %v9961_v4, %v8961_v8  ;;  %v9969_v4 = vpack.c.bf16 %v9005_v9, %v9008_v12 }
 0x31d   : > { %5374 = vmatprep.mubr.bf16.mxu0 %v3962_v38  ;;  %v9960_v54 = vpack.c.bf16 %v8927_v1, %v9959_v37  ;;  %v4846_v1 = vadd.f32 %v9063_v57, %v9183_v50  ;;  %v9966_v57 = vpack.c.bf16 %v9965_v39, %v8994_v48  ;;  %v9967_v37 = vld [vmem:[#allocation42_spill] sm:$0xff] }
 0x323   : > { %5222 = vmatmul.mubr.bf16.gmra.mrb[220].mxu1 %v3962_v38  ;;  %v3967_v38 = vpack.c.bf16 %v3947_v34, %v3946_v56 }
 0x324   : > { %5375 = vmatmul.mubr.bf16.gmra.mrb[248].mxu0 %v9944_v19  ;;  %5229 = vmatprep.mubr.bf16.mxu1 %v9946_v53 }
 0x325   : > { %5382 = vmatprep.mubr.bf16.mxu0 %v3963_v24 }
 0x32b   : > { %5230 = vmatmul.mubr.bf16.gmra.mrb[224].mxu1 %v3963_v24 }
 0x32c   : > { %5383 = vmatmul.mubr.bf16.gmra.mrb[252].mxu0 %v9948_v63  ;;  %5237 = vmatprep.mubr.bf16.mxu1 %v9950_v32  ;;  %v3968_v63 = vpack.c.bf16 %v3949_v52, %v3948_v16  ;;  %v9964_v32 = vpack.c.bf16 %v8929_v18, %v9963_v6  ;;  %v9970_v6 = vld [vmem:[#allocation44_spill] sm:$0xff] }
 0x32d   : > { %5390 = vmatprep.mubr.bf16.mxu0 %v3964_v2 }
 0x333   : > { %5238 = vmatmul.mubr.bf16.gmra.mrb[228].mxu1 %v3964_v2 }
 0x334   : > { %5391 = vmatmul.mubr.bf16.gmra.mrb[0].mxu0 %v9952_v5  ;;  %5245 = vmatprep.mubr.bf16.mxu1 %v9954_v30 }
 0x335   : > { %5398 = vmatprep.mubr.bf16.mxu0 %v3965_v11 }
 0x33b   : > { %5246 = vmatmul.mubr.bf16.gmra.mrb[232].mxu1 %v3965_v11 }
 0x33c   : > { %5399 = vmatmul.mubr.bf16.gmra.mrb[4].mxu0 %v9956_v10  ;;  %5253 = vmatprep.mubr.bf16.mxu1 %v9958_v26  ;;  %v3950_v26 = vld [vmem:[#allocation2 + $0xf8] sm:$0xff] }
 0x33d   : > { %5406 = vmatprep.mubr.bf16.mxu0 %v3966_v27 }
 0x343   : > { %5254 = vmatmul.mubr.bf16.gmra.mrb[236].mxu1 %v3966_v27 }
 0x344   : > { %5407 = vmatmul.mubr.bf16.gmra.mrb[8].mxu0 %v9960_v54  ;;  %5261 = vmatprep.mubr.bf16.mxu1 %v9962_v49  ;;  %v9968_v54 = vpack.c.bf16 %v8969_v14, %v9967_v37 }
 0x345   : > { %5414 = vmatprep.mubr.bf16.mxu0 %v3967_v38 }
 0x346   : > { %v6542_v35 = vpop.f32.mrb[132].mxu1 }
 0x347   : > { %v6648_v29 = vpop.f32.mrb[160].mxu0  ;;  %v6543_v3 = vpop.f32.mrb[133].mxu1 }
 0x348   : > { %v6544_v21 = vadd.f32 %v6543_v3, %v6542_v35  ;;  %v6649_v55 = vpop.f32.mrb[161].mxu0  ;;  %v6545_v24 = vpop.f32.mrb[134].mxu1 }
 0x349   : > { %v6650_v13 = vadd.f32 %v6649_v55, %v6648_v29  ;;  %v6651_v19 = vpop.f32.mrb[162].mxu0  ;;  %v6546_v8 = vpop.f32.mrb[135].mxu1  ;;  %v3795_v29 = vmul.f32 %v9905_v22, %v9029_v46 }
 0x34a   : > { %v6547_v45 = vadd.f32 %v6546_v8, %v6545_v24  ;;  %v6652_v53 = vpop.f32.mrb[163].mxu0  ;;  %v4854_v42 = vadd.f32 %v6544_v21, %v9183_v50 }
 0x34b   : > { %v9189_v2 = vadd.f32 %v6650_v13, %v4846_v1  ;;  %v6653_v36 = vadd.f32 %v6652_v53, %v6651_v19  ;;  %5262 = vmatmul.mubr.bf16.gmra.mrb[240].mxu1 %v3967_v38  ;;  %v3969_v38 = vpack.c.bf16 %v3951_v47, %v3950_v26  ;;  %v3953_v1 = vld [vmem:[#allocation2 + $0x110] sm:$0xff]  ;;  %v3952_v53 = vld [vmem:[#allocation2 + $0x108] sm:$0xff] }
 0x34c   : > { %5415 = vmatmul.mubr.bf16.gmra.mrb[12].mxu0 %v9964_v32  ;;  %5269 = vmatprep.mubr.bf16.mxu1 %v9966_v57  ;;  %v4857_v48 = vadd.f32 %v6547_v45, %v9183_v50  ;;  %v3811_v45 = vpack.c.bf16 %v3795_v29, %v9038_v23  ;;  %v9971_v32 = vpack.c.bf16 %v8987_v15, %v9970_v6  ;;  %v7314_v15 = vld [vmem:[#allocation2 + $0x8] sm:$0xff]  ;;  %v3993_v29 = vld [vmem:[#allocation2 + $0x51] sm:$0xff] }
 0x34d   : > { %v9197_v0 = vadd.f32 %v6653_v36, %v4849_v20  ;;  %5422 = vmatprep.mubr.bf16.mxu0 %v3968_v63  ;;  %v3970_v36 = vpack.c.bf16 %v3953_v1, %v3952_v53  ;;  %v3992_v6 = vld [vmem:[#allocation2 + $0x49] sm:$0xff] }
 0x34e   : > { %v6548_v11 = vpop.f32.mrb[136].mxu1 }
 0x34f   : > { %v6654_v60 = vpop.f32.mrb[164].mxu0  ;;  %v6549_v5 = vpop.f32.mrb[137].mxu1 }
 0x350   : > { %v6550_v40 = vadd.f32 %v6549_v5, %v6548_v11  ;;  %v6655_v61 = vpop.f32.mrb[165].mxu0  ;;  %v6551_v30 = vpop.f32.mrb[138].mxu1  ;;  %v9972_v11 = vld [vmem:[#allocation15_spill] sm:$0xff] }
 0x351   : > { %v6656_v27 = vadd.f32 %v6655_v61, %v6654_v60  ;;  %v6657_v44 = vpop.f32.mrb[166].mxu0  ;;  %v6552_v18 = vpop.f32.mrb[139].mxu1 }
 0x352   : > { %v6553_v10 = vadd.f32 %v6552_v18, %v6551_v30  ;;  %v6658_v41 = vpop.f32.mrb[167].mxu0  ;;  %v4862_v14 = vadd.f32 %v6550_v40, %v9183_v50 }
 0x353   : > { %v9201_v34 = vadd.f32 %v6656_v27, %v4854_v42  ;;  %v6659_v56 = vadd.f32 %v6658_v41, %v6657_v44  ;;  %5270 = vmatmul.mubr.bf16.gmra.mrb[244].mxu1 %v3968_v63  ;;  %v3989_v63 = vld [vmem:[#allocation2 + $0x31] sm:$0xff]  ;;  %v3971_v41 = vpack.c.bf16 %v7314_v15, %v7314_v15 }
 0x354   : > { %5423 = vmatmul.mubr.bf16.gmra.mrb[16].mxu0 %v9968_v54  ;;  %5277 = vmatprep.mubr.bf16.mxu1 %v9969_v4  ;;  %v4865_v16 = vadd.f32 %v6553_v10, %v9183_v50  ;;  %v4021_v60 = vmul.f32 %v9972_v11, %v3989_v63  ;;  %v3988_v10 = vld [vmem:[#allocation2 + $0x29] sm:$0xff] }
 0x355   : > { %v9209_v49 = vadd.f32 %v6659_v56, %v4857_v48  ;;  %5430 = vmatprep.mubr.bf16.mxu0 %v3969_v38 }
 0x356   : > { %v6554_v35 = vpop.f32.mrb[140].mxu1  ;;  %v4052_v56 = vpack.c.bf16 %v4021_v60, %v3988_v10  ;;  %v3995_v60 = vld [vmem:[#allocation2 + $0x61] sm:$0xff] }
 0x357   : > { %v6660_v3 = vpop.f32.mrb[168].mxu0  ;;  %v6555_v21 = vpop.f32.mrb[141].mxu1 }
 0x358   : > { %v6556_v55 = vadd.f32 %v6555_v21, %v6554_v35  ;;  %v6661_v24 = vpop.f32.mrb[169].mxu0  ;;  %v6557_v52 = vpop.f32.mrb[142].mxu1  ;;  %v3858_v35 = vld [vmem:[#allocation2 + $0x117] sm:$0xff] }
 0x359   : > { %v6662_v13 = vadd.f32 %v6661_v24, %v6660_v3  ;;  %v6663_v19 = vpop.f32.mrb[170].mxu0  ;;  %v6558_v8 = vpop.f32.mrb[143].mxu1  ;;  %v9973_v3 = vpack.c.bf16 %v9021_v59, %v9017_v43  ;;  %v3890_v1 = vmul.f32 %v9903_v17, %v3858_v35 }
 0x35a   : > { %v6559_v9 = vadd.f32 %v6558_v8, %v6557_v52  ;;  %v6664_v12 = vpop.f32.mrb[171].mxu0  ;;  %v4870_v42 = vadd.f32 %v6556_v55, %v9183_v50  ;;  %v9974_v55 = vld [vmem:[#allocation17_spill] sm:$0xff] }
 0x35b   : > { %v9216_v20 = vadd.f32 %v6662_v13, %v4862_v14  ;;  %v6665_v46 = vadd.f32 %v6664_v12, %v6663_v19  ;;  %5278 = vmatmul.mubr.bf16.gmra.mrb[248].mxu1 %v3969_v38  ;;  %v3991_v38 = vld [vmem:[#allocation2 + $0x41] sm:$0xff]  ;;  %v9975_v14 = vld [vmem:[#allocation18_spill] sm:$0xff] }
 0x35c   : > { %5431 = vmatmul.mubr.bf16.gmra.mrb[20].mxu0 %v9971_v32  ;;  %5285 = vmatprep.mubr.bf16.mxu1 %v3811_v45  ;;  %v4873_v37 = vadd.f32 %v6559_v9, %v9183_v50  ;;  %v4023_v24 = vmul.f32 %v9974_v55, %v3991_v38  ;;  %v4025_v13 = vmul.f32 %v9975_v14, %v3993_v29  ;;  %v3859_v9 = vld [vmem:[#allocation2 + $0x11f] sm:$0xff]  ;;  %v3996_v55 = vld [vmem:[#allocation2 + $0x69] sm:$0xff] }
 0x35d   : > { %v9221_v39 = vadd.f32 %v6665_v46, %v4865_v16  ;;  %5438 = vmatprep.mubr.bf16.mxu0 %v3970_v36  ;;  %v3990_v16 = vld [vmem:[#allocation2 + $0x39] sm:$0xff]  ;;  %v3907_v11 = vpack.c.bf16 %v3859_v9, %v3890_v1  ;;  %v3999_v14 = vld [vmem:[#allocation2 + $0x81] sm:$0xff]  ;;  %v4001_v9 = vld [vmem:[#allocation2 + $0x91] sm:$0xff] }
 0x35e   : > { %v6560_v57 = vpop.f32.mrb[144].mxu1  ;;  %v4053_v63 = vpack.c.bf16 %v4023_v24, %v3990_v16  ;;  %v4054_v17 = vpack.c.bf16 %v4025_v13, %v3992_v6 }
 0x35f   : > { %v6666_v5 = vpop.f32.mrb[172].mxu0  ;;  %v6561_v40 = vpop.f32.mrb[145].mxu1 }
 0x360   : > { %v6562_v61 = vadd.f32 %v6561_v40, %v6560_v57  ;;  %v6667_v30 = vpop.f32.mrb[173].mxu0  ;;  %v6563_v47 = vpop.f32.mrb[146].mxu1 }
 0x361   : > { %v6668_v27 = vadd.f32 %v6667_v30, %v6666_v5  ;;  %v6669_v44 = vpop.f32.mrb[174].mxu0  ;;  %v6564_v18 = vpop.f32.mrb[147].mxu1 }
 0x362   : > { %v6565_v26 = vadd.f32 %v6564_v18, %v6563_v47  ;;  %v6670_v48 = vpop.f32.mrb[175].mxu0  ;;  %v4878_v43 = vadd.f32 %v6562_v61, %v9183_v50  ;;  %v3997_v47 = vld [vmem:[#allocation2 + $0x71] sm:$0xff]  ;;  %v9977_v18 = vld [vmem:[#allocation20_spill] sm:$0xff] }
 0x363   : > { %v9226_v54 = vadd.f32 %v6668_v27, %v4870_v42  ;;  %v6671_v4 = vadd.f32 %v6670_v48, %v6669_v44  ;;  %5286 = vmatmul.mubr.bf16.gmra.mrb[252].mxu1 %v3970_v36  ;;  %v9976_v42 = vld [vmem:[#allocation19_spill] sm:$0xff]  ;;  %v4029_v10 = vmul.f32 %v9977_v18, %v3997_v47  ;;  %v4000_v47 = vld [vmem:[#allocation2 + $0x89] sm:$0xff]  ;;  %v4003_v18 = vld [vmem:[#allocation2 + $0xa1] sm:$0xff] }
 0x364   : > { %5439 = vmatmul.mubr.bf16.gmra.mrb[24].mxu0 %v9973_v3  ;;  %7056 = vmatprep.mubr.bf16.mxu1 %v4052_v56  ;;  %v4881_v5 = vadd.f32 %v6565_v26, %v9183_v50  ;;  %v4027_v27 = vmul.f32 %v9976_v42, %v3995_v60  ;;  %v3994_v26 = vld [vmem:[#allocation2 + $0x59] sm:$0xff] }
 0x365   : > { %v9231_v21 = vadd.f32 %v6671_v4, %v4873_v37  ;;  %5446 = vmatprep.mubr.bf16.mxu0 %v3971_v41  ;;  %v4056_v1 = vpack.c.bf16 %v4029_v10, %v3996_v55 }
 0x366   : > { %v6566_v52 = vpop.f32.mrb[148].mxu1  ;;  %v4055_v3 = vpack.c.bf16 %v4027_v27, %v3994_v26 }
 0x367   : > { %v6672_v19 = vpop.f32.mrb[176].mxu0  ;;  %v6567_v8 = vpop.f32.mrb[149].mxu1 }
 0x368   : > { %v6568_v12 = vadd.f32 %v6567_v8, %v6566_v52  ;;  %v6673_v45 = vpop.f32.mrb[177].mxu0  ;;  %v6569_v53 = vpop.f32.mrb[150].mxu1 }
 0x369   : > { %v6674_v59 = vadd.f32 %v6673_v45, %v6672_v19  ;;  %v6675_v46 = vpop.f32.mrb[178].mxu0  ;;  %v6570_v36 = vpop.f32.mrb[151].mxu1 }
 0x36a   : > { %v6571_v32 = vadd.f32 %v6570_v36, %v6569_v53  ;;  %v6676_v57 = vpop.f32.mrb[179].mxu0  ;;  %v4886_v37 = vadd.f32 %v6568_v12, %v9183_v50  ;;  %v9978_v12 = vld [vmem:[#allocation24_spill] sm:$0xff] }
 0x36b   : > { %v9238_v40 = vadd.f32 %v6674_v59, %v4878_v43  ;;  %v6677_v30 = vadd.f32 %v6676_v57, %v6675_v46  ;;  %7057 = vmatmul.mubr.bf16.vlgmr.msra.gmra.mrb[0].mxu1 %v4053_v63  ;;  %v4031_v53 = vmul.f32 %v9978_v12, %v3999_v14  ;;  %v9979_v43 = vld [vmem:[#allocation25_spill] sm:$0xff] }
 0x36c   : > { %5447 = vmatmul.mubr.bf16.gmra.mrb[28].mxu0 %v3907_v11  ;;  %7060 = vmatprep.mubr.bf16.mxu1 %v4054_v17  ;;  %v4889_v13 = vadd.f32 %v6571_v32, %v9183_v50  ;;  %v4033_v59 = vmul.f32 %v9979_v43, %v4001_v9  ;;  %v3998_v11 = vld [vmem:[#allocation2 + $0x79] sm:$0xff]  ;;  %v4004_v12 = vld [vmem:[#allocation2 + $0xa9] sm:$0xff] }
 0x36d   : > { %v9240_v61 = vadd.f32 %v6677_v30, %v4881_v5  ;;  %v4057_v30 = vpack.c.bf16 %v4031_v53, %v3998_v11 }
 0x36e   : > { %v6572_v44 = vpop.f32.mrb[152].mxu1 }
 0x36f   : > { %v6678_v15 = vpop.f32.mrb[180].mxu0  ;;  %v6573_v41 = vpop.f32.mrb[153].mxu1 }
 0x370   : > { %v6574_v48 = vadd.f32 %v6573_v41, %v6572_v44  ;;  %v6679_v56 = vpop.f32.mrb[181].mxu0  ;;  %v6575_v38 = vpop.f32.mrb[154].mxu1  ;;  %v4058_v44 = vpack.c.bf16 %v4033_v59, %v4000_v47  ;;  %v4007_v59 = vld [vmem:[#allocation2 + $0xc1] sm:$0xff] }
 0x371   : > { %v6680_v4 = vadd.f32 %v6679_v56, %v6678_v15  ;;  %v6681_v35 = vpop.f32.mrb[182].mxu0  ;;  %v6576_v29 = vpop.f32.mrb[155].mxu1  ;;  %v4005_v56 = vld [vmem:[#allocation2 + $0xb1] sm:$0xff] }
 0x372   : > { %v6577_v24 = vadd.f32 %v6576_v29, %v6575_v38  ;;  %v6682_v52 = vpop.f32.mrb[183].mxu0  ;;  %v4894_v32 = vadd.f32 %v6574_v48, %v9183_v50  ;;  %v9980_v48 = vld [vmem:[#allocation30_spill] sm:$0xff] }
 0x373   : > { %v9246_v19 = vadd.f32 %v6680_v4, %v4886_v37  ;;  %v6683_v8 = vadd.f32 %v6682_v52, %v6681_v35  ;;  %7061 = vmatmul.mubr.bf16.gmra.mrb[4].mxu1 %v4055_v3  ;;  %v4035_v26 = vmul.f32 %v9980_v48, %v4003_v18  ;;  %v4037_v4 = vmul.f32 %v9877_v62, %v4005_v56  ;;  %v4008_v56 = vld [vmem:[#allocation2 + $0xc9] sm:$0xff] }
 0x374   : > { %7064 = vmatprep.mubr.bf16.mxu1 %v4056_v1  ;;  %v4897_v10 = vadd.f32 %v6577_v24, %v9183_v50  ;;  %v4002_v1 = vld [vmem:[#allocation2 + $0x99] sm:$0xff] }
 0x375   : > { %v9248_v45 = vadd.f32 %v6683_v8, %v4889_v13  ;;  %v4059_v9 = vpack.c.bf16 %v4035_v26, %v4002_v1  ;;  %v4060_v43 = vpack.c.bf16 %v4037_v4, %v4004_v12  ;;  %v4010_v12 = vld [vmem:[#allocation2 + $0xd9] sm:$0xff] }
 0x376   : > { %v6578_v16 = vpop.f32.mrb[156].mxu1 }
 0x377   : > { %v6684_v46 = vpop.f32.mrb[184].mxu0  ;;  %v6579_v36 = vpop.f32.mrb[157].mxu1 }
 0x378   : > { %v6580_v63 = vadd.f32 %v6579_v36, %v6578_v16  ;;  %v6685_v6 = vpop.f32.mrb[185].mxu0  ;;  %v6581_v57 = vpop.f32.mrb[158].mxu1 }
 0x379   : > { %v6686_v17 = vadd.f32 %v6685_v6, %v6684_v46  ;;  %v6687_v60 = vpop.f32.mrb[186].mxu0  ;;  %v6582_v5 = vpop.f32.mrb[159].mxu1  ;;  %v4009_v6 = vld [vmem:[#allocation2 + $0xd1] sm:$0xff] }
 0x37a   : > { %v6583_v42 = vadd.f32 %v6582_v5, %v6581_v57  ;;  %v6688_v27 = vpop.f32.mrb[187].mxu0  ;;  %v4902_v24 = vadd.f32 %v6580_v63, %v9183_v50  ;;  %v4039_v63 = vmul.f32 %v9881_v7, %v4007_v59  ;;  %v4011_v7 = vld [vmem:[#allocation2 + $0xe1] sm:$0xff] }
 0x37b   : > { %v9254_v15 = vadd.f32 %v6686_v17, %v4894_v32  ;;  %v6689_v41 = vadd.f32 %v6688_v27, %v6687_v60  ;;  %7065 = vmatmul.mubr.bf16.gmra.mrb[8].mxu1 %v4057_v30  ;;  %v4041_v32 = vmul.f32 %v9885_v33, %v4009_v6  ;;  %v4006_v27 = vld [vmem:[#allocation2 + $0xb9] sm:$0xff] }
 0x37c   : > { %7068 = vmatprep.mubr.bf16.mxu1 %v4058_v44  ;;  %v4905_v46 = vadd.f32 %v6583_v42, %v9183_v50 }
 0x37d   : > { %v9256_v38 = vadd.f32 %v6689_v41, %v4897_v10  ;;  %v4061_v41 = vpack.c.bf16 %v4039_v63, %v4006_v27 }
 0x37e   : > { %v6584_v37 = vpop.f32.mrb[160].mxu1 }
 0x37f   : > { %v6690_v35 = vpop.f32.mrb[188].mxu0  ;;  %v6585_v29 = vpop.f32.mrb[161].mxu1 }
 0x380   : > { %v6586_v3 = vadd.f32 %v6585_v29, %v6584_v37  ;;  %v6691_v55 = vpop.f32.mrb[189].mxu0  ;;  %v6587_v52 = vpop.f32.mrb[162].mxu1  ;;  %v4062_v37 = vpack.c.bf16 %v4041_v32, %v4008_v56  ;;  %v4013_v29 = vld [vmem:[#allocation2 + $0xf1] sm:$0xff] }
 0x381   : > { %v6692_v14 = vadd.f32 %v6691_v55, %v6690_v35  ;;  %v6693_v13 = vpop.f32.mrb[190].mxu0  ;;  %v6588_v8 = vpop.f32.mrb[163].mxu1  ;;  %v4045_v1 = vmul.f32 %v9893_v31, %v4013_v29 }
 0x382   : > { %v6589_v53 = vadd.f32 %v6588_v8, %v6587_v52  ;;  %v6694_v16 = vpop.f32.mrb[191].mxu0  ;;  %v4910_v42 = vadd.f32 %v6586_v3, %v9183_v50  ;;  %v4043_v3 = vmul.f32 %v9889_v51, %v4011_v7  ;;  %v4015_v51 = vld [vmem:[#allocation2 + $0x101] sm:$0xff] }
 0x383   : > { %v9262_v62 = vadd.f32 %v6692_v14, %v4902_v24  ;;  %v6695_v36 = vadd.f32 %v6694_v16, %v6693_v13  ;;  %7069 = vmatmul.mubr.bf16.gmra.mrb[12].mxu1 %v4059_v9 }
 0x384   : > { %7072 = vmatprep.mubr.bf16.mxu1 %v4060_v43  ;;  %v4913_v4 = vadd.f32 %v6589_v53, %v9183_v50 }
 0x385   : > { %v9264_v57 = vadd.f32 %v6695_v36, %v4905_v46  ;;  %v4063_v46 = vpack.c.bf16 %v4043_v3, %v4010_v12  ;;  %v4012_v36 = vld [vmem:[#allocation2 + $0xe9] sm:$0xff] }
 0x386   : > { %v6590_v11 = vpop.f32.mrb[164].mxu1 }
 0x387   : > { %v6696_v17 = vpop.f32.mrb[192].mxu0  ;;  %v6591_v60 = vpop.f32.mrb[165].mxu1 }
 0x388   : > { %v6592_v5 = vadd.f32 %v6591_v60, %v6590_v11  ;;  %v6697_v30 = vpop.f32.mrb[193].mxu0  ;;  %v6593_v47 = vpop.f32.mrb[166].mxu1  ;;  %v4064_v11 = vpack.c.bf16 %v4045_v1, %v4012_v36  ;;  %v4018_v1 = vld [vmem:[#allocation2 + $0x119] sm:$0xff] }
 0x389   : > { %v6698_v44 = vadd.f32 %v6697_v30, %v6696_v17  ;;  %v6699_v18 = vpop.f32.mrb[194].mxu0  ;;  %v6594_v10 = vpop.f32.mrb[167].mxu1 }
 0x38a   : > { %v6595_v48 = vadd.f32 %v6594_v10, %v6593_v47  ;;  %v6700_v26 = vpop.f32.mrb[195].mxu0  ;;  %v4918_v53 = vadd.f32 %v6592_v5, %v9183_v50  ;;  %v4047_v5 = vmul.f32 %v9897_v58, %v4015_v51 }
 0x38b   : > { %v9270_v33 = vadd.f32 %v6698_v44, %v4910_v42  ;;  %v6701_v35 = vadd.f32 %v6700_v26, %v6699_v18  ;;  %7073 = vmatmul.mubr.bf16.gmra.mrb[16].mxu1 %v4061_v41  ;;  %v4019_v42 = vld [vmem:[#allocation2 + $0x121] sm:$0xff]  ;;  %v4014_v41 = vld [vmem:[#allocation2 + $0xf9] sm:$0xff] }
 0x38c   : > { %7076 = vmatprep.mubr.bf16.mxu1 %v4062_v37  ;;  %v4921_v32 = vadd.f32 %v6595_v48, %v9183_v50  ;;  %v4065_v7 = vpack.c.bf16 %v4047_v5, %v4014_v41  ;;  %v4051_v29 = vmul.f32 %v9905_v22, %v4019_v42 }
 0x38d   : > { %v9272_v55 = vadd.f32 %v6701_v35, %v4913_v4 }
 0x38e   : > { %v6596_v52 = vpop.f32.mrb[168].mxu1 }
 0x38f   : > { %v6702_v24 = vpop.f32.mrb[196].mxu0  ;;  %v6597_v14 = vpop.f32.mrb[169].mxu1 }
 0x390   : > { %v6598_v13 = vadd.f32 %v6597_v14, %v6596_v52  ;;  %v6703_v8 = vpop.f32.mrb[197].mxu0  ;;  %v6599_v9 = vpop.f32.mrb[170].mxu1 }
 0x391   : > { %v6704_v16 = vadd.f32 %v6703_v8, %v6702_v24  ;;  %v6705_v43 = vpop.f32.mrb[198].mxu0  ;;  %v6600_v59 = vpop.f32.mrb[171].mxu1 }
 0x392   : > { %v6601_v6 = vadd.f32 %v6600_v59, %v6599_v9  ;;  %v6706_v63 = vpop.f32.mrb[199].mxu0  ;;  %v4926_v56 = vadd.f32 %v6598_v13, %v9183_v50  ;;  %v4067_v9 = vpack.c.bf16 %v4051_v29, %v4018_v1 }
 0x393   : > { %v9278_v31 = vadd.f32 %v6704_v16, %v4918_v53  ;;  %v6707_v17 = vadd.f32 %v6706_v63, %v6705_v43  ;;  %7077 = vmatmul.mubr.bf16.gmra.mrb[20].mxu1 %v4063_v46 }
 0x394   : > { %7080 = vmatprep.mubr.bf16.mxu1 %v4064_v11  ;;  %v4929_v58 = vadd.f32 %v6601_v6, %v9183_v50 }
 0x395   : > { %v9280_v60 = vadd.f32 %v6707_v17, %v4921_v32 }
 0x396   : > { %v6602_v30 = vpop.f32.mrb[172].mxu1 }
 0x397   : > { %v6708_v47 = vpop.f32.mrb[200].mxu0  ;;  %v6603_v27 = vpop.f32.mrb[173].mxu1 }
 0x398   : > { %v6604_v44 = vadd.f32 %v6603_v27, %v6602_v30  ;;  %v6709_v18 = vpop.f32.mrb[201].mxu0  ;;  %v6605_v10 = vpop.f32.mrb[174].mxu1 }
 0x399   : > { %v6710_v48 = vadd.f32 %v6709_v18, %v6708_v47  ;;  %v6711_v26 = vpop.f32.mrb[202].mxu0  ;;  %v6606_v37 = vpop.f32.mrb[175].mxu1 }
 0x39a   : > { %v6607_v4 = vadd.f32 %v6606_v37, %v6605_v10  ;;  %v6712_v35 = vpop.f32.mrb[203].mxu0  ;;  %v4934_v16 = vadd.f32 %v6604_v44, %v9183_v50 }
 0x39b   : > { %v9286_v3 = vadd.f32 %v6710_v48, %v4926_v56  ;;  %v6713_v52 = vadd.f32 %v6712_v35, %v6711_v26  ;;  %7081 = vmatmul.mubr.bf16.gmra.mrb[24].mxu1 %v4065_v7 }
 0x39c   : > { %7084 = vmatprep.mubr.bf16.mxu1 %v4066_v28  ;;  %v4937_v25 = vadd.f32 %v6607_v4, %v9183_v50 }
 0x39d   : > { %v9291_v24 = vadd.f32 %v6713_v52, %v4929_v58 }
 0x39e   : > { %v6608_v14 = vpop.f32.mrb[176].mxu1 }
 0x39f   : > { %v6714_v13 = vpop.f32.mrb[204].mxu0  ;;  %v6609_v8 = vpop.f32.mrb[177].mxu1 }
 0x3a0   : > { %v6610_v12 = vadd.f32 %v6609_v8, %v6608_v14  ;;  %v6715_v53 = vpop.f32.mrb[205].mxu0  ;;  %v6611_v22 = vpop.f32.mrb[178].mxu1 }
 0x3a1   : > { %v6716_v43 = vadd.f32 %v6715_v53, %v6714_v13  ;;  %v6717_v59 = vpop.f32.mrb[206].mxu0  ;;  %v6612_v46 = vpop.f32.mrb[179].mxu1 }
 0x3a2   : > { %v6613_v36 = vadd.f32 %v6612_v46, %v6611_v22  ;;  %v6718_v6 = vpop.f32.mrb[207].mxu0  ;;  %v4942_v47 = vadd.f32 %v6610_v12, %v9183_v50 }
 0x3a3   : > { %v9295_v23 = vadd.f32 %v6716_v43, %v4934_v16  ;;  %v6719_v28 = vadd.f32 %v6718_v6, %v6717_v59  ;;  %7085 = vmatmul.mubr.bf16.gmra.mrb[28].mxu1 %v4067_v9 }
 0x3a4   : > { %v4945_v41 = vadd.f32 %v6613_v36, %v9183_v50 }
 0x3a5   : > { %v9297_v63 = vadd.f32 %v6719_v28, %v4937_v25 }
 0x3a6   : > { %v6614_v11 = vpop.f32.mrb[180].mxu1 }
 0x3a7   : > { %v6720_v51 = vpop.f32.mrb[208].mxu0  ;;  %v6615_v32 = vpop.f32.mrb[181].mxu1 }
 0x3a8   : > { %v6616_v17 = vadd.f32 %v6615_v32, %v6614_v11  ;;  %v6721_v5 = vpop.f32.mrb[209].mxu0  ;;  %v6617_v30 = vpop.f32.mrb[182].mxu1 }
 0x3a9   : > { %v6722_v27 = vadd.f32 %v6721_v5, %v6720_v51  ;;  %v6723_v42 = vpop.f32.mrb[210].mxu0  ;;  %v6618_v44 = vpop.f32.mrb[183].mxu1 }
 0x3aa   : > { %v6619_v18 = vadd.f32 %v6618_v44, %v6617_v30  ;;  %v6724_v10 = vpop.f32.mrb[211].mxu0  ;;  %v4950_v52 = vadd.f32 %v6616_v17, %v9183_v50 }
 0x3ab   : > { %v9301_v56 = vadd.f32 %v6722_v27, %v4942_v47  ;;  %v6725_v48 = vadd.f32 %v6724_v10, %v6723_v42 }
 0x3ac   : > { %v4953_v12 = vadd.f32 %v6619_v18, %v9183_v50 }
 0x3ad   : > { %v9303_v26 = vadd.f32 %v6725_v48, %v4945_v41 }
 0x3ae   : > { %v6620_v37 = vpop.f32.mrb[184].mxu1 }
 0x3af   : > { %v6726_v7 = vpop.f32.mrb[212].mxu0  ;;  %v6621_v4 = vpop.f32.mrb[185].mxu1 }
 0x3b0   : > { %v6622_v35 = vadd.f32 %v6621_v4, %v6620_v37  ;;  %v6727_v29 = vpop.f32.mrb[213].mxu0  ;;  %v6623_v58 = vpop.f32.mrb[186].mxu1 }
 0x3b1   : > { %v6728_v1 = vadd.f32 %v6727_v29, %v6726_v7  ;;  %v6729_v14 = vpop.f32.mrb[214].mxu0  ;;  %v6624_v13 = vpop.f32.mrb[187].mxu1 }
 0x3b2   : > { %v6625_v8 = vadd.f32 %v6624_v13, %v6623_v58  ;;  %v6730_v9 = vpop.f32.mrb[215].mxu0  ;;  %v4958_v28 = vadd.f32 %v6622_v35, %v9183_v50 }
 0x3b3   : > { %v9307_v53 = vadd.f32 %v6728_v1, %v4950_v52  ;;  %v6731_v22 = vadd.f32 %v6730_v9, %v6729_v14 }
 0x3b4   : > { %v4961_v30 = vadd.f32 %v6625_v8, %v9183_v50 }
 0x3b5   : > { %v9309_v16 = vadd.f32 %v6731_v22, %v4953_v12 }
 0x3b6   : > { %v6626_v43 = vpop.f32.mrb[188].mxu1 }
 0x3b7   : > { %v6732_v59 = vpop.f32.mrb[216].mxu0  ;;  %v6627_v46 = vpop.f32.mrb[189].mxu1 }
 0x3b8   : > { %v6628_v36 = vadd.f32 %v6627_v46, %v6626_v43  ;;  %v6733_v6 = vpop.f32.mrb[217].mxu0  ;;  %v6629_v25 = vpop.f32.mrb[190].mxu1 }
 0x3b9   : > { %v6734_v11 = vadd.f32 %v6733_v6, %v6732_v59  ;;  %v6735_v51 = vpop.f32.mrb[218].mxu0  ;;  %v6630_v32 = vpop.f32.mrb[191].mxu1 }
 0x3ba   : > { %v6631_v17 = vadd.f32 %v6630_v32, %v6629_v25  ;;  %v6736_v5 = vpop.f32.mrb[219].mxu0  ;;  %v4966_v7 = vadd.f32 %v6628_v36, %v9183_v50 }
 0x3bb   : > { %v9313_v47 = vadd.f32 %v6734_v11, %v4958_v28  ;;  %v6737_v27 = vadd.f32 %v6736_v5, %v6735_v51 }
 0x3bc   : > { %v4969_v14 = vadd.f32 %v6631_v17, %v9183_v50 }
 0x3bd   : > { %v9315_v42 = vadd.f32 %v6737_v27, %v4961_v30 }
 0x3be   : > { %v6760_v44 = vpop.f32.mrb[192].mxu1 }
 0x3bf   : > { %v6738_v18 = vpop.f32.mrb[220].mxu0  ;;  %v6761_v10 = vpop.f32.mrb[193].mxu1 }
 0x3c0   : > { %v6739_v41 = vpop.f32.mrb[221].mxu0  ;;  %v6762_v48 = vadd.f32 %v6761_v10, %v6760_v44  ;;  %v6763_v37 = vpop.f32.mrb[194].mxu1 }
 0x3c1   : > { %v6740_v4 = vadd.f32 %v6739_v41, %v6738_v18  ;;  %v6741_v35 = vpop.f32.mrb[222].mxu0  ;;  %v6764_v29 = vpop.f32.mrb[195].mxu1 }
 0x3c2   : > { %v5168_v58 = vadd.f32 %v6762_v48, %v9189_v2  ;;  %v6742_v52 = vpop.f32.mrb[223].mxu0  ;;  %v6765_v1 = vadd.f32 %v6764_v29, %v6763_v37 }
 0x3c3   : > { %v9320_v13 = vadd.f32 %v6740_v4, %v4966_v7  ;;  %v6743_v8 = vadd.f32 %v6742_v52, %v6741_v35 }
 0x3c4   : > { %v5171_v9 = vadd.f32 %v6765_v1, %v9197_v0 }
 0x3c5   : > { %v9323_v12 = vadd.f32 %v6743_v8, %v4969_v14 }
 0x3c6   : > { %v6766_v22 = vpop.f32.mrb[196].mxu1 }
 0x3c7   : > { %v6872_v43 = vpop.f32.mrb[224].mxu0  ;;  %v6767_v59 = vpop.f32.mrb[197].mxu1 }
 0x3c8   : > { %v6768_v46 = vadd.f32 %v6767_v59, %v6766_v22  ;;  %v6873_v36 = vpop.f32.mrb[225].mxu0  ;;  %v6769_v6 = vpop.f32.mrb[198].mxu1 }
 0x3c9   : > { %v6874_v25 = vadd.f32 %v6873_v36, %v6872_v43  ;;  %v6875_v28 = vpop.f32.mrb[226].mxu0  ;;  %v6770_v2 = vpop.f32.mrb[199].mxu1 }
 0x3ca   : > { %v5176_v11 = vadd.f32 %v6768_v46, %v9201_v34  ;;  %v6771_v51 = vadd.f32 %v6770_v2, %v6769_v6  ;;  %v6876_v50 = vpop.f32.mrb[227].mxu0 }
 0x3cb   : > { %v6877_v32 = vadd.f32 %v6876_v50, %v6875_v28  ;;  %v9326_v17 = vadd.f32 %v6874_v25, %v5168_v58 }
 0x3cc   : > { %v5179_v0 = vadd.f32 %v6771_v51, %v9209_v49 }
 0x3cd   : > { %v9329_v5 = vadd.f32 %v6877_v32, %v5171_v9 }
 0x3ce   : > { %v6772_v30 = vpop.f32.mrb[200].mxu1 }
 0x3cf   : > { %v6878_v27 = vpop.f32.mrb[228].mxu0  ;;  %v6773_v44 = vpop.f32.mrb[201].mxu1 }
 0x3d0   : > { %v6774_v18 = vadd.f32 %v6773_v44, %v6772_v30  ;;  %v6879_v10 = vpop.f32.mrb[229].mxu0  ;;  %v6775_v41 = vpop.f32.mrb[202].mxu1 }
 0x3d1   : > { %v6880_v48 = vadd.f32 %v6879_v10, %v6878_v27  ;;  %v6881_v37 = vpop.f32.mrb[230].mxu0  ;;  %v6776_v7 = vpop.f32.mrb[203].mxu1 }
 0x3d2   : > { %v5184_v34 = vadd.f32 %v6774_v18, %v9216_v20  ;;  %v6777_v4 = vadd.f32 %v6776_v7, %v6775_v41  ;;  %v6882_v35 = vpop.f32.mrb[231].mxu0 }
 0x3d3   : > { %v6883_v29 = vadd.f32 %v6882_v35, %v6881_v37  ;;  %v9332_v58 = vadd.f32 %v6880_v48, %v5176_v11 }
 0x3d4   : > { %v5187_v49 = vadd.f32 %v6777_v4, %v9221_v39 }
 0x3d5   : > { %v9335_v52 = vadd.f32 %v6883_v29, %v5179_v0 }
 0x3d6   : > { %v6778_v1 = vpop.f32.mrb[204].mxu1 }
 0x3d7   : > { %v6884_v14 = vpop.f32.mrb[232].mxu0  ;;  %v6779_v8 = vpop.f32.mrb[205].mxu1 }
 0x3d8   : > { %v6780_v9 = vadd.f32 %v6779_v8, %v6778_v1  ;;  %v6885_v22 = vpop.f32.mrb[233].mxu0  ;;  %v6781_v43 = vpop.f32.mrb[206].mxu1 }
 0x3d9   : > { %v6886_v59 = vadd.f32 %v6885_v22, %v6884_v14  ;;  %v6887_v46 = vpop.f32.mrb[234].mxu0  ;;  %v6782_v36 = vpop.f32.mrb[207].mxu1 }
 0x3da   : > { %v5192_v20 = vadd.f32 %v6780_v9, %v9226_v54  ;;  %v6783_v6 = vadd.f32 %v6782_v36, %v6781_v43  ;;  %v6888_v25 = vpop.f32.mrb[235].mxu0 }
 0x3db   : > { %v6889_v28 = vadd.f32 %v6888_v25, %v6887_v46  ;;  %v9338_v2 = vadd.f32 %v6886_v59, %v5184_v34 }
 0x3dc   : > { %v5195_v39 = vadd.f32 %v6783_v6, %v9231_v21 }
 0x3dd   : > { %v9341_v11 = vadd.f32 %v6889_v28, %v5187_v49 }
 0x3de   : > { %v6784_v51 = vpop.f32.mrb[208].mxu1 }
 0x3df   : > { %v6890_v50 = vpop.f32.mrb[236].mxu0  ;;  %v6785_v32 = vpop.f32.mrb[209].mxu1 }
 0x3e0   : > { %v6786_v0 = vadd.f32 %v6785_v32, %v6784_v51  ;;  %v6891_v30 = vpop.f32.mrb[237].mxu0  ;;  %v6787_v27 = vpop.f32.mrb[210].mxu1 }
 0x3e1   : > { %v6892_v44 = vadd.f32 %v6891_v30, %v6890_v50  ;;  %v6893_v18 = vpop.f32.mrb[238].mxu0  ;;  %v6788_v10 = vpop.f32.mrb[211].mxu1 }
 0x3e2   : > { %v5200_v54 = vadd.f32 %v6786_v0, %v9238_v40  ;;  %v6789_v41 = vadd.f32 %v6788_v10, %v6787_v27  ;;  %v6894_v48 = vpop.f32.mrb[239].mxu0 }
 0x3e3   : > { %v6895_v37 = vadd.f32 %v6894_v48, %v6893_v18  ;;  %v9344_v7 = vadd.f32 %v6892_v44, %v5192_v20 }
 0x3e4   : > { %v5203_v21 = vadd.f32 %v6789_v41, %v9240_v61 }
 0x3e5   : > { %v9347_v34 = vadd.f32 %v6895_v37, %v5195_v39 }
 0x3e6   : > { %v6790_v4 = vpop.f32.mrb[212].mxu1 }
 0x3e7   : > { %v6896_v35 = vpop.f32.mrb[240].mxu0  ;;  %v6791_v29 = vpop.f32.mrb[213].mxu1 }
 0x3e8   : > { %v6792_v49 = vadd.f32 %v6791_v29, %v6790_v4  ;;  %v6897_v1 = vpop.f32.mrb[241].mxu0  ;;  %v6793_v14 = vpop.f32.mrb[214].mxu1 }
 0x3e9   : > { %v6898_v8 = vadd.f32 %v6897_v1, %v6896_v35  ;;  %v6899_v9 = vpop.f32.mrb[242].mxu0  ;;  %v6794_v22 = vpop.f32.mrb[215].mxu1 }
 0x3ea   : > { %v5208_v40 = vadd.f32 %v6792_v49, %v9246_v19  ;;  %v6795_v43 = vadd.f32 %v6794_v22, %v6793_v14  ;;  %v6900_v59 = vpop.f32.mrb[243].mxu0 }
 0x3eb   : > { %v6901_v46 = vadd.f32 %v6900_v59, %v6899_v9  ;;  %v9350_v36 = vadd.f32 %v6898_v8, %v5200_v54 }
 0x3ec   : > { %v5211_v61 = vadd.f32 %v6795_v43, %v9248_v45 }
 0x3ed   : > { %v9353_v20 = vadd.f32 %v6901_v46, %v5203_v21 }
 0x3ee   : > { %v6796_v6 = vpop.f32.mrb[216].mxu1 }
 0x3ef   : > { %v6902_v25 = vpop.f32.mrb[244].mxu0  ;;  %v6797_v28 = vpop.f32.mrb[217].mxu1 }
 0x3f0   : > { %v6798_v39 = vadd.f32 %v6797_v28, %v6796_v6  ;;  %v6903_v51 = vpop.f32.mrb[245].mxu0  ;;  %v6799_v50 = vpop.f32.mrb[218].mxu1 }
 0x3f1   : > { %v6904_v32 = vadd.f32 %v6903_v51, %v6902_v25  ;;  %v6905_v0 = vpop.f32.mrb[246].mxu0  ;;  %v6800_v30 = vpop.f32.mrb[219].mxu1 }
 0x3f2   : > { %v5216_v19 = vadd.f32 %v6798_v39, %v9254_v15  ;;  %v6801_v27 = vadd.f32 %v6800_v30, %v6799_v50  ;;  %v6906_v44 = vpop.f32.mrb[247].mxu0 }
 0x3f3   : > { %v6907_v18 = vadd.f32 %v6906_v44, %v6905_v0  ;;  %v9356_v10 = vadd.f32 %v6904_v32, %v5208_v40 }
 0x3f4   : > { %v5219_v45 = vadd.f32 %v6801_v27, %v9256_v38 }
 0x3f5   : > { %v9359_v54 = vadd.f32 %v6907_v18, %v5211_v61 }
 0x3f6   : > { %v6802_v41 = vpop.f32.mrb[220].mxu1 }
 0x3f7   : > { %v6908_v48 = vpop.f32.mrb[248].mxu0  ;;  %v6803_v37 = vpop.f32.mrb[221].mxu1 }
 0x3f8   : > { %v6804_v21 = vadd.f32 %v6803_v37, %v6802_v41  ;;  %v6909_v4 = vpop.f32.mrb[249].mxu0  ;;  %v6805_v35 = vpop.f32.mrb[222].mxu1 }
 0x3f9   : > { %v6910_v29 = vadd.f32 %v6909_v4, %v6908_v48  ;;  %v6911_v49 = vpop.f32.mrb[250].mxu0  ;;  %v6806_v1 = vpop.f32.mrb[223].mxu1 }
 0x3fa   : > { %v5224_v15 = vadd.f32 %v6804_v21, %v9262_v62  ;;  %v6807_v14 = vadd.f32 %v6806_v1, %v6805_v35  ;;  %v6912_v8 = vpop.f32.mrb[251].mxu0 }
 0x3fb   : > { %v6913_v9 = vadd.f32 %v6912_v8, %v6911_v49  ;;  %v9362_v22 = vadd.f32 %v6910_v29, %v5216_v19 }
 0x3fc   : > { %v5227_v38 = vadd.f32 %v6807_v14, %v9264_v57 }
 0x3fd   : > { %v9365_v40 = vadd.f32 %v6913_v9, %v5219_v45 }
 0x3fe   : > { %v6808_v43 = vpop.f32.mrb[224].mxu1 }
 0x3ff   : > { %v6914_v59 = vpop.f32.mrb[252].mxu0  ;;  %v6809_v46 = vpop.f32.mrb[225].mxu1 }
 0x400   : > { %v6810_v61 = vadd.f32 %v6809_v46, %v6808_v43  ;;  %v6915_v6 = vpop.f32.mrb[253].mxu0  ;;  %v6811_v25 = vpop.f32.mrb[226].mxu1 }
 0x401   : > { %v6916_v28 = vadd.f32 %v6915_v6, %v6914_v59  ;;  %v6917_v39 = vpop.f32.mrb[254].mxu0  ;;  %v6812_v51 = vpop.f32.mrb[227].mxu1 }
 0x402   : > { %v5232_v62 = vadd.f32 %v6810_v61, %v9270_v33  ;;  %v6813_v50 = vadd.f32 %v6812_v51, %v6811_v25  ;;  %v6918_v32 = vpop.f32.mrb[255].mxu0 }
 0x403   : > { %v6919_v0 = vadd.f32 %v6918_v32, %v6917_v39  ;;  %v9368_v30 = vadd.f32 %v6916_v28, %v5224_v15 }
 0x404   : > { %v5235_v57 = vadd.f32 %v6813_v50, %v9272_v55 }
 0x405   : > { %v9371_v19 = vadd.f32 %v6919_v0, %v5227_v38 }
 0x406   : > { %v6814_v27 = vpop.f32.mrb[228].mxu1 }
 0x407   : > { %v6920_v44 = vpop.f32.mrb[0].mxu0  ;;  %v6815_v18 = vpop.f32.mrb[229].mxu1 }
 0x408   : > { %v6816_v45 = vadd.f32 %v6815_v18, %v6814_v27  ;;  %v6921_v41 = vpop.f32.mrb[1].mxu0  ;;  %v6817_v48 = vpop.f32.mrb[230].mxu1 }
 0x409   : > { %v6922_v37 = vadd.f32 %v6921_v41, %v6920_v44  ;;  %v6923_v21 = vpop.f32.mrb[2].mxu0  ;;  %v6818_v4 = vpop.f32.mrb[231].mxu1 }
 0x40a   : > { %v5240_v33 = vadd.f32 %v6816_v45, %v9278_v31  ;;  %v6819_v35 = vadd.f32 %v6818_v4, %v6817_v48  ;;  %v6924_v29 = vpop.f32.mrb[3].mxu0 }
 0x40b   : > { %v6925_v49 = vadd.f32 %v6924_v29, %v6923_v21  ;;  %v9374_v1 = vadd.f32 %v6922_v37, %v5232_v62 }
 0x40c   : > { %v5243_v55 = vadd.f32 %v6819_v35, %v9280_v60 }
 0x40d   : > { %v9377_v15 = vadd.f32 %v6925_v49, %v5235_v57 }
 0x40e   : > { %v6820_v14 = vpop.f32.mrb[232].mxu1 }
 0x40f   : > { %v6926_v8 = vpop.f32.mrb[4].mxu0  ;;  %v6821_v9 = vpop.f32.mrb[233].mxu1 }
 0x410   : > { %v6822_v38 = vadd.f32 %v6821_v9, %v6820_v14  ;;  %v6927_v43 = vpop.f32.mrb[5].mxu0  ;;  %v6823_v59 = vpop.f32.mrb[234].mxu1 }
 0x411   : > { %v6928_v46 = vadd.f32 %v6927_v43, %v6926_v8  ;;  %v6929_v61 = vpop.f32.mrb[6].mxu0  ;;  %v6824_v6 = vpop.f32.mrb[235].mxu1 }
 0x412   : > { %v5248_v31 = vadd.f32 %v6822_v38, %v9286_v3  ;;  %v6825_v25 = vadd.f32 %v6824_v6, %v6823_v59  ;;  %v6930_v28 = vpop.f32.mrb[7].mxu0 }
 0x413   : > { %v6931_v39 = vadd.f32 %v6930_v28, %v6929_v61  ;;  %v9380_v51 = vadd.f32 %v6928_v46, %v5240_v33 }
 0x414   : > { %v5251_v60 = vadd.f32 %v6825_v25, %v9291_v24 }
 0x415   : > { %v9383_v62 = vadd.f32 %v6931_v39, %v5243_v55 }
 0x416   : > { %v6826_v50 = vpop.f32.mrb[236].mxu1 }
 0x417   : > { %v6932_v32 = vpop.f32.mrb[8].mxu0  ;;  %v6827_v0 = vpop.f32.mrb[237].mxu1 }
 0x418   : > { %v6828_v57 = vadd.f32 %v6827_v0, %v6826_v50  ;;  %v6933_v27 = vpop.f32.mrb[9].mxu0  ;;  %v6829_v44 = vpop.f32.mrb[238].mxu1 }
 0x419   : > { %v6934_v18 = vadd.f32 %v6933_v27, %v6932_v32  ;;  %v6935_v45 = vpop.f32.mrb[10].mxu0  ;;  %v6830_v41 = vpop.f32.mrb[239].mxu1 }
 0x41a   : > { %v5256_v3 = vadd.f32 %v6828_v57, %v9295_v23  ;;  %v6831_v48 = vadd.f32 %v6830_v41, %v6829_v44  ;;  %v6936_v37 = vpop.f32.mrb[11].mxu0 }
 0x41b   : > { %v6937_v21 = vadd.f32 %v6936_v37, %v6935_v45  ;;  %v9386_v4 = vadd.f32 %v6934_v18, %v5248_v31 }
 0x41c   : > { %v5259_v24 = vadd.f32 %v6831_v48, %v9297_v63 }
 0x41d   : > { %v9389_v33 = vadd.f32 %v6937_v21, %v5251_v60 }
 0x41e   : > { %v6832_v35 = vpop.f32.mrb[240].mxu1 }
 0x41f   : > { %v6938_v29 = vpop.f32.mrb[12].mxu0  ;;  %v6833_v49 = vpop.f32.mrb[241].mxu1 }
 0x420   : > { %v6834_v55 = vadd.f32 %v6833_v49, %v6832_v35  ;;  %v6939_v14 = vpop.f32.mrb[13].mxu0  ;;  %v6835_v8 = vpop.f32.mrb[242].mxu1 }
 0x421   : > { %v6940_v9 = vadd.f32 %v6939_v14, %v6938_v29  ;;  %v6941_v38 = vpop.f32.mrb[14].mxu0  ;;  %v6836_v43 = vpop.f32.mrb[243].mxu1 }
 0x422   : > { %v5264_v23 = vadd.f32 %v6834_v55, %v9301_v56  ;;  %v6837_v59 = vadd.f32 %v6836_v43, %v6835_v8  ;;  %v6942_v46 = vpop.f32.mrb[15].mxu0 }
 0x423   : > { %v6943_v61 = vadd.f32 %v6942_v46, %v6941_v38  ;;  %v9392_v6 = vadd.f32 %v6940_v9, %v5256_v3 }
 0x424   : > { %v5267_v63 = vadd.f32 %v6837_v59, %v9303_v26 }
 0x425   : > { %v9395_v31 = vadd.f32 %v6943_v61, %v5259_v24 }
 0x426   : > { %v6838_v25 = vpop.f32.mrb[244].mxu1 }
 0x427   : > { %v6944_v28 = vpop.f32.mrb[16].mxu0  ;;  %v6839_v39 = vpop.f32.mrb[245].mxu1 }
 0x428   : > { %v6840_v60 = vadd.f32 %v6839_v39, %v6838_v25  ;;  %v6945_v50 = vpop.f32.mrb[17].mxu0  ;;  %v6841_v32 = vpop.f32.mrb[246].mxu1 }
 0x429   : > { %v6946_v0 = vadd.f32 %v6945_v50, %v6944_v28  ;;  %v6947_v57 = vpop.f32.mrb[18].mxu0  ;;  %v6842_v27 = vpop.f32.mrb[247].mxu1 }
 0x42a   : > { %v5272_v56 = vadd.f32 %v6840_v60, %v9307_v53  ;;  %v6843_v44 = vadd.f32 %v6842_v27, %v6841_v32  ;;  %v6948_v18 = vpop.f32.mrb[19].mxu0 }
 0x42b   : > { %v6949_v45 = vadd.f32 %v6948_v18, %v6947_v57  ;;  %v9398_v41 = vadd.f32 %v6946_v0, %v5264_v23  ;;  %v5618_v18 = vld [vmem:[%s7693_s6 + $0x10] sm:$0xff] }
 0x42c   : > { %v5275_v26 = vadd.f32 %v6843_v44, %v9309_v16 }
 0x42d   : > { %v9401_v3 = vadd.f32 %v6949_v45, %v5267_v63 }
 0x42e   : > { %v6844_v48 = vpop.f32.mrb[248].mxu1 }
 0x42f   : > { %v6950_v37 = vpop.f32.mrb[20].mxu0  ;;  %v6845_v21 = vpop.f32.mrb[249].mxu1 }
 0x430   : > { %v6846_v24 = vadd.f32 %v6845_v21, %v6844_v48  ;;  %v6951_v35 = vpop.f32.mrb[21].mxu0  ;;  %v6847_v29 = vpop.f32.mrb[250].mxu1 }
 0x431   : > { %v6952_v49 = vadd.f32 %v6951_v35, %v6950_v37  ;;  %v6953_v55 = vpop.f32.mrb[22].mxu0  ;;  %v6848_v14 = vpop.f32.mrb[251].mxu1  ;;  %v5616_v37 = vld [vmem:[%s7693_s6] sm:$0xff]  ;;  %v5619_v35 = vld [vmem:[%s7693_s6 + $0x18] sm:$0xff] }
 0x432   : > { %v5280_v53 = vadd.f32 %v6846_v24, %v9313_v47  ;;  %v6849_v8 = vadd.f32 %v6848_v14, %v6847_v29  ;;  %v6954_v9 = vpop.f32.mrb[23].mxu0 }
 0x433   : > { %v6955_v38 = vadd.f32 %v6954_v9, %v6953_v55  ;;  %v9404_v43 = vadd.f32 %v6952_v49, %v5272_v56 }
 0x434   : > { %v5283_v16 = vadd.f32 %v6849_v8, %v9315_v42 }
 0x435   : > { %v9407_v23 = vadd.f32 %v6955_v38, %v5275_v26 }
 0x436   : > { %v6850_v59 = vpop.f32.mrb[252].mxu1 }
 0x437   : > { %v6956_v46 = vpop.f32.mrb[24].mxu0  ;;  %v6851_v61 = vpop.f32.mrb[253].mxu1 }
 0x438   : > { %v6852_v63 = vadd.f32 %v6851_v61, %v6850_v59  ;;  %v6957_v25 = vpop.f32.mrb[25].mxu0  ;;  %v6853_v28 = vpop.f32.mrb[254].mxu1 }
 0x439   : > { %v6958_v39 = vadd.f32 %v6957_v25, %v6956_v46  ;;  %v6959_v60 = vpop.f32.mrb[26].mxu0  ;;  %v6854_v47 = vpop.f32.mrb[255].mxu1 }
 0x43a   : > { %v5288_v50 = vadd.f32 %v6852_v63, %v9320_v13  ;;  %v6855_v32 = vadd.f32 %v6854_v47, %v6853_v28  ;;  %v6960_v0 = vpop.f32.mrb[27].mxu0  ;;  %v5622_v28 = vld [vmem:[%s7693_s6 + $0x30] sm:$0xff]  ;;  %v5620_v47 = vld [vmem:[%s7693_s6 + $0x20] sm:$0xff] }
 0x43b   : > { %v6961_v57 = vadd.f32 %v6960_v0, %v6959_v60  ;;  %v9410_v42 = vadd.f32 %v6958_v39, %v5280_v53  ;;  %v5617_v53 = vld [vmem:[%s7693_s6 + $0x8] sm:$0xff]  ;;  %v5623_v0 = vld [vmem:[%s7693_s6 + $0x38] sm:$0xff] }
 0x43c   : > { %v5291_v27 = vadd.f32 %v6855_v32, %v9323_v12 }
 0x43d   : > { %v9413_v56 = vadd.f32 %v6961_v57, %v5283_v16 }
 0x43e   : > { %v7058_v44 = vpop.f32.mrb[0].mxu1 }
 0x43f   : > { %v6962_v45 = vpop.f32.mrb[28].mxu0  ;;  %v5498_v26 = vadd.f32 %v7058_v44, %v9332_v58  ;;  %v5489_v48 = vpop.f32.mrb[1].mxu1 }
 0x440   : > { %v6963_v21 = vpop.f32.mrb[29].mxu0  ;;  %v5490_v13 = vadd.f32 %v5489_v48, %v9326_v17  ;;  %v7059_v24 = vpop.f32.mrb[2].mxu1 }
 0x441   : > { %v5650_v29 = vadd.f32 %v5618_v18, %v5498_v26  ;;  %v6964_v49 = vadd.f32 %v6963_v21, %v6962_v45  ;;  %v6965_v55 = vpop.f32.mrb[30].mxu0  ;;  %v5501_v12 = vadd.f32 %v7059_v24, %v9335_v52  ;;  %v5492_v14 = vpop.f32.mrb[3].mxu1  ;;  %v5621_v18 = vld [vmem:[%s7693_s6 + $0x28] sm:$0xff] }
 0x442   : > { %v5648_v8 = vadd.f32 %v5616_v37, %v5490_v13  ;;  %v6966_v9 = vpop.f32.mrb[31].mxu0  ;;  %v5493_v58 = vadd.f32 %v5492_v14, %v9329_v5 }
 0x443   : > { %v5682_v38 = vmax.f32 %v5650_v29, 0.0  ;;  %v5651_v16 = vadd.f32 %v5619_v35, %v5501_v12  ;;  %v6967_v59 = vadd.f32 %v6966_v9, %v6965_v55  ;;  %v9423_v17 = vadd.f32 %v6964_v49, %v5288_v50  ;;  %v5626_v35 = vld [vmem:[%s7693_s6 + $0x50] sm:$0xff]  ;;  %v5624_v49 = vld [vmem:[%s7693_s6 + $0x40] sm:$0xff]  ;;  %v5627_v12 = vld [vmem:[%s7693_s6 + $0x58] sm:$0xff] }
 0x444   : > { %v5680_v46 = vmax.f32 %v5648_v8, 0.0  ;;  %v5649_v61 = vadd.f32 %v5617_v53, %v5493_v58  ;;  %v5625_v9 = vld [vmem:[%s7693_s6 + $0x48] sm:$0xff] }
 0x445   : > { %5714 = vst [vmem:[%s9427_s11 + $0x10] sm:$0xff] %v5682_v38  ;;  %v5683_v52 = vmax.f32 %v5651_v16, 0.0  ;;  %v9430_v63 = vadd.f32 %v6967_v59, %v5291_v27 }
 0x446   : > { %5712 = vst [vmem:[%s9427_s11] sm:$0xff] %v5680_v46  ;;  %v5681_v5 = vmax.f32 %v5649_v61, 0.0  ;;  %v7062_v25 = vpop.f32.mrb[4].mxu1 }
 0x447   : > { %5715 = vst [vmem:[%s9427_s11 + $0x18] sm:$0xff] %v5683_v52  ;;  %v5514_v39 = vadd.f32 %v7062_v25, %v9344_v7  ;;  %v5505_v60 = vpop.f32.mrb[5].mxu1 }
 0x448   : > { %5713 = vst [vmem:[%s9427_s11 + $0x8] sm:$0xff] %v5681_v5  ;;  %v5506_v50 = vadd.f32 %v5505_v60, %v9338_v2  ;;  %v7063_v32 = vpop.f32.mrb[6].mxu1  ;;  %v5630_v5 = vld [vmem:[%s7693_s6 + $0x70] sm:$0xff]  ;;  %v5631_v60 = vld [vmem:[%s7693_s6 + $0x78] sm:$0xff] }
 0x449   : > { %v5654_v57 = vadd.f32 %v5622_v28, %v5514_v39  ;;  %v5517_v27 = vadd.f32 %v7063_v32, %v9347_v34  ;;  %v5508_v44 = vpop.f32.mrb[7].mxu1  ;;  %v5628_v28 = vld [vmem:[%s7693_s6 + $0x60] sm:$0xff] }
 0x44a   : > { %v5652_v45 = vadd.f32 %v5620_v47, %v5506_v50  ;;  %v5509_v7 = vadd.f32 %v5508_v44, %v9341_v11 }
 0x44b   : > { %v5686_v26 = vmax.f32 %v5654_v57, 0.0  ;;  %v5655_v48 = vadd.f32 %v5623_v0, %v5517_v27  ;;  %v5629_v0 = vld [vmem:[%s7693_s6 + $0x68] sm:$0xff] }
 0x44c   : > { %v5684_v37 = vmax.f32 %v5652_v45, 0.0  ;;  %v5653_v21 = vadd.f32 %v5621_v18, %v5509_v7 }
 0x44d   : > { %5718 = vst [vmem:[%s9427_s11 + $0x30] sm:$0xff] %v5686_v26  ;;  %v5687_v2 = vmax.f32 %v5655_v48, 0.0  ;;  %v5634_v48 = vld [vmem:[%s7693_s6 + $0x90] sm:$0xff] }
 0x44e   : > { %5716 = vst [vmem:[%s9427_s11 + $0x20] sm:$0xff] %v5684_v37  ;;  %v5685_v13 = vmax.f32 %v5653_v21, 0.0  ;;  %v7066_v24 = vpop.f32.mrb[8].mxu1  ;;  %v5632_v21 = vld [vmem:[%s7693_s6 + $0x80] sm:$0xff] }
 0x44f   : > { %5719 = vst [vmem:[%s9427_s11 + $0x38] sm:$0xff] %v5687_v2  ;;  %v5530_v34 = vadd.f32 %v7066_v24, %v9356_v10  ;;  %v5521_v29 = vpop.f32.mrb[9].mxu1 }
 0x450   : > { %5717 = vst [vmem:[%s9427_s11 + $0x28] sm:$0xff] %v5685_v13  ;;  %v5522_v11 = vadd.f32 %v5521_v29, %v9350_v36  ;;  %v7067_v55 = vpop.f32.mrb[10].mxu1  ;;  %v5635_v13 = vld [vmem:[%s7693_s6 + $0x98] sm:$0xff]  ;;  %v5633_v29 = vld [vmem:[%s7693_s6 + $0x88] sm:$0xff] }
 0x451   : > { %v5658_v14 = vadd.f32 %v5626_v35, %v5530_v34  ;;  %v5533_v53 = vadd.f32 %v7067_v55, %v9359_v54  ;;  %v5524_v8 = vpop.f32.mrb[11].mxu1 }
 0x452   : > { %v5656_v58 = vadd.f32 %v5624_v49, %v5522_v11  ;;  %v5525_v10 = vadd.f32 %v5524_v8, %v9353_v20 }
 0x453   : > { %v5690_v38 = vmax.f32 %v5658_v14, 0.0  ;;  %v5659_v16 = vadd.f32 %v5627_v12, %v5533_v53 }
 0x454   : > { %v5688_v59 = vmax.f32 %v5656_v58, 0.0  ;;  %v5657_v46 = vadd.f32 %v5625_v9, %v5525_v10  ;;  %v5638_v9 = vld [vmem:[%s7693_s6 + $0xb0] sm:$0xff]  ;;  %v5636_v10 = vld [vmem:[%s7693_s6 + $0xa0] sm:$0xff] }
 0x455   : > { %5722 = vst [vmem:[%s9427_s11 + $0x50] sm:$0xff] %v5690_v38  ;;  %v5691_v36 = vmax.f32 %v5659_v16, 0.0  ;;  %v5639_v16 = vld [vmem:[%s7693_s6 + $0xb8] sm:$0xff] }
 0x456   : > { %5720 = vst [vmem:[%s9427_s11 + $0x40] sm:$0xff] %v5688_v59  ;;  %v5689_v61 = vmax.f32 %v5657_v46, 0.0  ;;  %v7070_v52 = vpop.f32.mrb[12].mxu1 }
 0x457   : > { %5723 = vst [vmem:[%s9427_s11 + $0x58] sm:$0xff] %v5691_v36  ;;  %v5546_v54 = vadd.f32 %v7070_v52, %v9368_v30  ;;  %v5537_v25 = vpop.f32.mrb[13].mxu1 }
 0x458   : > { %5721 = vst [vmem:[%s9427_s11 + $0x48] sm:$0xff] %v5689_v61  ;;  %v5538_v20 = vadd.f32 %v5537_v25, %v9362_v22  ;;  %v7071_v39 = vpop.f32.mrb[14].mxu1  ;;  %v5637_v61 = vld [vmem:[%s7693_s6 + $0xa8] sm:$0xff] }
 0x459   : > { %v5662_v47 = vadd.f32 %v5630_v5, %v5546_v54  ;;  %v5549_v50 = vadd.f32 %v7071_v39, %v9371_v19  ;;  %v5540_v32 = vpop.f32.mrb[15].mxu1 }
 0x45a   : > { %v5660_v57 = vadd.f32 %v5628_v28, %v5538_v20  ;;  %v5541_v30 = vadd.f32 %v5540_v32, %v9365_v40 }
 0x45b   : > { %v5694_v27 = vmax.f32 %v5662_v47, 0.0  ;;  %v5663_v44 = vadd.f32 %v5631_v60, %v5549_v50  ;;  %v5642_v60 = vld [vmem:[%s7693_s6 + $0xd0] sm:$0xff]  ;;  %v5640_v50 = vld [vmem:[%s7693_s6 + $0xc0] sm:$0xff] }
 0x45c   : > { %v5692_v18 = vmax.f32 %v5660_v57, 0.0  ;;  %v5661_v45 = vadd.f32 %v5629_v0, %v5541_v30  ;;  %v5643_v0 = vld [vmem:[%s7693_s6 + $0xd8] sm:$0xff] }
 0x45d   : > { %5726 = vst [vmem:[%s9427_s11 + $0x70] sm:$0xff] %v5694_v27  ;;  %v5695_v22 = vmax.f32 %v5663_v44, 0.0  ;;  %v5641_v44 = vld [vmem:[%s7693_s6 + $0xc8] sm:$0xff] }
 0x45e   : > { %5724 = vst [vmem:[%s9427_s11 + $0x60] sm:$0xff] %v5692_v18  ;;  %v5693_v7 = vmax.f32 %v5661_v45, 0.0  ;;  %v7074_v26 = vpop.f32.mrb[16].mxu1 }
 0x45f   : > { %5727 = vst [vmem:[%s9427_s11 + $0x78] sm:$0xff] %v5695_v22  ;;  %v5562_v19 = vadd.f32 %v7074_v26, %v9380_v51  ;;  %v5553_v37 = vpop.f32.mrb[17].mxu1 }
 0x460   : > { %5725 = vst [vmem:[%s9427_s11 + $0x68] sm:$0xff] %v5693_v7  ;;  %v5554_v40 = vadd.f32 %v5553_v37, %v9374_v1  ;;  %v7075_v2 = vpop.f32.mrb[18].mxu1 }
 0x461   : > { %v5666_v24 = vadd.f32 %v5634_v48, %v5562_v19  ;;  %v5565_v35 = vadd.f32 %v7075_v2, %v9383_v62  ;;  %v5556_v34 = vpop.f32.mrb[19].mxu1 }
 0x462   : > { %v5664_v49 = vadd.f32 %v5632_v21, %v5554_v40  ;;  %v5557_v51 = vadd.f32 %v5556_v34, %v9377_v15  ;;  %v5644_v40 = vld [vmem:[%s7693_s6 + $0xe0] sm:$0xff] }
 0x463   : > { %v5698_v11 = vmax.f32 %v5666_v24, 0.0  ;;  %v5667_v55 = vadd.f32 %v5635_v13, %v5565_v35  ;;  %v5647_v13 = vld [vmem:[%s7693_s6 + $0xf8] sm:$0xff] }
 0x464   : > { %v5696_v12 = vmax.f32 %v5664_v49, 0.0  ;;  %v5665_v14 = vadd.f32 %v5633_v29, %v5557_v51  ;;  %v5645_v29 = vld [vmem:[%s7693_s6 + $0xe8] sm:$0xff] }
 0x465   : > { %5730 = vst [vmem:[%s9427_s11 + $0x90] sm:$0xff] %v5698_v11  ;;  %v5699_v1 = vmax.f32 %v5667_v55, 0.0 }
 0x466   : > { %5728 = vst [vmem:[%s9427_s11 + $0x80] sm:$0xff] %v5696_v12  ;;  %v5697_v53 = vmax.f32 %v5665_v14, 0.0  ;;  %v7078_v8 = vpop.f32.mrb[20].mxu1 }
 0x467   : > { %5731 = vst [vmem:[%s9427_s11 + $0x98] sm:$0xff] %v5699_v1  ;;  %v5578_v62 = vadd.f32 %v7078_v8, %v9392_v6  ;;  %v5569_v58 = vpop.f32.mrb[21].mxu1 }
 0x468   : > { %5729 = vst [vmem:[%s9427_s11 + $0x88] sm:$0xff] %v5697_v53  ;;  %v5570_v15 = vadd.f32 %v5569_v58, %v9386_v4  ;;  %v7079_v38 = vpop.f32.mrb[22].mxu1 }
 0x469   : > { %v5670_v59 = vadd.f32 %v5638_v9, %v5578_v62  ;;  %v5581_v46 = vadd.f32 %v7079_v38, %v9395_v31  ;;  %v5572_v36 = vpop.f32.mrb[23].mxu1 }
 0x46a   : > { %v5668_v52 = vadd.f32 %v5636_v10, %v5570_v15  ;;  %v5573_v6 = vadd.f32 %v5572_v36, %v9389_v33 }
 0x46b   : > { %v5702_v5 = vmax.f32 %v5670_v59, 0.0  ;;  %v5671_v54 = vadd.f32 %v5639_v16, %v5581_v46 }
 0x46c   : > { %v5700_v25 = vmax.f32 %v5668_v52, 0.0  ;;  %v5669_v28 = vadd.f32 %v5637_v61, %v5573_v6 }
 0x46d   : > { %5734 = vst [vmem:[%s9427_s11 + $0xb0] sm:$0xff] %v5702_v5  ;;  %v5703_v4 = vmax.f32 %v5671_v54, 0.0 }
 0x46e   : > { %5732 = vst [vmem:[%s9427_s11 + $0xa0] sm:$0xff] %v5700_v25  ;;  %v5701_v20 = vmax.f32 %v5669_v28, 0.0  ;;  %v7082_v39 = vpop.f32.mrb[24].mxu1 }
 0x46f   : > { %5735 = vst [vmem:[%s9427_s11 + $0xb8] sm:$0xff] %v5703_v4  ;;  %v5594_v31 = vadd.f32 %v7082_v39, %v9404_v43  ;;  %v5585_v47 = vpop.f32.mrb[25].mxu1 }
 0x470   : > { %5733 = vst [vmem:[%s9427_s11 + $0xa8] sm:$0xff] %v5701_v20  ;;  %v5586_v33 = vadd.f32 %v5585_v47, %v9398_v41  ;;  %v7083_v32 = vpop.f32.mrb[26].mxu1 }
 0x471   : > { %v5674_v57 = vadd.f32 %v5642_v60, %v5594_v31  ;;  %v5597_v30 = vadd.f32 %v7083_v32, %v9407_v23  ;;  %v5588_v27 = vpop.f32.mrb[27].mxu1  ;;  %v5646_v23 = vld [vmem:[%s7693_s6 + $0xf0] sm:$0xff] }
 0x472   : > { %v5672_v18 = vadd.f32 %v5640_v50, %v5586_v33  ;;  %v5589_v43 = vadd.f32 %v5588_v27, %v9401_v3 }
 0x473   : > { %v5706_v45 = vmax.f32 %v5674_v57, 0.0  ;;  %v5675_v22 = vadd.f32 %v5643_v0, %v5597_v30 }
 0x474   : > { %v5704_v7 = vmax.f32 %v5672_v18, 0.0  ;;  %v5673_v26 = vadd.f32 %v5641_v44, %v5589_v43 }
 0x475   : > { %5738 = vst [vmem:[%s9427_s11 + $0xd0] sm:$0xff] %v5706_v45  ;;  %v5707_v41 = vmax.f32 %v5675_v22, 0.0 }
 0x476   : > { %5736 = vst [vmem:[%s9427_s11 + $0xc0] sm:$0xff] %v5704_v7  ;;  %v5705_v48 = vmax.f32 %v5673_v26, 0.0  ;;  %v7086_v19 = vpop.f32.mrb[28].mxu1 }
 0x477   : > { %5739 = vst [vmem:[%s9427_s11 + $0xd8] sm:$0xff] %v5707_v41  ;;  %v5610_v37 = vadd.f32 %v7086_v19, %v9423_v17  ;;  %v5601_v21 = vpop.f32.mrb[29].mxu1 }
 0x478   : > { %5737 = vst [vmem:[%s9427_s11 + $0xc8] sm:$0xff] %v5705_v48  ;;  %v5602_v3 = vadd.f32 %v5601_v21, %v9410_v42  ;;  %v7087_v2 = vpop.f32.mrb[30].mxu1 }
 0x479   : > { %v5678_v24 = vadd.f32 %v5646_v23, %v5610_v37  ;;  %v5613_v35 = vadd.f32 %v7087_v2, %v9430_v63  ;;  %v5604_v34 = vpop.f32.mrb[31].mxu1 }
 0x47a   : > { %v5676_v49 = vadd.f32 %v5644_v40, %v5602_v3  ;;  %v5605_v17 = vadd.f32 %v5604_v34, %v9413_v56 }
 0x47b   : > { %v5710_v51 = vmax.f32 %v5678_v24, 0.0  ;;  %v5679_v11 = vadd.f32 %v5647_v13, %v5613_v35 }
 0x47c   : > { %v5708_v42 = vmax.f32 %v5676_v49, 0.0  ;;  %v5677_v55 = vadd.f32 %v5645_v29, %v5605_v17 }
 0x47d   : > { %5742 = vst [vmem:[%s9427_s11 + $0xf0] sm:$0xff] %v5710_v51  ;;  %v5711_v12 = vmax.f32 %v5679_v11, 0.0 }
 0x47e   : > { %5740 = vst [vmem:[%s9427_s11 + $0xe0] sm:$0xff] %v5708_v42  ;;  %v5709_v56 = vmax.f32 %v5677_v55, 0.0 }
 0x47f   : > { %5743 = vst [vmem:[%s9427_s11 + $0xf8] sm:$0xff] %v5711_v12 }
 0x480   : > { %5741 = vst [vmem:[%s9427_s11 + $0xe8] sm:$0xff] %v5709_v56 }
 0x481   : > { %7414 = shalt.err (!%p7411_p2)
}
 0x482   : > { %s7415_s6 = scalar_lea.hbm %s9521_s9, 4096  ;;  %s7419_s8 = scalar_lea.hbm %s9575_s5, 8192 }
 0x483   : > { %p7416_p13 = scmp.ne.s32.totalorder %s9521_s9, %s7415_s6  ;;  %p7420_p4 = scmp.lt.u32.totalorder %s9521_s9, %s9575_s5 }
 0x484   : > { %p7421_p5 = scmp.lt.u32.totalorder %s7419_s8, %s7415_s6  ;;  %p7423_p11 = scmp.lt.u32.totalorder %s7415_s6, %s9521_s9 }
 0x485   : > { %p7417_p6 = pnand %p7416_p13, %p9981_p0 }
 0x486   : > { %p7422_p8 = por %p7421_p5, %p7420_p4 }
 0x487   : > { %p7418_p10 = pneg %p7417_p6 }
 0x488   : > { %p7424_p1 = por %p7423_p11, %p7422_p8 }
 0x48a   : > { %p7425_p3 = pnand %p7424_p1, %p7418_p10 }
 0x48c   : > { %7428 = shalt.err (!%p7425_p3)
}
 0x48d   : > { %s7483_s28 = smov 128   ;;  %s7484_s15 = smov 8  }
 0x48e   : > { %7098 = dma.vmem_to_hbm [thread:$0]  (%p9981_p0), %s9523_s30, 4096, %s9521_s9, %s5745_s22, %s7483_s28, %s7483_s28, %s7484_s15  }
 0x48f PF: > { %s5773_s16 = sand.u32 1, %s7459_s18   ;;  %p9982_p7 = scmp.ne.s32.totalorder %s9712_s25, 0 }
 0x490   : > { %p9983_p9 = scmp.ge.s32.totalorder %s7471_s21, 2  ;;  %s5774_s12 = scalar_lea.sflag [#allocation6], %s5773_s16 }
 0x492   : > { %p7112_p12 = pnand %p9983_p9, %p9982_p7 }
 0x494   : > { %7454 = dma.done.wait (!%p7112_p12), %s5774_s12, 4096  }
 0x495   : > { %7456 = vsyncadd (!%p7112_p12), %s5774_s12, 4294963200  ;;  %p19_p2 = scmp.ge.s32.totalorder %s7625_s14, 4   ;;  %s9984_s18 = smov %s7463_s19 }
 0x496   : > { %s9985_s19 = smov %s7467_s20  ;;  %s9986_s20 = smov %s7641_s27 }
 0x497   : > { %s9987_s21 = smov %s7625_s14  ;;  %21 = sbr.rel (!%p19_p2) target bundleno = 6 (0x6), region = 93 }
 0x49e   :  { %5779 = vsyncpa [#allocation5], 1 }
 0x49f   :  { %5781 = vsyncpa [#allocation5 + $0x1], 1 }
 0x4a0   :  { %5782 = vsyncpa [#allocation8], 1 }
 0x4a1   :  { %5783 = vsyncpa [#allocation6], 1 }
 0x4a2   :  { %5785 = vsyncpa [#allocation6 + $0x1], 1 }

</bundles_post_ra>
